<compile_context>
chip_gen: v6e
topology: v6e:2x2x1
jax: 0.10.0
libtpu: 0.0.40
codegen_flags: <defaults>
</compile_context>

<pallas_src>
import functools

import jax
import jax.numpy as jnp
from jax.experimental import pallas as pl
from jax.experimental.pallas import tpu as pltpu

EPS = 1e-5


def _resblock_kernel(x_ref, w1_ref, w2_ref, w3_ref, ws_ref, sh_ref,
                     g1_ref, b1_ref, g2_ref, b2_ref,
                     g3_ref, b3_ref, gs_ref, bs_ref,
                     gm_ref, gmt_ref, go_ref, got_ref,
                     out_ref, *, count):
    f32 = jnp.float32
    bf16 = jnp.bfloat16
    exact = jax.lax.Precision.HIGHEST
    inv_count = 1.0 / count

    def bn(t, gamma, beta, g_mat, gt_mat, relu):
        """Training-mode BatchNorm2d on a folded (N*H, W*C) tensor, folded
        into one per-channel FMA.  Single-pass stats; the tiny (1, .) group
        reductions over the W replicas of the lane axis use exact matmuls
        against 0/1 operators (negligible cost, keeps stats f32-accurate)."""
        s = jnp.sum(t, axis=0, keepdims=True)                 # (1, W*C)
        sq = jnp.sum(t * t, axis=0, keepdims=True)            # (1, W*C)
        s_c = jnp.dot(s, g_mat, preferred_element_type=f32, precision=exact)
        sq_c = jnp.dot(sq, g_mat, preferred_element_type=f32, precision=exact)
        mean = s_c * inv_count                                # (1, C)
        var = sq_c * inv_count - mean * mean                  # biased, like torch
        a = gamma * jax.lax.rsqrt(var + EPS)                  # (1, C)
        b = beta - mean * a
        a_f = jnp.dot(a, gt_mat, preferred_element_type=f32, precision=exact)
        b_f = jnp.dot(b, gt_mat, preferred_element_type=f32, precision=exact)
        out = t * a_f + b_f                                   # one FMA pass
        return jnp.maximum(out, 0.0) if relu else out

    x = x_ref[...]                                            # (N*H, W*Cin) bf16

    # ---- conv1 (1x1) -> bn1 -> relu : block-diagonal matmul ---------------
    h1 = jnp.dot(x, w1_ref[...], preferred_element_type=f32)
    h1 = bn(h1, g1_ref[...], b1_ref[...], gm_ref[...], gmt_ref[...], True)
    h1b = h1.astype(bf16)

    # ---- conv2 (3x3, pad=1): dy via shift/mask matmuls on the left, -------
    # ---- (dx, channel) taps folded into banded matrices on the right ------
    acc = jnp.dot(h1b, w2_ref[1], preferred_element_type=f32)           # dy = 0
    up = jnp.dot(sh_ref[0], h1b, preferred_element_type=f32)            # rows y-1
    acc = acc + jnp.dot(up.astype(bf16), w2_ref[0], preferred_element_type=f32)
    dn = jnp.dot(sh_ref[1], h1b, preferred_element_type=f32)            # rows y+1
    acc = acc + jnp.dot(dn.astype(bf16), w2_ref[2], preferred_element_type=f32)
    h2 = bn(acc, g2_ref[...], b2_ref[...], gm_ref[...], gmt_ref[...], True)

    # ---- conv3 (1x1) -> bn3 -------------------------------------------------
    h3 = jnp.dot(h2.astype(bf16), w3_ref[...], preferred_element_type=f32)
    h3 = bn(h3, g3_ref[...], b3_ref[...], go_ref[...], got_ref[...], False)

    # ---- shortcut: 1x1 conv -> bn -------------------------------------------
    sc = jnp.dot(x, ws_ref[...], preferred_element_type=f32)
    sc = bn(sc, gs_ref[...], bs_ref[...], go_ref[...], got_ref[...], False)

    # ---- residual add + relu (lane-dense (N*H, W*Cout) store) ---------------
    out_ref[...] = jnp.maximum(h3 + sc, 0.0)


def residual_block_forward(x_nchw, params, stride=1):
    """Forward pass of ResidualBlock(in_channels, out_channels, stride=1)."""
    if stride != 1:
        # TODO(synk): stride > 1 (strided row/col selection in the folded layout) not implemented.
        raise NotImplementedError("stride != 1 not implemented")

    n, cin, hh, ww = x_nchw.shape
    w1, g1, b1, w2, g2, b2, w3, g3, b3, ws, gs, bs = params
    cm = w1.shape[0]          # out_channels // 4
    cout = w3.shape[0]        # out_channels
    nh = n * hh
    f32, bf16 = jnp.float32, jnp.bfloat16

    # ---- layout: NCHW -> folded (N*H, W*C) so W*C is the 128-lane axis ------
    # TODO(synk): accepting NHWC (or the folded layout) at the module boundary
    # would avoid this extra HBM round trip for the activation tensor.
    x_f = (jnp.transpose(x_nchw, (0, 2, 3, 1))
           .reshape(nh, ww * cin).astype(bf16))

    # ---- weight repacking (tiny, plain JAX; constant per weight set) --------
    eye_w = jnp.eye(ww, dtype=f32)
    w1b = jnp.kron(eye_w, w1[:, :, 0, 0].T.astype(f32)).astype(bf16)   # (W*Cin, W*Cm)
    w3b = jnp.kron(eye_w, w3[:, :, 0, 0].T.astype(f32)).astype(bf16)   # (W*Cm, W*Cout)
    wsb = jnp.kron(eye_w, ws[:, :, 0, 0].T.astype(f32)).astype(bf16)   # (W*Cin, W*Cout)

    # conv2: one banded (W*Cm, W*Cm) matrix per dy, folding the three dx taps
    # and the channel contraction; zero padding at x = 0 / W-1 falls out of
    # the band structure.
    w2b = jnp.stack([
        sum(jnp.kron(jnp.eye(ww, k=-(kx - 1), dtype=f32),
                     w2[:, :, ky, kx].T.astype(f32)) for kx in range(3))
        for ky in range(3)]).astype(bf16)                               # (3, W*Cm, W*Cm)

    # dy = -1 / +1 row-shift operators with the image-boundary mask baked in.
    r = jnp.arange(nh)
    y = r % hh

    def shift_mat(dy):
        valid = (y + dy >= 0) & (y + dy < hh)
        return ((r[None, :] == r[:, None] + dy) & valid[:, None]).astype(f32)

    sh = jnp.stack([shift_mat(-1), shift_mat(1)]).astype(bf16)          # (2, N*H, N*H)

    # per-channel group-reduce / broadcast operators over the folded lane axis
    gm = jnp.tile(jnp.eye(cm, dtype=f32), (ww, 1))                      # (W*Cm, Cm)
    go = jnp.tile(jnp.eye(cout, dtype=f32), (ww, 1))                    # (W*Cout, Cout)

    vec = lambda p: p.reshape(1, -1).astype(f32)

    inputs = (x_f, w1b, w2b, w3b, wsb, sh,
              vec(g1), vec(b1), vec(g2), vec(b2),
              vec(g3), vec(b3), vec(gs), vec(bs),
              gm, gm.T, go, go.T)

    def full_spec(a):
        nd = a.ndim
        return pl.BlockSpec(a.shape, lambda i, _nd=nd: (0,) * _nd)

    kernel = functools.partial(_resblock_kernel, count=float(n * hh * ww))

    out_f = pl.pallas_call(
        kernel,
        out_shape=jax.ShapeDtypeStruct((nh, ww * cout), f32),
        grid=(1,),
        in_specs=[full_spec(a) for a in inputs],
        out_specs=pl.BlockSpec((nh, ww * cout), lambda i: (0, 0)),
        compiler_params=pltpu.CompilerParams(
            dimension_semantics=("arbitrary",)),
    )(*inputs)

    return jnp.transpose(out_f.reshape(n, hh, ww, cout), (0, 3, 1, 2))


# ---------------- pure-JAX reference (for correctness check) ----------------
def residual_block_ref(x, params):
    """Reference.  Conv inputs are rounded to bf16 (mirroring the kernel's
    single-pass bf16-input MXU matmuls) and accumulated in f32, so the
    comparison isolates the structural correctness of the Pallas kernel."""
    w1, g1, b1, w2, g2, b2, w3, g3, b3, ws, gs, bs = params
    rnd = lambda a: a.astype(jnp.bfloat16).astype(jnp.float32)

    def conv(inp, wgt, pad=0):
        return jax.lax.conv_general_dilated(
            rnd(inp), rnd(wgt), window_strides=(1, 1),
            padding=[(pad, pad), (pad, pad)],
            dimension_numbers=("NCHW", "OIHW", "NCHW"),
            precision=jax.lax.Precision.HIGHEST)

    def bn(inp, g, b):
        mu = jnp.mean(inp, axis=(0, 2, 3), keepdims=True)
        var = jnp.mean((inp - mu) ** 2, axis=(0, 2, 3), keepdims=True)
        return ((inp - mu) * jax.lax.rsqrt(var + EPS)
                * g.reshape(1, -1, 1, 1) + b.reshape(1, -1, 1, 1))

    out = jax.nn.relu(bn(conv(x, w1), g1, b1))
    out = jax.nn.relu(bn(conv(out, w2, pad=1), g2, b2))
    out = bn(conv(out, w3), g3, b3)
    sc = bn(conv(x, ws), gs, bs)
    return jax.nn.relu(out + sc)


if __name__ == "__main__":
    # ResidualBlock(in_channels=8, out_channels=16, stride=1): in != out, so
    # the shortcut is conv1x1 + BN (the case this kernel implements).
    N, CIN, COUT, H, W = 2, 8, 16, 16, 16
    CM = COUT // 4

    key = jax.random.PRNGKey(0)
    keys = jax.random.split(key, 13)
    x = jax.random.normal(keys[0], (N, CIN, H, W), jnp.float32)

    w1 = 0.3 * jax.random.normal(keys[1], (CM, CIN, 1, 1), jnp.float32)
    g1 = 1.0 + 0.1 * jax.random.normal(keys[2], (CM,), jnp.float32)
    b1 = 0.1 * jax.random.normal(keys[3], (CM,), jnp.float32)
    w2 = 0.3 * jax.random.normal(keys[4], (CM, CM, 3, 3), jnp.float32)
    g2 = 1.0 + 0.1 * jax.random.normal(keys[5], (CM,), jnp.float32)
    b2 = 0.1 * jax.random.normal(keys[6], (CM,), jnp.float32)
    w3 = 0.3 * jax.random.normal(keys[7], (COUT, CM, 1, 1), jnp.float32)
    g3 = 1.0 + 0.1 * jax.random.normal(keys[8], (COUT,), jnp.float32)
    b3 = 0.1 * jax.random.normal(keys[9], (COUT,), jnp.float32)
    ws = 0.3 * jax.random.normal(keys[10], (COUT, CIN, 1, 1), jnp.float32)
    gs = 1.0 + 0.1 * jax.random.normal(keys[11], (COUT,), jnp.float32)
    bs = 0.1 * jax.random.normal(keys[12], (COUT,), jnp.float32)
    params = (w1, g1, b1, w2, g2, b2, w3, g3, b3, ws, gs, bs)

    out = jax.block_until_ready(jax.jit(residual_block_forward)(x, params))
    ref = jax.block_until_ready(residual_block_ref(x, params))

    assert out.shape == (N, COUT, H, W), out.shape
    # Max-abs bound covers rare bf16 double-rounding flips of intermediate
    # activations between kernel and reference; relative-RMS is the tight
    # structural check.
    max_err = float(jnp.max(jnp.abs(out - ref)))
    rel_rms = float(jnp.sqrt(jnp.mean((out - ref) ** 2) /
                             (jnp.mean(ref ** 2) + 1e-12)))
    assert max_err < 2e-2, f"max abs error {max_err}"
    assert rel_rms < 2e-3, f"relative rms error {rel_rms}"
    print("KERNEL_OK")
</pallas_src>

<mosaic_0001>
module attributes {stable_mosaic.version = 11 : i64} {
  func.func @_resblock_kernel(%arg0: i32, %arg1: memref<32x128xbf16, #tpu.memory_space<vmem>>, %arg2: memref<128x64xbf16, #tpu.memory_space<vmem>>, %arg3: memref<3x64x64xbf16, #tpu.memory_space<vmem>>, %arg4: memref<64x256xbf16, #tpu.memory_space<vmem>>, %arg5: memref<128x256xbf16, #tpu.memory_space<vmem>>, %arg6: memref<2x32x32xbf16, #tpu.memory_space<vmem>>, %arg7: memref<1x4xf32, #tpu.memory_space<vmem>>, %arg8: memref<1x4xf32, #tpu.memory_space<vmem>>, %arg9: memref<1x4xf32, #tpu.memory_space<vmem>>, %arg10: memref<1x4xf32, #tpu.memory_space<vmem>>, %arg11: memref<1x16xf32, #tpu.memory_space<vmem>>, %arg12: memref<1x16xf32, #tpu.memory_space<vmem>>, %arg13: memref<1x16xf32, #tpu.memory_space<vmem>>, %arg14: memref<1x16xf32, #tpu.memory_space<vmem>>, %arg15: memref<64x4xf32, #tpu.memory_space<vmem>>, %arg16: memref<4x64xf32, #tpu.memory_space<vmem>>, %arg17: memref<256x16xf32, #tpu.memory_space<vmem>>, %arg18: memref<16x256xf32, #tpu.memory_space<vmem>>, %arg19: memref<32x256xf32, #tpu.memory_space<vmem>>) attributes {dimension_semantics = [#tpu.dimension_semantics<arbitrary>], iteration_bounds = array<i64: 1>, scalar_prefetch = 0 : i64, scratch_operands = 0 : i64, tpu.core_type = #tpu.core_type<tc>, window_params = [{pipeline_mode = #tpu.pipeline_mode<synchronous>, transform_indices = @transform_0, window_bounds = array<i64: 32, 128>}, {pipeline_mode = #tpu.pipeline_mode<synchronous>, transform_indices = @transform_1, window_bounds = array<i64: 128, 64>}, {pipeline_mode = #tpu.pipeline_mode<synchronous>, transform_indices = @transform_2, window_bounds = array<i64: 3, 64, 64>}, {pipeline_mode = #tpu.pipeline_mode<synchronous>, transform_indices = @transform_3, window_bounds = array<i64: 64, 256>}, {pipeline_mode = #tpu.pipeline_mode<synchronous>, transform_indices = @transform_4, window_bounds = array<i64: 128, 256>}, {pipeline_mode = #tpu.pipeline_mode<synchronous>, transform_indices = @transform_5, window_bounds = array<i64: 2, 32, 32>}, {pipeline_mode = #tpu.pipeline_mode<synchronous>, transform_indices = @transform_6, window_bounds = array<i64: 1, 4>}, {pipeline_mode = #tpu.pipeline_mode<synchronous>, transform_indices = @transform_7, window_bounds = array<i64: 1, 4>}, {pipeline_mode = #tpu.pipeline_mode<synchronous>, transform_indices = @transform_8, window_bounds = array<i64: 1, 4>}, {pipeline_mode = #tpu.pipeline_mode<synchronous>, transform_indices = @transform_9, window_bounds = array<i64: 1, 4>}, {pipeline_mode = #tpu.pipeline_mode<synchronous>, transform_indices = @transform_10, window_bounds = array<i64: 1, 16>}, {pipeline_mode = #tpu.pipeline_mode<synchronous>, transform_indices = @transform_11, window_bounds = array<i64: 1, 16>}, {pipeline_mode = #tpu.pipeline_mode<synchronous>, transform_indices = @transform_12, window_bounds = array<i64: 1, 16>}, {pipeline_mode = #tpu.pipeline_mode<synchronous>, transform_indices = @transform_13, window_bounds = array<i64: 1, 16>}, {pipeline_mode = #tpu.pipeline_mode<synchronous>, transform_indices = @transform_14, window_bounds = array<i64: 64, 4>}, {pipeline_mode = #tpu.pipeline_mode<synchronous>, transform_indices = @transform_15, window_bounds = array<i64: 4, 64>}, {pipeline_mode = #tpu.pipeline_mode<synchronous>, transform_indices = @transform_16, window_bounds = array<i64: 256, 16>}, {pipeline_mode = #tpu.pipeline_mode<synchronous>, transform_indices = @transform_17, window_bounds = array<i64: 16, 256>}, {pipeline_mode = #tpu.pipeline_mode<synchronous>, transform_indices = @transform_18, window_bounds = array<i64: 32, 256>}]} {
    %c0 = arith.constant 0 : index
    %c0_0 = arith.constant 0 : index
    %0 = vector.load %arg1[%c0, %c0_0] : memref<32x128xbf16, #tpu.memory_space<vmem>>, vector<32x128xbf16>
    %c0_1 = arith.constant 0 : index
    %c0_2 = arith.constant 0 : index
    %1 = vector.load %arg2[%c0_1, %c0_2] : memref<128x64xbf16, #tpu.memory_space<vmem>>, vector<128x64xbf16>
    %cst = arith.constant dense<0.000000e+00> : vector<32x64xf32>
    %2 = tpu.matmul %0, %1, %cst {dimension_numbers = #tpu.dot_dimension_numbers<[1], [0], [0], [1], [0, 0, 1, 1], [], []>} : vector<32x128xbf16>, vector<128x64xbf16>, vector<32x64xf32> -> vector<32x64xf32>
    %c0_3 = arith.constant 0 : index
    %c0_4 = arith.constant 0 : index
    %3 = vector.load %arg7[%c0_3, %c0_4] : memref<1x4xf32, #tpu.memory_space<vmem>>, vector<1x4xf32>
    %c0_5 = arith.constant 0 : index
    %c0_6 = arith.constant 0 : index
    %4 = vector.load %arg8[%c0_5, %c0_6] : memref<1x4xf32, #tpu.memory_space<vmem>>, vector<1x4xf32>
    %c0_7 = arith.constant 0 : index
    %c0_8 = arith.constant 0 : index
    %5 = vector.load %arg15[%c0_7, %c0_8] : memref<64x4xf32, #tpu.memory_space<vmem>>, vector<64x4xf32>
    %c0_9 = arith.constant 0 : index
    %c0_10 = arith.constant 0 : index
    %6 = vector.load %arg16[%c0_9, %c0_10] : memref<4x64xf32, #tpu.memory_space<vmem>>, vector<4x64xf32>
    %cst_11 = arith.constant dense<0.000000e+00> : vector<64xf32>
    %7 = vector.multi_reduction <add>, %2, %cst_11 [0] : vector<32x64xf32> to vector<64xf32>
    %8 = vector.shape_cast %7 : vector<64xf32> to vector<1x64xf32>
    %9 = arith.mulf %2, %2 : vector<32x64xf32>
    %cst_12 = arith.constant dense<0.000000e+00> : vector<64xf32>
    %10 = vector.multi_reduction <add>, %9, %cst_12 [0] : vector<32x64xf32> to vector<64xf32>
    %11 = vector.shape_cast %10 : vector<64xf32> to vector<1x64xf32>
    %cst_13 = arith.constant dense<0.000000e+00> : vector<1x4xf32>
    %12 = tpu.matmul %8, %5, %cst_13 {dimension_numbers = #tpu.dot_dimension_numbers<[1], [0], [0], [1], [0, 0, 1, 1], [], []>, precision = #tpu.contract_precision<fp32>} : vector<1x64xf32>, vector<64x4xf32>, vector<1x4xf32> -> vector<1x4xf32>
    %cst_14 = arith.constant dense<0.000000e+00> : vector<1x4xf32>
    %13 = tpu.matmul %11, %5, %cst_14 {dimension_numbers = #tpu.dot_dimension_numbers<[1], [0], [0], [1], [0, 0, 1, 1], [], []>, precision = #tpu.contract_precision<fp32>} : vector<1x64xf32>, vector<64x4xf32>, vector<1x4xf32> -> vector<1x4xf32>
    %cst_15 = arith.constant 0.001953125 : f32
    %14 = vector.broadcast %cst_15 : f32 to vector<1x4xf32>
    %15 = arith.mulf %12, %14 : vector<1x4xf32>
    %cst_16 = arith.constant 0.001953125 : f32
    %16 = vector.broadcast %cst_16 : f32 to vector<1x4xf32>
    %17 = arith.mulf %13, %16 : vector<1x4xf32>
    %18 = arith.mulf %15, %15 : vector<1x4xf32>
    %19 = arith.subf %17, %18 : vector<1x4xf32>
    %cst_17 = arith.constant 9.99999974E-6 : f32
    %20 = vector.broadcast %cst_17 : f32 to vector<1x4xf32>
    %21 = arith.addf %19, %20 : vector<1x4xf32>
    %22 = math.rsqrt %21 : vector<1x4xf32>
    %23 = arith.mulf %3, %22 : vector<1x4xf32>
    %24 = arith.mulf %15, %23 : vector<1x4xf32>
    %25 = arith.subf %4, %24 : vector<1x4xf32>
    %cst_18 = arith.constant dense<0.000000e+00> : vector<1x64xf32>
    %26 = tpu.matmul %23, %6, %cst_18 {dimension_numbers = #tpu.dot_dimension_numbers<[1], [0], [0], [1], [0, 0, 1, 1], [], []>, precision = #tpu.contract_precision<fp32>} : vector<1x4xf32>, vector<4x64xf32>, vector<1x64xf32> -> vector<1x64xf32>
    %cst_19 = arith.constant dense<0.000000e+00> : vector<1x64xf32>
    %27 = tpu.matmul %25, %6, %cst_19 {dimension_numbers = #tpu.dot_dimension_numbers<[1], [0], [0], [1], [0, 0, 1, 1], [], []>, precision = #tpu.contract_precision<fp32>} : vector<1x4xf32>, vector<4x64xf32>, vector<1x64xf32> -> vector<1x64xf32>
    %28 = vector.broadcast %26 : vector<1x64xf32> to vector<32x64xf32>
    %29 = arith.mulf %2, %28 : vector<32x64xf32>
    %30 = vector.broadcast %27 : vector<1x64xf32> to vector<32x64xf32>
    %31 = arith.addf %29, %30 : vector<32x64xf32>
    %cst_20 = arith.constant 0.000000e+00 : f32
    %32 = vector.broadcast %cst_20 : f32 to vector<32x64xf32>
    %33 = arith.maximumf %31, %32 : vector<32x64xf32>
    %34 = arith.truncf %33 : vector<32x64xf32> to vector<32x64xbf16>
    %c1 = arith.constant 1 : index
    %c0_21 = arith.constant 0 : index
    %c0_22 = arith.constant 0 : index
    %35 = vector.load %arg3[%c1, %c0_21, %c0_22] : memref<3x64x64xbf16, #tpu.memory_space<vmem>>, vector<1x64x64xbf16>
    %36 = vector.shape_cast %35 : vector<1x64x64xbf16> to vector<64x64xbf16>
    %cst_23 = arith.constant dense<0.000000e+00> : vector<32x64xf32>
    %37 = tpu.matmul %34, %36, %cst_23 {dimension_numbers = #tpu.dot_dimension_numbers<[1], [0], [0], [1], [0, 0, 1, 1], [], []>} : vector<32x64xbf16>, vector<64x64xbf16>, vector<32x64xf32> -> vector<32x64xf32>
    %c0_24 = arith.constant 0 : index
    %c0_25 = arith.constant 0 : index
    %c0_26 = arith.constant 0 : index
    %38 = vector.load %arg6[%c0_24, %c0_25, %c0_26] : memref<2x32x32xbf16, #tpu.memory_space<vmem>>, vector<1x32x32xbf16>
    %39 = vector.shape_cast %38 : vector<1x32x32xbf16> to vector<32x32xbf16>
    %cst_27 = arith.constant dense<0.000000e+00> : vector<32x64xf32>
    %40 = tpu.matmul %39, %34, %cst_27 {dimension_numbers = #tpu.dot_dimension_numbers<[1], [0], [0], [1], [0, 0, 1, 1], [], []>} : vector<32x32xbf16>, vector<32x64xbf16>, vector<32x64xf32> -> vector<32x64xf32>
    %41 = arith.truncf %40 : vector<32x64xf32> to vector<32x64xbf16>
    %c0_28 = arith.constant 0 : index
    %c0_29 = arith.constant 0 : index
    %c0_30 = arith.constant 0 : index
    %42 = vector.load %arg3[%c0_28, %c0_29, %c0_30] : memref<3x64x64xbf16, #tpu.memory_space<vmem>>, vector<1x64x64xbf16>
    %43 = vector.shape_cast %42 : vector<1x64x64xbf16> to vector<64x64xbf16>
    %cst_31 = arith.constant dense<0.000000e+00> : vector<32x64xf32>
    %44 = tpu.matmul %41, %43, %cst_31 {dimension_numbers = #tpu.dot_dimension_numbers<[1], [0], [0], [1], [0, 0, 1, 1], [], []>} : vector<32x64xbf16>, vector<64x64xbf16>, vector<32x64xf32> -> vector<32x64xf32>
    %45 = arith.addf %37, %44 : vector<32x64xf32>
    %c1_32 = arith.constant 1 : index
    %c0_33 = arith.constant 0 : index
    %c0_34 = arith.constant 0 : index
    %46 = vector.load %arg6[%c1_32, %c0_33, %c0_34] : memref<2x32x32xbf16, #tpu.memory_space<vmem>>, vector<1x32x32xbf16>
    %47 = vector.shape_cast %46 : vector<1x32x32xbf16> to vector<32x32xbf16>
    %cst_35 = arith.constant dense<0.000000e+00> : vector<32x64xf32>
    %48 = tpu.matmul %47, %34, %cst_35 {dimension_numbers = #tpu.dot_dimension_numbers<[1], [0], [0], [1], [0, 0, 1, 1], [], []>} : vector<32x32xbf16>, vector<32x64xbf16>, vector<32x64xf32> -> vector<32x64xf32>
    %49 = arith.truncf %48 : vector<32x64xf32> to vector<32x64xbf16>
    %c2 = arith.constant 2 : index
    %c0_36 = arith.constant 0 : index
    %c0_37 = arith.constant 0 : index
    %50 = vector.load %arg3[%c2, %c0_36, %c0_37] : memref<3x64x64xbf16, #tpu.memory_space<vmem>>, vector<1x64x64xbf16>
    %51 = vector.shape_cast %50 : vector<1x64x64xbf16> to vector<64x64xbf16>
    %cst_38 = arith.constant dense<0.000000e+00> : vector<32x64xf32>
    %52 = tpu.matmul %49, %51, %cst_38 {dimension_numbers = #tpu.dot_dimension_numbers<[1], [0], [0], [1], [0, 0, 1, 1], [], []>} : vector<32x64xbf16>, vector<64x64xbf16>, vector<32x64xf32> -> vector<32x64xf32>
    %53 = arith.addf %45, %52 : vector<32x64xf32>
    %c0_39 = arith.constant 0 : index
    %c0_40 = arith.constant 0 : index
    %54 = vector.load %arg9[%c0_39, %c0_40] : memref<1x4xf32, #tpu.memory_space<vmem>>, vector<1x4xf32>
    %c0_41 = arith.constant 0 : index
    %c0_42 = arith.constant 0 : index
    %55 = vector.load %arg10[%c0_41, %c0_42] : memref<1x4xf32, #tpu.memory_space<vmem>>, vector<1x4xf32>
    %c0_43 = arith.constant 0 : index
    %c0_44 = arith.constant 0 : index
    %56 = vector.load %arg15[%c0_43, %c0_44] : memref<64x4xf32, #tpu.memory_space<vmem>>, vector<64x4xf32>
    %c0_45 = arith.constant 0 : index
    %c0_46 = arith.constant 0 : index
    %57 = vector.load %arg16[%c0_45, %c0_46] : memref<4x64xf32, #tpu.memory_space<vmem>>, vector<4x64xf32>
    %cst_47 = arith.constant dense<0.000000e+00> : vector<64xf32>
    %58 = vector.multi_reduction <add>, %53, %cst_47 [0] : vector<32x64xf32> to vector<64xf32>
    %59 = vector.shape_cast %58 : vector<64xf32> to vector<1x64xf32>
    %60 = arith.mulf %53, %53 : vector<32x64xf32>
    %cst_48 = arith.constant dense<0.000000e+00> : vector<64xf32>
    %61 = vector.multi_reduction <add>, %60, %cst_48 [0] : vector<32x64xf32> to vector<64xf32>
    %62 = vector.shape_cast %61 : vector<64xf32> to vector<1x64xf32>
    %cst_49 = arith.constant dense<0.000000e+00> : vector<1x4xf32>
    %63 = tpu.matmul %59, %56, %cst_49 {dimension_numbers = #tpu.dot_dimension_numbers<[1], [0], [0], [1], [0, 0, 1, 1], [], []>, precision = #tpu.contract_precision<fp32>} : vector<1x64xf32>, vector<64x4xf32>, vector<1x4xf32> -> vector<1x4xf32>
    %cst_50 = arith.constant dense<0.000000e+00> : vector<1x4xf32>
    %64 = tpu.matmul %62, %56, %cst_50 {dimension_numbers = #tpu.dot_dimension_numbers<[1], [0], [0], [1], [0, 0, 1, 1], [], []>, precision = #tpu.contract_precision<fp32>} : vector<1x64xf32>, vector<64x4xf32>, vector<1x4xf32> -> vector<1x4xf32>
    %cst_51 = arith.constant 0.001953125 : f32
    %65 = vector.broadcast %cst_51 : f32 to vector<1x4xf32>
    %66 = arith.mulf %63, %65 : vector<1x4xf32>
    %cst_52 = arith.constant 0.001953125 : f32
    %67 = vector.broadcast %cst_52 : f32 to vector<1x4xf32>
    %68 = arith.mulf %64, %67 : vector<1x4xf32>
    %69 = arith.mulf %66, %66 : vector<1x4xf32>
    %70 = arith.subf %68, %69 : vector<1x4xf32>
    %cst_53 = arith.constant 9.99999974E-6 : f32
    %71 = vector.broadcast %cst_53 : f32 to vector<1x4xf32>
    %72 = arith.addf %70, %71 : vector<1x4xf32>
    %73 = math.rsqrt %72 : vector<1x4xf32>
    %74 = arith.mulf %54, %73 : vector<1x4xf32>
    %75 = arith.mulf %66, %74 : vector<1x4xf32>
    %76 = arith.subf %55, %75 : vector<1x4xf32>
    %cst_54 = arith.constant dense<0.000000e+00> : vector<1x64xf32>
    %77 = tpu.matmul %74, %57, %cst_54 {dimension_numbers = #tpu.dot_dimension_numbers<[1], [0], [0], [1], [0, 0, 1, 1], [], []>, precision = #tpu.contract_precision<fp32>} : vector<1x4xf32>, vector<4x64xf32>, vector<1x64xf32> -> vector<1x64xf32>
    %cst_55 = arith.constant dense<0.000000e+00> : vector<1x64xf32>
    %78 = tpu.matmul %76, %57, %cst_55 {dimension_numbers = #tpu.dot_dimension_numbers<[1], [0], [0], [1], [0, 0, 1, 1], [], []>, precision = #tpu.contract_precision<fp32>} : vector<1x4xf32>, vector<4x64xf32>, vector<1x64xf32> -> vector<1x64xf32>
    %79 = vector.broadcast %77 : vector<1x64xf32> to vector<32x64xf32>
    %80 = arith.mulf %53, %79 : vector<32x64xf32>
    %81 = vector.broadcast %78 : vector<1x64xf32> to vector<32x64xf32>
    %82 = arith.addf %80, %81 : vector<32x64xf32>
    %cst_56 = arith.constant 0.000000e+00 : f32
    %83 = vector.broadcast %cst_56 : f32 to vector<32x64xf32>
    %84 = arith.maximumf %82, %83 : vector<32x64xf32>
    %85 = arith.truncf %84 : vector<32x64xf32> to vector<32x64xbf16>
    %c0_57 = arith.constant 0 : index
    %c0_58 = arith.constant 0 : index
    %86 = vector.load %arg4[%c0_57, %c0_58] : memref<64x256xbf16, #tpu.memory_space<vmem>>, vector<64x256xbf16>
    %cst_59 = arith.constant dense<0.000000e+00> : vector<32x256xf32>
    %87 = tpu.matmul %85, %86, %cst_59 {dimension_numbers = #tpu.dot_dimension_numbers<[1], [0], [0], [1], [0, 0, 1, 1], [], []>} : vector<32x64xbf16>, vector<64x256xbf16>, vector<32x256xf32> -> vector<32x256xf32>
    %c0_60 = arith.constant 0 : index
    %c0_61 = arith.constant 0 : index
    %88 = vector.load %arg11[%c0_60, %c0_61] : memref<1x16xf32, #tpu.memory_space<vmem>>, vector<1x16xf32>
    %c0_62 = arith.constant 0 : index
    %c0_63 = arith.constant 0 : index
    %89 = vector.load %arg12[%c0_62, %c0_63] : memref<1x16xf32, #tpu.memory_space<vmem>>, vector<1x16xf32>
    %c0_64 = arith.constant 0 : index
    %c0_65 = arith.constant 0 : index
    %90 = vector.load %arg17[%c0_64, %c0_65] : memref<256x16xf32, #tpu.memory_space<vmem>>, vector<256x16xf32>
    %c0_66 = arith.constant 0 : index
    %c0_67 = arith.constant 0 : index
    %91 = vector.load %arg18[%c0_66, %c0_67] : memref<16x256xf32, #tpu.memory_space<vmem>>, vector<16x256xf32>
    %cst_68 = arith.constant dense<0.000000e+00> : vector<256xf32>
    %92 = vector.multi_reduction <add>, %87, %cst_68 [0] : vector<32x256xf32> to vector<256xf32>
    %93 = vector.shape_cast %92 : vector<256xf32> to vector<1x256xf32>
    %94 = arith.mulf %87, %87 : vector<32x256xf32>
    %cst_69 = arith.constant dense<0.000000e+00> : vector<256xf32>
    %95 = vector.multi_reduction <add>, %94, %cst_69 [0] : vector<32x256xf32> to vector<256xf32>
    %96 = vector.shape_cast %95 : vector<256xf32> to vector<1x256xf32>
    %cst_70 = arith.constant dense<0.000000e+00> : vector<1x16xf32>
    %97 = tpu.matmul %93, %90, %cst_70 {dimension_numbers = #tpu.dot_dimension_numbers<[1], [0], [0], [1], [0, 0, 1, 1], [], []>, precision = #tpu.contract_precision<fp32>} : vector<1x256xf32>, vector<256x16xf32>, vector<1x16xf32> -> vector<1x16xf32>
    %cst_71 = arith.constant dense<0.000000e+00> : vector<1x16xf32>
    %98 = tpu.matmul %96, %90, %cst_71 {dimension_numbers = #tpu.dot_dimension_numbers<[1], [0], [0], [1], [0, 0, 1, 1], [], []>, precision = #tpu.contract_precision<fp32>} : vector<1x256xf32>, vector<256x16xf32>, vector<1x16xf32> -> vector<1x16xf32>
    %cst_72 = arith.constant 0.001953125 : f32
    %99 = vector.broadcast %cst_72 : f32 to vector<1x16xf32>
    %100 = arith.mulf %97, %99 : vector<1x16xf32>
    %cst_73 = arith.constant 0.001953125 : f32
    %101 = vector.broadcast %cst_73 : f32 to vector<1x16xf32>
    %102 = arith.mulf %98, %101 : vector<1x16xf32>
    %103 = arith.mulf %100, %100 : vector<1x16xf32>
    %104 = arith.subf %102, %103 : vector<1x16xf32>
    %cst_74 = arith.constant 9.99999974E-6 : f32
    %105 = vector.broadcast %cst_74 : f32 to vector<1x16xf32>
    %106 = arith.addf %104, %105 : vector<1x16xf32>
    %107 = math.rsqrt %106 : vector<1x16xf32>
    %108 = arith.mulf %88, %107 : vector<1x16xf32>
    %109 = arith.mulf %100, %108 : vector<1x16xf32>
    %110 = arith.subf %89, %109 : vector<1x16xf32>
    %cst_75 = arith.constant dense<0.000000e+00> : vector<1x256xf32>
    %111 = tpu.matmul %108, %91, %cst_75 {dimension_numbers = #tpu.dot_dimension_numbers<[1], [0], [0], [1], [0, 0, 1, 1], [], []>, precision = #tpu.contract_precision<fp32>} : vector<1x16xf32>, vector<16x256xf32>, vector<1x256xf32> -> vector<1x256xf32>
    %cst_76 = arith.constant dense<0.000000e+00> : vector<1x256xf32>
    %112 = tpu.matmul %110, %91, %cst_76 {dimension_numbers = #tpu.dot_dimension_numbers<[1], [0], [0], [1], [0, 0, 1, 1], [], []>, precision = #tpu.contract_precision<fp32>} : vector<1x16xf32>, vector<16x256xf32>, vector<1x256xf32> -> vector<1x256xf32>
    %113 = vector.broadcast %111 : vector<1x256xf32> to vector<32x256xf32>
    %114 = arith.mulf %87, %113 : vector<32x256xf32>
    %115 = vector.broadcast %112 : vector<1x256xf32> to vector<32x256xf32>
    %116 = arith.addf %114, %115 : vector<32x256xf32>
    %c0_77 = arith.constant 0 : index
    %c0_78 = arith.constant 0 : index
    %117 = vector.load %arg5[%c0_77, %c0_78] : memref<128x256xbf16, #tpu.memory_space<vmem>>, vector<128x256xbf16>
    %cst_79 = arith.constant dense<0.000000e+00> : vector<32x256xf32>
    %118 = tpu.matmul %0, %117, %cst_79 {dimension_numbers = #tpu.dot_dimension_numbers<[1], [0], [0], [1], [0, 0, 1, 1], [], []>} : vector<32x128xbf16>, vector<128x256xbf16>, vector<32x256xf32> -> vector<32x256xf32>
    %c0_80 = arith.constant 0 : index
    %c0_81 = arith.constant 0 : index
    %119 = vector.load %arg13[%c0_80, %c0_81] : memref<1x16xf32, #tpu.memory_space<vmem>>, vector<1x16xf32>
    %c0_82 = arith.constant 0 : index
    %c0_83 = arith.constant 0 : index
    %120 = vector.load %arg14[%c0_82, %c0_83] : memref<1x16xf32, #tpu.memory_space<vmem>>, vector<1x16xf32>
    %c0_84 = arith.constant 0 : index
    %c0_85 = arith.constant 0 : index
    %121 = vector.load %arg17[%c0_84, %c0_85] : memref<256x16xf32, #tpu.memory_space<vmem>>, vector<256x16xf32>
    %c0_86 = arith.constant 0 : index
    %c0_87 = arith.constant 0 : index
    %122 = vector.load %arg18[%c0_86, %c0_87] : memref<16x256xf32, #tpu.memory_space<vmem>>, vector<16x256xf32>
    %cst_88 = arith.constant dense<0.000000e+00> : vector<256xf32>
    %123 = vector.multi_reduction <add>, %118, %cst_88 [0] : vector<32x256xf32> to vector<256xf32>
    %124 = vector.shape_cast %123 : vector<256xf32> to vector<1x256xf32>
    %125 = arith.mulf %118, %118 : vector<32x256xf32>
    %cst_89 = arith.constant dense<0.000000e+00> : vector<256xf32>
    %126 = vector.multi_reduction <add>, %125, %cst_89 [0] : vector<32x256xf32> to vector<256xf32>
    %127 = vector.shape_cast %126 : vector<256xf32> to vector<1x256xf32>
    %cst_90 = arith.constant dense<0.000000e+00> : vector<1x16xf32>
    %128 = tpu.matmul %124, %121, %cst_90 {dimension_numbers = #tpu.dot_dimension_numbers<[1], [0], [0], [1], [0, 0, 1, 1], [], []>, precision = #tpu.contract_precision<fp32>} : vector<1x256xf32>, vector<256x16xf32>, vector<1x16xf32> -> vector<1x16xf32>
    %cst_91 = arith.constant dense<0.000000e+00> : vector<1x16xf32>
    %129 = tpu.matmul %127, %121, %cst_91 {dimension_numbers = #tpu.dot_dimension_numbers<[1], [0], [0], [1], [0, 0, 1, 1], [], []>, precision = #tpu.contract_precision<fp32>} : vector<1x256xf32>, vector<256x16xf32>, vector<1x16xf32> -> vector<1x16xf32>
    %cst_92 = arith.constant 0.001953125 : f32
    %130 = vector.broadcast %cst_92 : f32 to vector<1x16xf32>
    %131 = arith.mulf %128, %130 : vector<1x16xf32>
    %cst_93 = arith.constant 0.001953125 : f32
    %132 = vector.broadcast %cst_93 : f32 to vector<1x16xf32>
    %133 = arith.mulf %129, %132 : vector<1x16xf32>
    %134 = arith.mulf %131, %131 : vector<1x16xf32>
    %135 = arith.subf %133, %134 : vector<1x16xf32>
    %cst_94 = arith.constant 9.99999974E-6 : f32
    %136 = vector.broadcast %cst_94 : f32 to vector<1x16xf32>
    %137 = arith.addf %135, %136 : vector<1x16xf32>
    %138 = math.rsqrt %137 : vector<1x16xf32>
    %139 = arith.mulf %119, %138 : vector<1x16xf32>
    %140 = arith.mulf %131, %139 : vector<1x16xf32>
    %141 = arith.subf %120, %140 : vector<1x16xf32>
    %cst_95 = arith.constant dense<0.000000e+00> : vector<1x256xf32>
    %142 = tpu.matmul %139, %122, %cst_95 {dimension_numbers = #tpu.dot_dimension_numbers<[1], [0], [0], [1], [0, 0, 1, 1], [], []>, precision = #tpu.contract_precision<fp32>} : vector<1x16xf32>, vector<16x256xf32>, vector<1x256xf32> -> vector<1x256xf32>
    %cst_96 = arith.constant dense<0.000000e+00> : vector<1x256xf32>
    %143 = tpu.matmul %141, %122, %cst_96 {dimension_numbers = #tpu.dot_dimension_numbers<[1], [0], [0], [1], [0, 0, 1, 1], [], []>, precision = #tpu.contract_precision<fp32>} : vector<1x16xf32>, vector<16x256xf32>, vector<1x256xf32> -> vector<1x256xf32>
    %144 = vector.broadcast %142 : vector<1x256xf32> to vector<32x256xf32>
    %145 = arith.mulf %118, %144 : vector<32x256xf32>
    %146 = vector.broadcast %143 : vector<1x256xf32> to vector<32x256xf32>
    %147 = arith.addf %145, %146 : vector<32x256xf32>
    %148 = arith.addf %116, %147 : vector<32x256xf32>
    %cst_97 = arith.constant 0.000000e+00 : f32
    %149 = vector.broadcast %cst_97 : f32 to vector<32x256xf32>
    %150 = arith.maximumf %148, %149 : vector<32x256xf32>
    %c0_98 = arith.constant 0 : index
    %c0_99 = arith.constant 0 : index
    %151 = vector.load %arg19[%c0_98, %c0_99] : memref<32x256xf32, #tpu.memory_space<vmem>>, vector<32x256xf32>
    tpu.vector_store %arg19[%c0_98, %c0_99], %150 {strides = array<i32>} : memref<32x256xf32, #tpu.memory_space<vmem>>, vector<32x256xf32>,
    return
  }
  func.func @transform_0(%arg0: i32) -> (i32, i32) {
    %c0_i32 = arith.constant 0 : i32
    %c0_i32_0 = arith.constant 0 : i32
    %c0_i32_1 = arith.constant 0 : i32
    return %c0_i32, %c0_i32_0 : i32, i32
  }
  func.func @transform_1(%arg0: i32) -> (i32, i32) {
    %c0_i32 = arith.constant 0 : i32
    %c0_i32_0 = arith.constant 0 : i32
    %c0_i32_1 = arith.constant 0 : i32
    return %c0_i32, %c0_i32_0 : i32, i32
  }
  func.func @transform_2(%arg0: i32) -> (i32, i32, i32) {
    %c0_i32 = arith.constant 0 : i32
    %c0_i32_0 = arith.constant 0 : i32
    %c0_i32_1 = arith.constant 0 : i32
    %c0_i32_2 = arith.constant 0 : i32
    return %c0_i32, %c0_i32_0, %c0_i32_1 : i32, i32, i32
  }
  func.func @transform_3(%arg0: i32) -> (i32, i32) {
    %c0_i32 = arith.constant 0 : i32
    %c0_i32_0 = arith.constant 0 : i32
    %c0_i32_1 = arith.constant 0 : i32
    return %c0_i32, %c0_i32_0 : i32, i32
  }
  func.func @transform_4(%arg0: i32) -> (i32, i32) {
    %c0_i32 = arith.constant 0 : i32
    %c0_i32_0 = arith.constant 0 : i32
    %c0_i32_1 = arith.constant 0 : i32
    return %c0_i32, %c0_i32_0 : i32, i32
  }
  func.func @transform_5(%arg0: i32) -> (i32, i32, i32) {
    %c0_i32 = arith.constant 0 : i32
    %c0_i32_0 = arith.constant 0 : i32
    %c0_i32_1 = arith.constant 0 : i32
    %c0_i32_2 = arith.constant 0 : i32
    return %c0_i32, %c0_i32_0, %c0_i32_1 : i32, i32, i32
  }
  func.func @transform_6(%arg0: i32) -> (i32, i32) {
    %c0_i32 = arith.constant 0 : i32
    %c0_i32_0 = arith.constant 0 : i32
    %c0_i32_1 = arith.constant 0 : i32
    return %c0_i32, %c0_i32_0 : i32, i32
  }
  func.func @transform_7(%arg0: i32) -> (i32, i32) {
    %c0_i32 = arith.constant 0 : i32
    %c0_i32_0 = arith.constant 0 : i32
    %c0_i32_1 = arith.constant 0 : i32
    return %c0_i32, %c0_i32_0 : i32, i32
  }
  func.func @transform_8(%arg0: i32) -> (i32, i32) {
    %c0_i32 = arith.constant 0 : i32
    %c0_i32_0 = arith.constant 0 : i32
    %c0_i32_1 = arith.constant 0 : i32
    return %c0_i32, %c0_i32_0 : i32, i32
  }
  func.func @transform_9(%arg0: i32) -> (i32, i32) {
    %c0_i32 = arith.constant 0 : i32
    %c0_i32_0 = arith.constant 0 : i32
    %c0_i32_1 = arith.constant 0 : i32
    return %c0_i32, %c0_i32_0 : i32, i32
  }
  func.func @transform_10(%arg0: i32) -> (i32, i32) {
    %c0_i32 = arith.constant 0 : i32
    %c0_i32_0 = arith.constant 0 : i32
    %c0_i32_1 = arith.constant 0 : i32
    return %c0_i32, %c0_i32_0 : i32, i32
  }
  func.func @transform_11(%arg0: i32) -> (i32, i32) {
    %c0_i32 = arith.constant 0 : i32
    %c0_i32_0 = arith.constant 0 : i32
    %c0_i32_1 = arith.constant 0 : i32
    return %c0_i32, %c0_i32_0 : i32, i32
  }
  func.func @transform_12(%arg0: i32) -> (i32, i32) {
    %c0_i32 = arith.constant 0 : i32
    %c0_i32_0 = arith.constant 0 : i32
    %c0_i32_1 = arith.constant 0 : i32
    return %c0_i32, %c0_i32_0 : i32, i32
  }
  func.func @transform_13(%arg0: i32) -> (i32, i32) {
    %c0_i32 = arith.constant 0 : i32
    %c0_i32_0 = arith.constant 0 : i32
    %c0_i32_1 = arith.constant 0 : i32
    return %c0_i32, %c0_i32_0 : i32, i32
  }
  func.func @transform_14(%arg0: i32) -> (i32, i32) {
    %c0_i32 = arith.constant 0 : i32
    %c0_i32_0 = arith.constant 0 : i32
    %c0_i32_1 = arith.constant 0 : i32
    return %c0_i32, %c0_i32_0 : i32, i32
  }
  func.func @transform_15(%arg0: i32) -> (i32, i32) {
    %c0_i32 = arith.constant 0 : i32
    %c0_i32_0 = arith.constant 0 : i32
    %c0_i32_1 = arith.constant 0 : i32
    return %c0_i32, %c0_i32_0 : i32, i32
  }
  func.func @transform_16(%arg0: i32) -> (i32, i32) {
    %c0_i32 = arith.constant 0 : i32
    %c0_i32_0 = arith.constant 0 : i32
    %c0_i32_1 = arith.constant 0 : i32
    return %c0_i32, %c0_i32_0 : i32, i32
  }
  func.func @transform_17(%arg0: i32) -> (i32, i32) {
    %c0_i32 = arith.constant 0 : i32
    %c0_i32_0 = arith.constant 0 : i32
    %c0_i32_1 = arith.constant 0 : i32
    return %c0_i32, %c0_i32_0 : i32, i32
  }
  func.func @transform_18(%arg0: i32) -> (i32, i32) {
    %c0_i32 = arith.constant 0 : i32
    %c0_i32_0 = arith.constant 0 : i32
    %c0_i32_1 = arith.constant 0 : i32
    return %c0_i32, %c0_i32_0 : i32, i32
  }
}

</mosaic_0001>

<bundles_post_ra>
// kernel: tile.19
= control target key start
LH: loop header
LB: loop body
LE: loop exit
PB: predicated region body
PF: predicated region fallthrough
CT: control target
= control target key end

     0   :  { %vm65_vm0 = vcmask 1043458   ;;  %s105_s6 = smov 3  ;;  %vm70_vm1 = vcmask 1045508   ;;  %vm75_vm2 = vcmask 1047558   ;;  %s108_s9 = smov 12  ;;  %vm4_vm3 = vcmask 1047556   ;;  %s1498_s0 = inlined_call_operand.vmem [shape: f32[16,16,16], index: 0, kind: input, shape index: {}]   ;;  %s1499_s1 = inlined_call_operand.vmem [shape: f32[256,16], index: 1, kind: output, shape index: {}]  }
   0x1   :  { %v726_v0 = vld [vmem:[%s1498_s0 + $0x87] ss:$16 sm:%s105_s6]   ;;  %s113_s10 = smov 48  ;;  %s118_s15 = smov 192  ;;  %vm6_vm4 = vcmask 130048   ;;  %vm79_vm5 = vcmask 1048448  }
   0x2   :  { %v727_v1 = vld [vmem:[%s1498_s0 + $0x87] ss:$16 sm:%s108_s9]   ;;  %s60_s16 = smov 3  ;;  %s63_s21 = smov 12  ;;  %vm170_vm6 = vcmask 917248   ;;  %vm261_vm7 = vcmask 786048  }
   0x3   :  { %v728_v2 = vld [vmem:[%s1498_s0 + $0x87] ss:$16 sm:%s113_s10]   ;;  %v111_v3 = vsel %vm65_vm0, %v727_v1, %v726_v0  ;;  %s68_s22 = smov 48  ;;  %s73_s27 = smov 192  ;;  %vm352_vm8 = vcmask 654848   ;;  %vm443_vm9 = vcmask 523648  }
   0x4   :  { %v729_v4 = vld [vmem:[%s1498_s0 + $0x87] ss:$16 sm:%s118_s15]   ;;  %v116_v6 = vsel %vm70_vm1, %v728_v2, %v111_v3  ;;  %s128_s28 = smov 3  ;;  %s131_s4 = smov 12  ;;  %vm534_vm10 = vcmask 392448   ;;  %vm625_vm11 = vcmask 261248  }
   0x5   :  { %v717_v5 = vld [vmem:[%s1498_s0 + $0x7] ss:$16 sm:%s60_s16]   ;;  %v121_v9 = vsel %vm75_vm2, %v729_v4, %v116_v6  ;;  %v731_v12 = vld [vmem:[%s1498_s0 + $0x8f] ss:$16 sm:%s128_s28]   ;;  %s136_s5 = smov 48  ;;  %s857_s6 = smov 112  }
   0x6   :  { %v718_v7 = vld [vmem:[%s1498_s0 + $0x7] ss:$16 sm:%s63_s21]   ;;  %122 = vrot.lane.b32.xlu1 %v121_v9, %s857_s6  ;;  %s141_s9 = smov 192  ;;  %s82_s10 = smov 3 }
   0x7   :  { %v719_v8 = vld [vmem:[%s1498_s0 + $0x7] ss:$16 sm:%s68_s22]   ;;  %v66_v10 = vsel %vm65_vm0, %v718_v7, %v717_v5  ;;  %v732_v14 = vld [vmem:[%s1498_s0 + $0x8f] ss:$16 sm:%s131_s4]   ;;  %s85_s15 = smov 12  ;;  %s90_s16 = smov 48 }
   0x8   :  { %v720_v11 = vld [vmem:[%s1498_s0 + $0x7] ss:$16 sm:%s73_s27]   ;;  %v71_v13 = vsel %vm70_vm1, %v719_v8, %v66_v10  ;;  %v134_v16 = vsel %vm65_vm0, %v732_v14, %v731_v12  ;;  %v733_v17 = vld [vmem:[%s1498_s0 + $0x8f] ss:$16 sm:%s136_s5]   ;;  %s95_s19 = smov 192  ;;  %s173_s24 = smov 3 }
   0x9   :  { %v76_v15 = vsel %vm75_vm2, %v720_v11, %v71_v13  ;;  %v734_v18 = vld [vmem:[%s1498_s0 + $0x8f] ss:$16 sm:%s141_s9]   ;;  %v139_v19 = vsel %vm70_vm1, %v733_v17, %v134_v16  ;;  %s176_s25 = smov 12  ;;  %s181_s28 = smov 48  ;;  %v740_v27 = vld [vmem:[%s1498_s0 + $0xe] ss:$16 sm:%s173_s24]  }
   0xa   :  { %77 = vrot.lane.b32.xlu0 %v76_v15, %s857_s6  ;;  %v721_v20 = vld [vmem:[%s1498_s0 + $0xf] ss:$16 sm:%s82_s10]   ;;  %v144_v21 = vsel %vm75_vm2, %v734_v18, %v139_v19  ;;  %s186_s29 = smov 192  ;;  %s151_s5 = smov 3 }
   0xb   :  { %v722_v22 = vld [vmem:[%s1498_s0 + $0xf] ss:$16 sm:%s85_s15]   ;;  %145 = vrot.lane.b32.xlu1 %v144_v21, %s857_s6  ;;  %s154_s7 = smov 12  ;;  %s159_s12 = smov 48 }
   0xc   :  { %v723_v23 = vld [vmem:[%s1498_s0 + $0xf] ss:$16 sm:%s90_s16]   ;;  %v88_v24 = vsel %vm65_vm0, %v722_v22, %v721_v20  ;;  %v741_v28 = vld [vmem:[%s1498_s0 + $0xe] ss:$16 sm:%s176_s25]   ;;  %s164_s13 = smov 192  ;;  %s219_s15 = smov 3 }
   0xd   :  { %v724_v25 = vld [vmem:[%s1498_s0 + $0xf] ss:$16 sm:%s95_s19]   ;;  %v93_v26 = vsel %vm70_vm1, %v723_v23, %v88_v24  ;;  %v179_v30 = vsel %vm65_vm0, %v741_v28, %v740_v27  ;;  %v742_v31 = vld [vmem:[%s1498_s0 + $0xe] ss:$16 sm:%s181_s28]   ;;  %s222_s16 = smov 12  ;;  %s227_s21 = smov 48 }
   0xe   :  { %v98_v29 = vsel %vm75_vm2, %v724_v25, %v93_v26  ;;  %v743_v32 = vld [vmem:[%s1498_s0 + $0xe] ss:$16 sm:%s186_s29]   ;;  %v184_v33 = vsel %vm70_vm1, %v742_v31, %v179_v30  ;;  %v736_v34 = vld [vmem:[%s1498_s0 + $0x6] ss:$16 sm:%s151_s5]   ;;  %s232_s22 = smov 192  ;;  %s858_s23 = smov 96  }
   0xf   :  { %99 = vrot.lane.b32.xlu0 %v98_v29, %s857_s6  ;;  %v189_v35 = vsel %vm75_vm2, %v743_v32, %v184_v33  ;;  %v737_v36 = vld [vmem:[%s1498_s0 + $0x6] ss:$16 sm:%s154_s7]   ;;  %s196_s26 = smov 3  ;;  %s199_s2 = smov 12 }
  0x10   :  { %v738_v37 = vld [vmem:[%s1498_s0 + $0x6] ss:$16 sm:%s159_s12]   ;;  %190 = vrot.lane.b32.xlu1 %v189_v35, %s858_s23  ;;  %v157_v38 = vsel %vm65_vm0, %v737_v36, %v736_v34  ;;  %s204_s3 = smov 48  ;;  %s209_s9 = smov 192 }
  0x11   :  { %v739_v39 = vld [vmem:[%s1498_s0 + $0x6] ss:$16 sm:%s164_s13]   ;;  %v162_v40 = vsel %vm70_vm1, %v738_v37, %v157_v38  ;;  %v750_v41 = vld [vmem:[%s1498_s0 + $0x8e] ss:$16 sm:%s219_s15]   ;;  %s264_s12 = smov 3  ;;  %s267_s13 = smov 12 }
  0x12   :  { %v751_v42 = vld [vmem:[%s1498_s0 + $0x8e] ss:$16 sm:%s222_s16]   ;;  %v167_v43 = vsel %vm75_vm2, %v739_v39, %v162_v40  ;;  %v745_v48 = vld [vmem:[%s1498_s0 + $0x86] ss:$16 sm:%s196_s26]   ;;  %s272_s17 = smov 48  ;;  %s277_s18 = smov 192 }
  0x13   :  { %v225_v44 = vsel %vm65_vm0, %v751_v42, %v750_v41  ;;  %v752_v45 = vld [vmem:[%s1498_s0 + $0x8e] ss:$16 sm:%s227_s21]   ;;  %168 = vrot.lane.b32.xlu0 %v167_v43, %s858_s23  ;;  %s242_s21 = smov 3  ;;  %s245_s27 = smov 12 }
  0x14   :  { %v753_v46 = vld [vmem:[%s1498_s0 + $0x8e] ss:$16 sm:%s232_s22]   ;;  %v230_v47 = vsel %vm70_vm1, %v752_v45, %v225_v44  ;;  %v746_v50 = vld [vmem:[%s1498_s0 + $0x86] ss:$16 sm:%s199_s2]   ;;  %s250_s28 = smov 48  ;;  %s255_s4 = smov 192 }
  0x15   :  { %v235_v49 = vsel %vm75_vm2, %v753_v46, %v230_v47  ;;  %v747_v51 = vld [vmem:[%s1498_s0 + $0x86] ss:$16 sm:%s204_s3]   ;;  %v202_v52 = vsel %vm65_vm0, %v746_v50, %v745_v48  ;;  %v759_v55 = vld [vmem:[%s1498_s0 + $0xd] ss:$16 sm:%s264_s12]   ;;  %s310_s7 = smov 3  ;;  %s313_s8 = smov 12 }
  0x16   :  { %236 = vrot.lane.b32.xlu1 %v235_v49, %s858_s23  ;;  %v748_v53 = vld [vmem:[%s1498_s0 + $0x86] ss:$16 sm:%s209_s9]   ;;  %v207_v54 = vsel %vm70_vm1, %v747_v51, %v202_v52  ;;  %s323_s6 = smov 192  ;;  %s859_s14 = smov 80  }
  0x17   :  { %v760_v56 = vld [vmem:[%s1498_s0 + $0xd] ss:$16 sm:%s267_s13]   ;;  %v212_v57 = vsel %vm75_vm2, %v748_v53, %v207_v54  ;;  %v755_v62 = vld [vmem:[%s1498_s0 + $0x5] ss:$16 sm:%s242_s21]   ;;  %s318_s13 = smov 48  ;;  %s290_s22 = smov 12 }
  0x18   :  { %v270_v58 = vsel %vm65_vm0, %v760_v56, %v759_v55  ;;  %v761_v59 = vld [vmem:[%s1498_s0 + $0xd] ss:$16 sm:%s272_s17]   ;;  %213 = vrot.lane.b32.xlu0 %v212_v57, %s858_s23  ;;  %s287_s17 = smov 3  ;;  %s295_s24 = smov 48 }
  0x19   :  { %v762_v60 = vld [vmem:[%s1498_s0 + $0xd] ss:$16 sm:%s277_s18]   ;;  %v275_v61 = vsel %vm70_vm1, %v761_v59, %v270_v58  ;;  %v756_v0 = vld [vmem:[%s1498_s0 + $0x5] ss:$16 sm:%s245_s27]   ;;  %s300_s29 = smov 192  ;;  %s355_s3 = smov 3 }
  0x1a   :  { %v280_v63 = vsel %vm75_vm2, %v762_v60, %v275_v61  ;;  %v757_v1 = vld [vmem:[%s1498_s0 + $0x5] ss:$16 sm:%s250_s28]   ;;  %v248_v2 = vsel %vm65_vm0, %v756_v0, %v755_v62  ;;  %v769_v5 = vld [vmem:[%s1498_s0 + $0x8d] ss:$16 sm:%s310_s7]   ;;  %s363_s9 = smov 48  ;;  %s368_s10 = smov 192 }
  0x1b   :  { %281 = vrot.lane.b32.xlu1 %v280_v63, %s859_s14  ;;  %v758_v3 = vld [vmem:[%s1498_s0 + $0x5] ss:$16 sm:%s255_s4]   ;;  %v253_v4 = vsel %vm70_vm1, %v757_v1, %v248_v2  ;;  %s358_s4 = smov 12  ;;  %s336_s18 = smov 12 }
  0x1c   :  { %v770_v6 = vld [vmem:[%s1498_s0 + $0x8d] ss:$16 sm:%s313_s8]   ;;  %v258_v7 = vsel %vm75_vm2, %v758_v3, %v253_v4  ;;  %v764_v12 = vld [vmem:[%s1498_s0 + $0x85] ss:$16 sm:%s287_s17]   ;;  %s341_s19 = smov 48  ;;  %s346_s25 = smov 192 }
  0x1d   :  { %v316_v8 = vsel %vm65_vm0, %v770_v6, %v769_v5  ;;  %v771_v9 = vld [vmem:[%s1498_s0 + $0x8d] ss:$16 sm:%s318_s13]   ;;  %259 = vrot.lane.b32.xlu0 %v258_v7, %s859_s14  ;;  %s333_s13 = smov 3  ;;  %s401_s27 = smov 3 }
  0x1e   :  { %v772_v10 = vld [vmem:[%s1498_s0 + $0x8d] ss:$16 sm:%s323_s6]   ;;  %v321_v11 = vsel %vm70_vm1, %v771_v9, %v316_v8  ;;  %v765_v14 = vld [vmem:[%s1498_s0 + $0x85] ss:$16 sm:%s290_s22]   ;;  %s404_s28 = smov 12  ;;  %s414_s23 = smov 192 }
  0x1f   :  { %v326_v13 = vsel %vm75_vm2, %v772_v10, %v321_v11  ;;  %v766_v15 = vld [vmem:[%s1498_s0 + $0x85] ss:$16 sm:%s295_s24]   ;;  %v293_v16 = vsel %vm65_vm0, %v765_v14, %v764_v12  ;;  %v778_v19 = vld [vmem:[%s1498_s0 + $0xc] ss:$16 sm:%s355_s3]   ;;  %s860_s5 = smov 64   ;;  %s381_s6 = smov 12 }
  0x20   :  { %327 = vrot.lane.b32.xlu1 %v326_v13, %s859_s14  ;;  %v767_v17 = vld [vmem:[%s1498_s0 + $0x85] ss:$16 sm:%s300_s29]   ;;  %v298_v18 = vsel %vm70_vm1, %v766_v15, %v293_v16  ;;  %s386_s15 = smov 48  ;;  %s391_s20 = smov 192 }
  0x21   :  { %v779_v20 = vld [vmem:[%s1498_s0 + $0xc] ss:$16 sm:%s358_s4]   ;;  %v303_v21 = vsel %vm75_vm2, %v767_v17, %v298_v18  ;;  %v774_v26 = vld [vmem:[%s1498_s0 + $0x4] ss:$16 sm:%s333_s13]   ;;  %s409_s4 = smov 48  ;;  %s446_s24 = smov 3 }
  0x22   :  { %v361_v22 = vsel %vm65_vm0, %v779_v20, %v778_v19  ;;  %v780_v23 = vld [vmem:[%s1498_s0 + $0xc] ss:$16 sm:%s363_s9]   ;;  %304 = vrot.lane.b32.xlu0 %v303_v21, %s859_s14  ;;  %s378_s9 = smov 3  ;;  %s454_s29 = smov 48 }
  0x23   :  { %v781_v24 = vld [vmem:[%s1498_s0 + $0xc] ss:$16 sm:%s368_s10]   ;;  %v366_v25 = vsel %vm70_vm1, %v780_v23, %v361_v22  ;;  %v775_v28 = vld [vmem:[%s1498_s0 + $0x4] ss:$16 sm:%s336_s18]   ;;  %s459_s30 = smov 192  ;;  %s427_s10 = smov 12 }
  0x24   :  { %v371_v27 = vsel %vm75_vm2, %v781_v24, %v366_v25  ;;  %v776_v29 = vld [vmem:[%s1498_s0 + $0x4] ss:$16 sm:%s341_s19]   ;;  %v339_v30 = vsel %vm65_vm0, %v775_v28, %v774_v26  ;;  %v788_v33 = vld [vmem:[%s1498_s0 + $0x8c] ss:$16 sm:%s401_s27]   ;;  %s432_s11 = smov 48  ;;  %s437_s16 = smov 192 }
  0x25   :  { %372 = vrot.lane.b32.xlu1 %v371_v27, %s860_s5  ;;  %v777_v31 = vld [vmem:[%s1498_s0 + $0x4] ss:$16 sm:%s346_s25]   ;;  %v344_v32 = vsel %vm70_vm1, %v776_v29, %v339_v30  ;;  %s449_s25 = smov 12  ;;  %s492_s18 = smov 3 }
  0x26   :  { %v789_v34 = vld [vmem:[%s1498_s0 + $0x8c] ss:$16 sm:%s404_s28]   ;;  %v349_v35 = vsel %vm75_vm2, %v777_v31, %v344_v32  ;;  %v783_v40 = vld [vmem:[%s1498_s0 + $0x84] ss:$16 sm:%s378_s9]   ;;  %s495_s19 = smov 12  ;;  %s505_s14 = smov 192 }
  0x27   :  { %v407_v36 = vsel %vm65_vm0, %v789_v34, %v788_v33  ;;  %v790_v37 = vld [vmem:[%s1498_s0 + $0x8c] ss:$16 sm:%s409_s4]   ;;  %350 = vrot.lane.b32.xlu0 %v349_v35, %s860_s5  ;;  %s424_s4 = smov 3  ;;  %s861_s26 = smov 48  }
  0x28   :  { %v791_v38 = vld [vmem:[%s1498_s0 + $0x8c] ss:$16 sm:%s414_s23]   ;;  %v412_v39 = vsel %vm70_vm1, %v790_v37, %v407_v36  ;;  %v784_v42 = vld [vmem:[%s1498_s0 + $0x84] ss:$16 sm:%s381_s6]   ;;  %s472_s23 = smov 12  ;;  %s477_s7 = smov 48 }
  0x29   :  { %v417_v41 = vsel %vm75_vm2, %v791_v38, %v412_v39  ;;  %v785_v43 = vld [vmem:[%s1498_s0 + $0x84] ss:$16 sm:%s386_s15]   ;;  %v384_v44 = vsel %vm65_vm0, %v784_v42, %v783_v40  ;;  %v797_v47 = vld [vmem:[%s1498_s0 + $0xb] ss:$16 sm:%s446_s24]   ;;  %s482_s12 = smov 192  ;;  %s537_s15 = smov 3 }
  0x2a   :  { %418 = vrot.lane.b32.xlu1 %v417_v41, %s860_s5  ;;  %v786_v45 = vld [vmem:[%s1498_s0 + $0x84] ss:$16 sm:%s391_s20]   ;;  %v389_v46 = vsel %vm70_vm1, %v785_v43, %v384_v44  ;;  %s545_s20 = smov 48  ;;  %s550_s21 = smov 192 }
  0x2b   :  { %v798_v48 = vld [vmem:[%s1498_s0 + $0xb] ss:$16 sm:%s449_s25]   ;;  %v394_v49 = vsel %vm75_vm2, %v786_v45, %v389_v46  ;;  %v793_v54 = vld [vmem:[%s1498_s0 + $0x3] ss:$16 sm:%s424_s4]   ;;  %s500_s25 = smov 48  ;;  %s523_s2 = smov 48 }
  0x2c   :  { %v452_v50 = vsel %vm65_vm0, %v798_v48, %v797_v47  ;;  %v799_v51 = vld [vmem:[%s1498_s0 + $0xb] ss:$16 sm:%s454_s29]   ;;  %395 = vrot.lane.b32.xlu0 %v394_v49, %s860_s5  ;;  %s469_s29 = smov 3  ;;  %s528_s8 = smov 192 }
  0x2d   :  { %v800_v52 = vld [vmem:[%s1498_s0 + $0xb] ss:$16 sm:%s459_s30]   ;;  %v457_v53 = vsel %vm70_vm1, %v799_v51, %v452_v50  ;;  %v794_v56 = vld [vmem:[%s1498_s0 + $0x3] ss:$16 sm:%s427_s10]   ;;  %s518_s30 = smov 12  ;;  %s583_s10 = smov 3 }
  0x2e   :  { %v462_v55 = vsel %vm75_vm2, %v800_v52, %v457_v53  ;;  %v795_v57 = vld [vmem:[%s1498_s0 + $0x3] ss:$16 sm:%s432_s11]   ;;  %v430_v58 = vsel %vm65_vm0, %v794_v56, %v793_v54  ;;  %v807_v61 = vld [vmem:[%s1498_s0 + $0x8b] ss:$16 sm:%s492_s18]   ;;  %s586_s11 = smov 12  ;;  %s596_s5 = smov 192 }
  0x2f   :  { %463 = vrot.lane.b32.xlu1 %v462_v55, %s861_s26  ;;  %v796_v59 = vld [vmem:[%s1498_s0 + $0x3] ss:$16 sm:%s437_s16]   ;;  %v435_v60 = vsel %vm70_vm1, %v795_v57, %v430_v58  ;;  %s540_s16 = smov 12  ;;  %s862_s17 = smov 32  }
  0x30   :  { %v808_v62 = vld [vmem:[%s1498_s0 + $0x8b] ss:$16 sm:%s495_s19]   ;;  %v440_v63 = vsel %vm75_vm2, %v796_v59, %v435_v60  ;;  %v802_v4 = vld [vmem:[%s1498_s0 + $0x83] ss:$16 sm:%s469_s29]   ;;  %s568_s27 = smov 48  ;;  %s573_s3 = smov 192 }
  0x31   :  { %v498_v0 = vsel %vm65_vm0, %v808_v62, %v807_v61  ;;  %v809_v1 = vld [vmem:[%s1498_s0 + $0x8b] ss:$16 sm:%s500_s25]   ;;  %441 = vrot.lane.b32.xlu0 %v440_v63, %s861_s26  ;;  %s515_s25 = smov 3  ;;  %s641_s13 = smov 192 }
  0x32   :  { %v810_v2 = vld [vmem:[%s1498_s0 + $0x8b] ss:$16 sm:%s505_s14]   ;;  %v503_v3 = vsel %vm70_vm1, %v809_v1, %v498_v0  ;;  %v803_v6 = vld [vmem:[%s1498_s0 + $0x83] ss:$16 sm:%s472_s23]   ;;  %s563_s14 = smov 12  ;;  %s609_s24 = smov 12 }
  0x33   :  { %v508_v5 = vsel %vm75_vm2, %v810_v2, %v503_v3  ;;  %v804_v7 = vld [vmem:[%s1498_s0 + $0x83] ss:$16 sm:%s477_s7]   ;;  %v475_v8 = vsel %vm65_vm0, %v803_v6, %v802_v4  ;;  %v816_v11 = vld [vmem:[%s1498_s0 + $0xa] ss:$16 sm:%s537_s15]   ;;  %s628_s7 = smov 3  ;;  %s677_s4 = smov 12 }
  0x34   :  { %509 = vrot.lane.b32.xlu1 %v508_v5, %s861_s26  ;;  %v805_v9 = vld [vmem:[%s1498_s0 + $0x83] ss:$16 sm:%s482_s12]   ;;  %v480_v10 = vsel %vm70_vm1, %v804_v7, %v475_v8  ;;  %s636_s12 = smov 48  ;;  %v2_v38 = vld [vmem:[%s1498_s0] ss:$8 sm:$0xf]  }
  0x35   :  { %v817_v12 = vld [vmem:[%s1498_s0 + $0xa] ss:$16 sm:%s540_s16]   ;;  %v485_v13 = vsel %vm75_vm2, %v805_v9, %v480_v10  ;;  %v812_v18 = vld [vmem:[%s1498_s0 + $0x2] ss:$16 sm:%s515_s25]   ;;  %s591_s16 = smov 48  ;;  %s614_s25 = smov 48 }
  0x36   :  { %v543_v14 = vsel %vm65_vm0, %v817_v12, %v816_v11  ;;  %v818_v15 = vld [vmem:[%s1498_s0 + $0xa] ss:$16 sm:%s545_s20]   ;;  %486 = vrot.lane.b32.xlu0 %v485_v13, %s861_s26  ;;  %s560_s20 = smov 3  ;;  %v3_v48 = vld [vmem:[%s1498_s0] ss:$8 sm:$0xf0]  }
  0x37   :  { %v819_v16 = vld [vmem:[%s1498_s0 + $0xa] ss:$16 sm:%s550_s21]   ;;  %v548_v17 = vsel %vm70_vm1, %v818_v15, %v543_v14  ;;  %v813_v20 = vld [vmem:[%s1498_s0 + $0x2] ss:$16 sm:%s518_s30]   ;;  %s619_s30 = smov 192  ;;  %v5_v52 = vsel %vm4_vm3, %v3_v48, %v2_v38  ;;  %s664_s26 = smov 192 }
  0x38   :  { %v553_v19 = vsel %vm75_vm2, %v819_v16, %v548_v17  ;;  %v814_v21 = vld [vmem:[%s1498_s0 + $0x2] ss:$16 sm:%s523_s2]   ;;  %v521_v22 = vsel %vm65_vm0, %v813_v20, %v812_v18  ;;  %v826_v25 = vld [vmem:[%s1498_s0 + $0x8a] ss:$16 sm:%s583_s10]   ;;  %s674_s2 = smov 3 }
  0x39   :  { %554 = vrot.lane.b32.xlu1 %v553_v19, %s862_s17  ;;  %v815_v23 = vld [vmem:[%s1498_s0 + $0x2] ss:$16 sm:%s528_s8]   ;;  %v526_v24 = vsel %vm70_vm1, %v814_v21, %v521_v22  ;;  %s631_s8 = smov 12  ;;  %7 = vst.msk [vmem:[%s1499_s1] ss:$8 sm:$0x3] %vm6_vm4, %v5_v52  }
  0x3a   :  { %v827_v26 = vld [vmem:[%s1498_s0 + $0x8a] ss:$16 sm:%s586_s11]   ;;  %v531_v27 = vsel %vm75_vm2, %v815_v23, %v526_v24  ;;  %v821_v32 = vld [vmem:[%s1498_s0 + $0x82] ss:$16 sm:%s560_s20]   ;;  %s682_s11 = smov 48 }
  0x3b   :  { %v589_v28 = vsel %vm65_vm0, %v827_v26, %v826_v25  ;;  %v828_v29 = vld [vmem:[%s1498_s0 + $0x8a] ss:$16 sm:%s591_s16]   ;;  %532 = vrot.lane.b32.xlu0 %v531_v27, %s862_s17  ;;  %s606_s16 = smov 3  ;;  %696 = vst.msk [vmem:[%s1499_s1 - $0xf] ss:$8 sm:$0xc] %vm6_vm4, %v5_v52  }
  0x3c   :  { %v829_v30 = vld [vmem:[%s1498_s0 + $0x8a] ss:$16 sm:%s596_s5]   ;;  %v594_v31 = vsel %vm70_vm1, %v828_v29, %v589_v28  ;;  %v822_v34 = vld [vmem:[%s1498_s0 + $0x82] ss:$16 sm:%s563_s14]  }
  0x3d   :  { %v599_v33 = vsel %vm75_vm2, %v829_v30, %v594_v31  ;;  %v823_v35 = vld [vmem:[%s1498_s0 + $0x82] ss:$16 sm:%s568_s27]   ;;  %v566_v36 = vsel %vm65_vm0, %v822_v34, %v821_v32  ;;  %v835_v40 = vld [vmem:[%s1498_s0 + $0x9] ss:$16 sm:%s628_s7]  }
  0x3e   :  { %600 = vrot.lane.b32.xlu1 %v599_v33, %s862_s17  ;;  %v824_v37 = vld [vmem:[%s1498_s0 + $0x82] ss:$16 sm:%s573_s3]   ;;  %v571_v39 = vsel %vm70_vm1, %v823_v35, %v566_v36  ;;  %697 = vst.msk [vmem:[%s1499_s1 - $0x1e] ss:$8 sm:$0x30] %vm6_vm4, %v5_v52   ;;  %s659_s3 = smov 48 }
  0x3f   :  { %v836_v41 = vld [vmem:[%s1498_s0 + $0x9] ss:$16 sm:%s631_s8]   ;;  %v576_v42 = vsel %vm75_vm2, %v824_v37, %v571_v39  ;;  %v831_v47 = vld [vmem:[%s1498_s0 + $0x1] ss:$16 sm:%s606_s16]   ;;  %s651_s16 = smov 3 }
  0x40   :  { %v634_v43 = vsel %vm65_vm0, %v836_v41, %v835_v40  ;;  %v837_v44 = vld [vmem:[%s1498_s0 + $0x9] ss:$16 sm:%s636_s12]   ;;  %577 = vrot.lane.b32.xlu0 %v576_v42, %s862_s17  ;;  %s687_s12 = smov 192  ;;  %698 = vst.msk [vmem:[%s1499_s1 - $0x2d] ss:$8 sm:$0xc0] %vm6_vm4, %v5_v52  }
  0x41   :  { %v838_v45 = vld [vmem:[%s1498_s0 + $0x9] ss:$16 sm:%s641_s13]   ;;  %v639_v46 = vsel %vm70_vm1, %v837_v44, %v634_v43  ;;  %v832_v50 = vld [vmem:[%s1498_s0 + $0x1] ss:$16 sm:%s609_s24]   ;;  %s863_s13 = smov 16   ;;  %s654_s17 = smov 12 }
  0x42   :  { %v644_v49 = vsel %vm75_vm2, %v838_v45, %v639_v46  ;;  %v833_v51 = vld [vmem:[%s1498_s0 + $0x1] ss:$16 sm:%s614_s25]   ;;  %v612_v53 = vsel %vm65_vm0, %v832_v50, %v831_v47  ;;  %v699_v55 = vld [vmem:[%s1498_s0 + $0x40] ss:$8 sm:$0xf]  }
  0x43   :  { %645 = vrot.lane.b32.xlu1 %v644_v49, %s863_s13  ;;  %v834_v54 = vld [vmem:[%s1498_s0 + $0x1] ss:$16 sm:%s619_s30]   ;;  %v617_v56 = vsel %vm70_vm1, %v833_v51, %v612_v53  ;;  %v700_v1 = vld [vmem:[%s1498_s0 + $0x40] ss:$8 sm:$0xf0]  }
  0x44   :  { %v845_v57 = vld [vmem:[%s1498_s0 + $0x89] ss:$16 sm:%s674_s2]   ;;  %v622_v59 = vsel %vm75_vm2, %v834_v54, %v617_v56  ;;  %v840_v0 = vld [vmem:[%s1498_s0 + $0x81] ss:$16 sm:%s651_s16]   ;;  %v19_v5 = vsel %vm4_vm3, %v700_v1, %v699_v55 }
  0x45   :  { %v846_v58 = vld [vmem:[%s1498_s0 + $0x89] ss:$16 sm:%s677_s4]   ;;  %623 = vrot.lane.b32.xlu0 %v622_v59, %s863_s13  ;;  %701 = vst.msk [vmem:[%s1499_s1 + $0x4] ss:$8 sm:$0x3] %vm6_vm4, %v19_v5  }
  0x46   :  { %v680_v60 = vsel %vm65_vm0, %v846_v58, %v845_v57  ;;  %v847_v61 = vld [vmem:[%s1498_s0 + $0x89] ss:$16 sm:%s682_s11]   ;;  %v841_v3 = vld [vmem:[%s1498_s0 + $0x81] ss:$16 sm:%s654_s17]  }
  0x47   :  { %v848_v62 = vld [vmem:[%s1498_s0 + $0x89] ss:$16 sm:%s687_s12]   ;;  %v685_v63 = vsel %vm70_vm1, %v847_v61, %v680_v60  ;;  %v842_v4 = vld [vmem:[%s1498_s0 + $0x81] ss:$16 sm:%s659_s3]   ;;  %v657_v6 = vsel %vm65_vm0, %v841_v3, %v840_v0 }
  0x48   :  { %v690_v2 = vsel %vm75_vm2, %v848_v62, %v685_v63  ;;  %v843_v7 = vld [vmem:[%s1498_s0 + $0x81] ss:$16 sm:%s664_s26]   ;;  %702 = vst.msk [vmem:[%s1499_s1 - $0xb] ss:$8 sm:$0xc] %vm6_vm4, %v19_v5   ;;  %v662_v9 = vsel %vm70_vm1, %v842_v4, %v657_v6 }
  0x49   :  { %691 = vrot.lane.b32.xlu1 %v690_v2, %s863_s13  ;;  %703 = vst.msk [vmem:[%s1499_s1 - $0x1a] ss:$8 sm:$0x30] %vm6_vm4, %v19_v5   ;;  %704 = vst.msk [vmem:[%s1499_s1 - $0x29] ss:$8 sm:$0xc0] %vm6_vm4, %v19_v5   ;;  %v667_v12 = vsel %vm75_vm2, %v843_v7, %v662_v9 }
  0x4a   :  { %v705_v8 = vld [vmem:[%s1498_s0 + $0x80] ss:$8 sm:$0xf]   ;;  %668 = vrot.lane.b32.xlu0 %v667_v12, %s863_s13 }
  0x4b   :  { %v706_v10 = vld [vmem:[%s1498_s0 + $0x80] ss:$8 sm:$0xf0]  }
  0x4c   :  { %v711_v11 = vld [vmem:[%s1498_s0 + $0xc0] ss:$8 sm:$0xf]   ;;  %v34_v13 = vsel %vm4_vm3, %v706_v10, %v705_v8 }
  0x4d   :  { %v712_v14 = vld [vmem:[%s1498_s0 + $0xc0] ss:$8 sm:$0xf0]   ;;  %707 = vst.msk [vmem:[%s1499_s1 + $0x10] ss:$8 sm:$0x3] %vm6_vm4, %v34_v13  }
  0x4e   :  { %708 = vst.msk [vmem:[%s1499_s1 + $0x1] ss:$8 sm:$0xc] %vm6_vm4, %v34_v13   ;;  %709 = vst.msk [vmem:[%s1499_s1 - $0xe] ss:$8 sm:$0x30] %vm6_vm4, %v34_v13   ;;  %v49_v15 = vsel %vm4_vm3, %v712_v14, %v711_v11 }
  0x4f   :  { %710 = vst.msk [vmem:[%s1499_s1 - $0x1d] ss:$8 sm:$0xc0] %vm6_vm4, %v34_v13   ;;  %713 = vst.msk [vmem:[%s1499_s1 + $0x14] ss:$8 sm:$0x3] %vm6_vm4, %v49_v15  }
  0x50   :  { %714 = vst.msk [vmem:[%s1499_s1 + $0x5] ss:$8 sm:$0xc] %vm6_vm4, %v49_v15   ;;  %715 = vst.msk [vmem:[%s1499_s1 - $0xa] ss:$8 sm:$0x30] %vm6_vm4, %v49_v15  }
  0x51   :  { %716 = vst.msk [vmem:[%s1499_s1 - $0x19] ss:$8 sm:$0xc0] %vm6_vm4, %v49_v15  }
  0x78   :  { %v123_v16 = vpop.permute.xlu1 %122  }
  0x79   :  { %730 = vst.msk [vmem:[%s1499_s1 + $0x10] sm:$0xff] %vm79_vm5, %v123_v16  }
  0x7c   :  { %v78_v17 = vpop.permute.xlu0 %77  }
  0x7d   :  { %80 = vst.msk [vmem:[%s1499_s1] sm:$0xff] %vm79_vm5, %v78_v17   ;;  %v146_v18 = vpop.permute.xlu1 %145  }
  0x7e   :  { %735 = vst.msk [vmem:[%s1499_s1 + $0x18] sm:$0xff] %vm79_vm5, %v146_v18  }
  0x81   :  { %v100_v19 = vpop.permute.xlu0 %99  }
  0x82   :  { %725 = vst.msk [vmem:[%s1499_s1 + $0x8] sm:$0xff] %vm79_vm5, %v100_v19   ;;  %v191_v20 = vpop.permute.xlu1 %190  }
  0x83   :  { %744 = vst.msk [vmem:[%s1499_s1 + $0x8] sm:$0xff] %vm170_vm6, %v191_v20  }
  0x85   :  { %v169_v21 = vpop.permute.xlu0 %168  }
  0x86   :  { %171 = vst.msk [vmem:[%s1499_s1] sm:$0xff] %vm170_vm6, %v169_v21  }
  0x88   :  { %v237_v22 = vpop.permute.xlu1 %236  }
  0x89   :  { %754 = vst.msk [vmem:[%s1499_s1 + $0x18] sm:$0xff] %vm170_vm6, %v237_v22  }
  0x8a   :  { %v214_v23 = vpop.permute.xlu0 %213  }
  0x8b   :  { %749 = vst.msk [vmem:[%s1499_s1 + $0x10] sm:$0xff] %vm170_vm6, %v214_v23  }
  0x8d   :  { %v282_v24 = vpop.permute.xlu1 %281  }
  0x8e   :  { %763 = vst.msk [vmem:[%s1499_s1 + $0x8] sm:$0xff] %vm261_vm7, %v282_v24  }
  0x8f   :  { %v260_v25 = vpop.permute.xlu0 %259  }
  0x90   :  { %262 = vst.msk [vmem:[%s1499_s1] sm:$0xff] %vm261_vm7, %v260_v25  }
  0x92   :  { %v328_v26 = vpop.permute.xlu1 %327  }
  0x93   :  { %773 = vst.msk [vmem:[%s1499_s1 + $0x18] sm:$0xff] %vm261_vm7, %v328_v26  }
  0x94   :  { %v305_v27 = vpop.permute.xlu0 %304  }
  0x95   :  { %768 = vst.msk [vmem:[%s1499_s1 + $0x10] sm:$0xff] %vm261_vm7, %v305_v27  }
  0x97   :  { %v373_v28 = vpop.permute.xlu1 %372  }
  0x98   :  { %782 = vst.msk [vmem:[%s1499_s1 + $0x8] sm:$0xff] %vm352_vm8, %v373_v28  }
  0x99   :  { %v351_v29 = vpop.permute.xlu0 %350  }
  0x9a   :  { %353 = vst.msk [vmem:[%s1499_s1] sm:$0xff] %vm352_vm8, %v351_v29  }
  0x9c   :  { %v419_v30 = vpop.permute.xlu1 %418  }
  0x9d   :  { %792 = vst.msk [vmem:[%s1499_s1 + $0x18] sm:$0xff] %vm352_vm8, %v419_v30  }
  0x9e   :  { %v396_v31 = vpop.permute.xlu0 %395  }
  0x9f   :  { %787 = vst.msk [vmem:[%s1499_s1 + $0x10] sm:$0xff] %vm352_vm8, %v396_v31  }
  0xa1   :  { %v464_v32 = vpop.permute.xlu1 %463  }
  0xa2   :  { %801 = vst.msk [vmem:[%s1499_s1 + $0x8] sm:$0xff] %vm443_vm9, %v464_v32  }
  0xa3   :  { %v442_v33 = vpop.permute.xlu0 %441  }
  0xa4   :  { %444 = vst.msk [vmem:[%s1499_s1] sm:$0xff] %vm443_vm9, %v442_v33  }
  0xa6   :  { %v510_v34 = vpop.permute.xlu1 %509  }
  0xa7   :  { %811 = vst.msk [vmem:[%s1499_s1 + $0x18] sm:$0xff] %vm443_vm9, %v510_v34  }
  0xa8   :  { %v487_v35 = vpop.permute.xlu0 %486  }
  0xa9   :  { %806 = vst.msk [vmem:[%s1499_s1 + $0x10] sm:$0xff] %vm443_vm9, %v487_v35  }
  0xab   :  { %v555_v36 = vpop.permute.xlu1 %554  }
  0xac   :  { %820 = vst.msk [vmem:[%s1499_s1 + $0x8] sm:$0xff] %vm534_vm10, %v555_v36  }
  0xad   :  { %v533_v37 = vpop.permute.xlu0 %532  }
  0xae   :  { %535 = vst.msk [vmem:[%s1499_s1] sm:$0xff] %vm534_vm10, %v533_v37  }
  0xb0   :  { %v601_v38 = vpop.permute.xlu1 %600  }
  0xb1   :  { %830 = vst.msk [vmem:[%s1499_s1 + $0x18] sm:$0xff] %vm534_vm10, %v601_v38  }
  0xb2   :  { %v578_v39 = vpop.permute.xlu0 %577  }
  0xb3   :  { %825 = vst.msk [vmem:[%s1499_s1 + $0x10] sm:$0xff] %vm534_vm10, %v578_v39  }
  0xb5   :  { %v646_v40 = vpop.permute.xlu1 %645  }
  0xb6   :  { %839 = vst.msk [vmem:[%s1499_s1 + $0x8] sm:$0xff] %vm625_vm11, %v646_v40  }
  0xb7   :  { %v624_v41 = vpop.permute.xlu0 %623  }
  0xb8   :  { %626 = vst.msk [vmem:[%s1499_s1] sm:$0xff] %vm625_vm11, %v624_v41  }
  0xbb   :  { %v692_v42 = vpop.permute.xlu1 %691  }
  0xbc   :  { %849 = vst.msk [vmem:[%s1499_s1 + $0x18] sm:$0xff] %vm625_vm11, %v692_v42   ;;  %v669_v43 = vpop.permute.xlu0 %668  }
  0xbd   :  { %844 = vst.msk [vmem:[%s1499_s1 + $0x10] sm:$0xff] %vm625_vm11, %v669_v43  }

// kernel: tile.14
= control target key start
LH: loop header
LB: loop body
LE: loop exit
PB: predicated region body
PF: predicated region fallthrough
CT: control target
= control target key end

     0   :  { %vm6_vm0 = vcmask 1043458   ;;  %s11_s6 = smov 3  ;;  %s14_s7 = smov 12  ;;  %vm8_vm1 = vcmask 31744   ;;  %vm20_vm2 = vcmask 523744   ;;  %vm32_vm3 = vcmask 490944   ;;  %s383_s0 = inlined_call_operand.vmem [shape: f32[16,4,4], index: 0, kind: input, shape index: {}]   ;;  %s384_s1 = inlined_call_operand.vmem [shape: f32[64,4], index: 1, kind: output, shape index: {}]  }
   0x1   :  { %v198_v0 = vld [vmem:[%s383_s0 + $0xf] ss:$16 sm:%s11_s6]   ;;  %s35_s12 = smov 3  ;;  %s38_s15 = smov 12  ;;  %vm44_vm4 = vcmask 458144   ;;  %vm56_vm5 = vcmask 425344  }
   0x2   :  { %v199_v1 = vld [vmem:[%s383_s0 + $0xf] ss:$16 sm:%s14_s7]   ;;  %v202_v3 = vld [vmem:[%s383_s0 + $0xd] ss:$16 sm:%s35_s12]   ;;  %s243_s16 = smov 60   ;;  %s23_s19 = smov 3 }
   0x3   :  { %v17_v2 = vsel %vm6_vm0, %v199_v1, %v198_v0  ;;  %v203_v4 = vld [vmem:[%s383_s0 + $0xd] ss:$16 sm:%s38_s15]   ;;  %s26_s20 = smov 12  ;;  %v200_v6 = vld [vmem:[%s383_s0 + $0xe] ss:$16 sm:%s23_s19]   ;;  %s47_s25 = smov 3 }
   0x4   :  { %18 = vrot.lane.b32.xlu0 %v17_v2, %s243_s16  ;;  %v41_v5 = vsel %vm6_vm0, %v203_v4, %v202_v3  ;;  %v201_v7 = vld [vmem:[%s383_s0 + $0xe] ss:$16 sm:%s26_s20]   ;;  %s244_s26 = smov 52   ;;  %s50_s29 = smov 12  ;;  %vm68_vm6 = vcmask 392544   ;;  %vm80_vm7 = vcmask 359744  }
   0x5   :  { %42 = vrot.lane.b32.xlu1 %v41_v5, %s244_s26  ;;  %v29_v8 = vsel %vm6_vm0, %v201_v7, %v200_v6  ;;  %v204_v9 = vld [vmem:[%s383_s0 + $0xc] ss:$16 sm:%s47_s25]   ;;  %s59_s3 = smov 3  ;;  %s62_s4 = smov 12  ;;  %vm92_vm8 = vcmask 326944   ;;  %vm104_vm9 = vcmask 294144  }
   0x6   :  { %v205_v10 = vld [vmem:[%s383_s0 + $0xc] ss:$16 sm:%s50_s29]   ;;  %s245_s5 = smov 56   ;;  %v206_v12 = vld [vmem:[%s383_s0 + $0xb] ss:$16 sm:%s59_s3]   ;;  %s71_s8 = smov 3 }
   0x7   :  { %v53_v11 = vsel %vm6_vm0, %v205_v10, %v204_v9  ;;  %v207_v13 = vld [vmem:[%s383_s0 + $0xb] ss:$16 sm:%s62_s4]   ;;  %v208_v14 = vld [vmem:[%s383_s0 + $0xa] ss:$16 sm:%s71_s8]   ;;  %s74_s13 = smov 12  ;;  %s246_s14 = smov 48  }
   0x8   :  { %30 = vrot.lane.b32.xlu0 %v29_v8, %s245_s5  ;;  %v65_v15 = vsel %vm6_vm0, %v207_v13, %v206_v12  ;;  %v209_v16 = vld [vmem:[%s383_s0 + $0xa] ss:$16 sm:%s74_s13]   ;;  %s83_s17 = smov 3  ;;  %s86_s18 = smov 12  ;;  %vm116_vm10 = vcmask 261344   ;;  %vm128_vm11 = vcmask 228544  }
   0x9   :  { %54 = vrot.lane.b32.xlu1 %v53_v11, %s246_s14  ;;  %v77_v17 = vsel %vm6_vm0, %v209_v16, %v208_v14  ;;  %v210_v18 = vld [vmem:[%s383_s0 + $0x9] ss:$16 sm:%s83_s17]   ;;  %s95_s23 = smov 3  ;;  %s247_s24 = smov 44   ;;  %vm140_vm12 = vcmask 195744   ;;  %vm152_vm13 = vcmask 162944  }
   0xa   :  { %v211_v19 = vld [vmem:[%s383_s0 + $0x9] ss:$16 sm:%s86_s18]   ;;  %v212_v20 = vld [vmem:[%s383_s0 + $0x8] ss:$16 sm:%s95_s23]   ;;  %s98_s27 = smov 12  ;;  %s107_s30 = smov 3 }
   0xb   :  { %v89_v21 = vsel %vm6_vm0, %v211_v19, %v210_v18  ;;  %v213_v22 = vld [vmem:[%s383_s0 + $0x8] ss:$16 sm:%s98_s27]   ;;  %s110_s2 = smov 12  ;;  %s248_s3 = smov 40   ;;  %v214_v23 = vld [vmem:[%s383_s0 + $0x7] ss:$16 sm:%s107_s30]  }
   0xc   :  { %66 = vrot.lane.b32.xlu0 %v65_v15, %s247_s24  ;;  %s119_s6 = smov 3  ;;  %v101_v24 = vsel %vm6_vm0, %v213_v22, %v212_v20  ;;  %v215_v25 = vld [vmem:[%s383_s0 + $0x7] ss:$16 sm:%s110_s2]   ;;  %s122_s11 = smov 12  ;;  %vm164_vm14 = vcmask 130144   ;;  %vm176_vm15 = vcmask 97344  }
   0xd   :  { %78 = vrot.lane.b32.xlu1 %v77_v17, %s248_s3  ;;  %v216_v26 = vld [vmem:[%s383_s0 + $0x6] ss:$16 sm:%s119_s6]   ;;  %s249_s12 = smov 36   ;;  %s131_s15 = smov 3  ;;  %v113_v28 = vsel %vm6_vm0, %v215_v25, %v214_v23 }
   0xe   :  { %v217_v27 = vld [vmem:[%s383_s0 + $0x6] ss:$16 sm:%s122_s11]   ;;  %s134_s16 = smov 12  ;;  %v218_v29 = vld [vmem:[%s383_s0 + $0x5] ss:$16 sm:%s131_s15]   ;;  %s143_s19 = smov 3 }
   0xf   :  { %s250_s20 = smov 32   ;;  %v219_v30 = vld [vmem:[%s383_s0 + $0x5] ss:$16 sm:%s134_s16]   ;;  %s146_s23 = smov 12  ;;  %v125_v31 = vsel %vm6_vm0, %v217_v27, %v216_v26  ;;  %v220_v32 = vld [vmem:[%s383_s0 + $0x4] ss:$16 sm:%s143_s19]  }
  0x10   :  { %90 = vrot.lane.b32.xlu0 %v89_v21, %s249_s12  ;;  %s155_s26 = smov 3  ;;  %s158_s27 = smov 12  ;;  %v221_v33 = vld [vmem:[%s383_s0 + $0x4] ss:$16 sm:%s146_s23]   ;;  %v137_v34 = vsel %vm6_vm0, %v219_v30, %v218_v29 }
  0x11   :  { %102 = vrot.lane.b32.xlu1 %v101_v24, %s250_s20  ;;  %s251_s28 = smov 28   ;;  %s167_s2 = smov 3  ;;  %v222_v35 = vld [vmem:[%s383_s0 + $0x3] ss:$16 sm:%s155_s26]   ;;  %v149_v37 = vsel %vm6_vm0, %v221_v33, %v220_v32 }
  0x12   :  { %s170_s5 = smov 12  ;;  %s252_s6 = smov 24   ;;  %v223_v36 = vld [vmem:[%s383_s0 + $0x3] ss:$16 sm:%s158_s27]   ;;  %v224_v38 = vld [vmem:[%s383_s0 + $0x2] ss:$16 sm:%s167_s2]  }
  0x13   :  { %s179_s9 = smov 3  ;;  %v225_v39 = vld [vmem:[%s383_s0 + $0x2] ss:$16 sm:%s170_s5]   ;;  %s182_s14 = smov 12  ;;  %v161_v41 = vsel %vm6_vm0, %v223_v36, %v222_v35 }
  0x14   :  { %114 = vrot.lane.b32.xlu0 %v113_v28, %s251_s28  ;;  %s2_s15 = smov 3  ;;  %s253_s16 = smov 20   ;;  %v226_v42 = vld [vmem:[%s383_s0 + $0x1] ss:$16 sm:%s179_s9]   ;;  %v173_v46 = vsel %vm6_vm0, %v225_v39, %v224_v38 }
  0x15   :  { %126 = vrot.lane.b32.xlu1 %v125_v31, %s252_s6  ;;  %v3_v40 = vld [vmem:[%s383_s0] ss:$16 sm:%s2_s15]   ;;  %s4_s19 = smov 12  ;;  %s254_s24 = smov 16  }
  0x16   :  { %v5_v43 = vld [vmem:[%s383_s0] ss:$16 sm:%s4_s19]   ;;  %v227_v44 = vld [vmem:[%s383_s0 + $0x1] ss:$16 sm:%s182_s14]   ;;  %s255_s0 = smov 12   ;;  %s256_s27 = smov 8  }
  0x17   :  { %v7_v45 = vsel %vm6_vm0, %v5_v43, %v3_v40  ;;  %v185_v47 = vsel %vm6_vm0, %v227_v44, %v226_v42  ;;  %s257_s28 = smov 4   ;;  %vm188_vm0 = vcmask 64544  }
  0x18   :  { %138 = vrot.lane.b32.xlu0 %v137_v34, %s253_s16  ;;  %9 = vst.msk [vmem:[#allocation0] sm:$0xf] %vm8_vm1, %v7_v45  }
  0x19   :  { %150 = vrot.lane.b32.xlu1 %v149_v37, %s254_s24 }
  0x1c   :  { %162 = vrot.lane.b32.xlu0 %v161_v41, %s255_s0 }
  0x1d   :  { %174 = vrot.lane.b32.xlu1 %v173_v46, %s256_s27 }
  0x20   :  { %186 = vrot.lane.b32.xlu0 %v185_v47, %s257_s28 }
  0x76   :  { %v19_v48 = vpop.permute.xlu0 %18  }
  0x77   :  { %21 = vst.msk [vmem:[#allocation0] sm:$0xf] %vm20_vm2, %v19_v48   ;;  %v43_v49 = vpop.permute.xlu1 %42  }
  0x7a   :  { %v31_v50 = vpop.permute.xlu0 %30  }
  0x7b   :  { %33 = vst.msk [vmem:[#allocation0] sm:$0xf] %vm32_vm3, %v31_v50   ;;  %v55_v51 = vpop.permute.xlu1 %54  }
  0x7c   :  { %45 = vst.msk [vmem:[#allocation0] sm:$0xf] %vm44_vm4, %v43_v49  }
  0x7d   :  { %57 = vst.msk [vmem:[#allocation0] sm:$0xf] %vm56_vm5, %v55_v51  }
  0x7e   :  { %v67_v52 = vpop.permute.xlu0 %66  }
  0x7f   :  { %69 = vst.msk [vmem:[#allocation0] sm:$0xf] %vm68_vm6, %v67_v52   ;;  %v79_v53 = vpop.permute.xlu1 %78  }
  0x80   :  { %81 = vst.msk [vmem:[#allocation0] sm:$0xf] %vm80_vm7, %v79_v53  }
  0x82   :  { %v91_v54 = vpop.permute.xlu0 %90  }
  0x83   :  { %93 = vst.msk [vmem:[#allocation0] sm:$0xf] %vm92_vm8, %v91_v54   ;;  %v103_v55 = vpop.permute.xlu1 %102  }
  0x84   :  { %105 = vst.msk [vmem:[#allocation0] sm:$0xf] %vm104_vm9, %v103_v55  }
  0x86   :  { %v115_v56 = vpop.permute.xlu0 %114  }
  0x87   :  { %117 = vst.msk [vmem:[#allocation0] sm:$0xf] %vm116_vm10, %v115_v56   ;;  %v127_v57 = vpop.permute.xlu1 %126  }
  0x88   :  { %129 = vst.msk [vmem:[#allocation0] sm:$0xf] %vm128_vm11, %v127_v57  }
  0x8a   :  { %v139_v58 = vpop.permute.xlu0 %138  }
  0x8b   :  { %141 = vst.msk [vmem:[#allocation0] sm:$0xf] %vm140_vm12, %v139_v58   ;;  %v151_v59 = vpop.permute.xlu1 %150  }
  0x8c   :  { %153 = vst.msk [vmem:[#allocation0] sm:$0xf] %vm152_vm13, %v151_v59  }
  0x8e   :  { %v163_v60 = vpop.permute.xlu0 %162  }
  0x8f   :  { %165 = vst.msk [vmem:[#allocation0] sm:$0xf] %vm164_vm14, %v163_v60   ;;  %v175_v61 = vpop.permute.xlu1 %174  }
  0x90   :  { %177 = vst.msk [vmem:[#allocation0] sm:$0xf] %vm176_vm15, %v175_v61  }
  0x92   :  { %v187_v62 = vpop.permute.xlu0 %186  }
  0x93   :  { %189 = vst.msk [vmem:[#allocation0] sm:$0xf] %vm188_vm0, %v187_v62  }
  0x9a   :  { %v194_v63 = vld [vmem:[#allocation0] sm:$0xf] }
  0x9b   :  { %197 = vst [vmem:[%s384_s1] sm:$0xf] %v194_v63 }

// kernel: residual_block_forward.1
= control target key start
LH: loop header
LB: loop body
LE: loop exit
PB: predicated region body
PF: predicated region fallthrough
CT: control target
= control target key end

     0   :  { %v15378_v15 = vmov 0.0   ;;  %vm12562_vm0 = vmmov 0   ;;  %vm200_vm1 = vcmask 523264   ;;  %vm1324_vm2 = vcmask 1043456   ;;  %s15356_s1 = inlined_call_operand.vmem [shape: bf16[128,64], index: 1, kind: input, shape index: {}]   ;;  %s15357_s0 = inlined_call_operand.vmem [shape: bf16[32,128], index: 0, kind: input, shape index: {}]   ;;  %s15358_s14 = inlined_call_operand.vmem [shape: f32[64,4], index: 14, kind: input, shape index: {}]   ;;  %s15359_s15 = inlined_call_operand.vmem [shape: f32[4,64], index: 15, kind: input, shape index: {}]   ;;  %s15360_s6 = inlined_call_operand.vmem [shape: f32[1,4], index: 6, kind: input, shape index: {}]   ;;  %s15361_s7 = inlined_call_operand.vmem [shape: f32[1,4], index: 7, kind: input, shape index: {}]   ;;  %s15362_s2 = inlined_call_operand.vmem [shape: bf16[3,64,64], index: 2, kind: input, shape index: {}]   ;;  %s15363_s5 = inlined_call_operand.vmem [shape: bf16[2,32,32], index: 5, kind: input, shape index: {}]   ;;  %s15364_s8 = inlined_call_operand.vmem [shape: f32[1,4], index: 8, kind: input, shape index: {}]   ;;  %s15365_s9 = inlined_call_operand.vmem [shape: f32[1,4], index: 9, kind: input, shape index: {}]   ;;  %s15366_s3 = inlined_call_operand.vmem [shape: bf16[64,256], index: 3, kind: input, shape index: {}]   ;;  %s15367_s16 = inlined_call_operand.vmem [shape: f32[256,16], index: 16, kind: input, shape index: {}]   ;;  %s15368_s17 = inlined_call_operand.vmem [shape: f32[16,256], index: 17, kind: input, shape index: {}]   ;;  %s15369_s4 = inlined_call_operand.vmem [shape: bf16[128,256], index: 4, kind: input, shape index: {}]   ;;  %s15370_s10 = inlined_call_operand.vmem [shape: f32[1,16], index: 10, kind: input, shape index: {}]   ;;  %s15371_s11 = inlined_call_operand.vmem [shape: f32[1,16], index: 11, kind: input, shape index: {}]   ;;  %s15372_s12 = inlined_call_operand.vmem [shape: f32[1,16], index: 12, kind: input, shape index: {}]   ;;  %s15373_s13 = inlined_call_operand.vmem [shape: f32[1,16], index: 13, kind: input, shape index: {}]   ;;  %s15374_s18 = inlined_call_operand.vmem [shape: f32[32,256], index: 18, kind: output, shape index: {}]  }
   0x1   :  { %15684 = sst [smem:[#allocation139_spill]] %s15356_s1  ;;  %11858 = vmatprep.subr.mxu1 %v15378_v15  ;;  %11874 = vmatprep.mubr.msk.f32.mxu1 %vm12562_vm0, %v15378_v15  ;;  %vm1320_vm3 = vcmask 31744   ;;  %vm2268_vm4 = vcmask 261120   ;;  %vm6619_vm5 = vcmask 130048  }
   0x2   :  { %15685 = sst [smem:[#allocation140_spill]] %s15357_s0 }
   0x3   :  { %15686 = sst [smem:[#allocation141_spill]] %s15358_s14 }
   0x4   :  { %s15687_s29 = sld [smem:[#allocation139_spill]] }
   0x5   :  { %s15688_s23 = sld [smem:[#allocation140_spill]] }
   0x6   :  { %s15689_s14 = sld [smem:[#allocation141_spill]] }
   0xa   :  { %v12489_v0 = vld [vmem:[%s15687_s29 + $0x38] sm:$0xff]   ;;  %v12490_v1 = vld [vmem:[%s15687_s29 + $0x30] sm:$0xff]   ;;  %v12491_v2 = vld [vmem:[%s15687_s29 + $0x28] sm:$0xff]  }
   0xb   :  { %11838 = vmatprep.subr.bf16.mxu0 %v12489_v0  ;;  %v12492_v3 = vld [vmem:[%s15687_s29 + $0x20] sm:$0xff]   ;;  %v12493_v5 = vld [vmem:[%s15687_s29 + $0x18] sm:$0xff]   ;;  %v12494_v6 = vld [vmem:[%s15687_s29 + $0x10] sm:$0xff]  }
   0xc   :  { %11839 = vmatpush3.bf16.msra.mxu0 %v12489_v0  ;;  %v12497_v4 = vld [vmem:[%s15688_s23] sm:$0xff]   ;;  %v12495_v7 = vld [vmem:[%s15687_s29 + $0x8] sm:$0xff]   ;;  %v198_v10 = vld [vmem:[%s15689_s14 + $0x38] sm:$0xff] }
   0xd   :  { %11840 = vmatprep.subr.bf16.mxu0 %v12490_v1  ;;  %11854 = vmatprep.mubr.bf16.mxu0 %v12497_v4  ;;  %v12496_v8 = vld [vmem:[%s15687_s29] sm:$0xff]   ;;  %v12498_v9 = vld [vmem:[%s15688_s23 + $0x8] sm:$0xff]   ;;  %v12692_v11 = vand.u32 4294901760, %v198_v10  ;;  %v197_v12 = vld [vmem:[%s15689_s14 + $0x30] sm:$0xff] }
   0xe   :  { %v12700_v14 = vand.u32 4294901760, %v197_v12  ;;  %v196_v16 = vld [vmem:[%s15689_s14 + $0x28] sm:$0xff]  ;;  %v195_v19 = vld [vmem:[%s15689_s14 + $0x20] sm:$0xff]  ;;  %v194_v22 = vld [vmem:[%s15689_s14 + $0x18] sm:$0xff] }
   0xf   :  { %v12698_v13 = vsub.f32 %v198_v10, %v12692_v11  ;;  %v12711_v18 = vand.u32 4294901760, %v196_v16  ;;  %11859 = vmatpush3.msra.mxu1 %v12692_v11  ;;  %v12723_v21 = vand.u32 4294901760, %v195_v19  ;;  %v12735_v24 = vand.u32 4294901760, %v194_v22  ;;  %v193_v25 = vld [vmem:[%s15689_s14 + $0x10] sm:$0xff]  ;;  %v192_v28 = vld [vmem:[%s15689_s14 + $0x8] sm:$0xff]  ;;  %v191_v31 = vld [vmem:[%s15689_s14] sm:$0xff] }
  0x10   :  { %11841 = vmatpush3.bf16.msra.mxu0 %v12490_v1  ;;  %v12709_v17 = vsub.f32 %v197_v12, %v12700_v14  ;;  %11860 = vmatprep.subr.mxu1 %v15378_v15  ;;  %v12747_v27 = vand.u32 4294901760, %v193_v25  ;;  %v12759_v30 = vand.u32 4294901760, %v192_v28  ;;  %v12771_v33 = vand.u32 4294901760, %v191_v31 }
  0x11   :  { %11842 = vmatprep.subr.bf16.mxu0 %v12491_v2  ;;  %v12721_v20 = vsub.f32 %v196_v16, %v12711_v18  ;;  %11861 = vmatpush3.msra.mxu1 %v12700_v14  ;;  %v12733_v23 = vsub.f32 %v195_v19, %v12723_v21  ;;  %v12745_v26 = vsub.f32 %v194_v22, %v12735_v24  ;;  %v12823_v4 = vand.u32 4294901760, %v12698_v13 }
  0x12   :  { %11862 = vmatprep.subr.mxu1 %v15378_v15  ;;  %v12757_v29 = vsub.f32 %v193_v25, %v12747_v27  ;;  %v12769_v32 = vsub.f32 %v192_v28, %v12759_v30  ;;  %v12779_v34 = vsub.f32 %v191_v31, %v12771_v33 }
  0x13   :  { %11863 = vmatpush3.msra.mxu1 %v12711_v18  ;;  %v12837_v10 = vand.u32 4294901760, %v12721_v20  ;;  %v12851_v22 = vand.u32 4294901760, %v12733_v23 }
  0x14   :  { %11843 = vmatpush3.bf16.msra.mxu0 %v12491_v2  ;;  %11864 = vmatprep.subr.mxu1 %v15378_v15 }
  0x15   :  { %11844 = vmatprep.subr.bf16.mxu0 %v12492_v3  ;;  %11865 = vmatpush3.msra.mxu1 %v12723_v21  ;;  %v351_v25 = vsub.f32 %v12721_v20, %v12837_v10 }
  0x16   :  { %11866 = vmatprep.subr.mxu1 %v15378_v15 }
  0x17   :  { %11867 = vmatpush3.msra.mxu1 %v12735_v24 }
  0x18   :  { %11845 = vmatpush3.bf16.msra.mxu0 %v12492_v3  ;;  %11868 = vmatprep.subr.mxu1 %v15378_v15 }
  0x19   :  { %11846 = vmatprep.subr.bf16.mxu0 %v12493_v5  ;;  %11869 = vmatpush3.msra.mxu1 %v12747_v27 }
  0x1a   :  { %11870 = vmatprep.subr.mxu1 %v15378_v15 }
  0x1b   :  { %11871 = vmatpush3.msra.mxu1 %v12759_v30 }
  0x1c   :  { %11847 = vmatpush3.bf16.msra.mxu0 %v12493_v5  ;;  %11872 = vmatprep.subr.mxu1 %v15378_v15 }
  0x1d   :  { %11848 = vmatprep.subr.bf16.mxu0 %v12494_v6  ;;  %11873 = vmatpush3.msra.mxu1 %v12771_v33 }
  0x1e   :  { %11877 = vmatprep.subr.mxu1 %v15378_v15 }
  0x20   :  { %11849 = vmatpush3.bf16.msra.mxu0 %v12494_v6  ;;  %v12829_v6 = vand.u32 4294901760, %v12709_v17 }
  0x21   :  { %11850 = vmatprep.subr.bf16.mxu0 %v12495_v7 }
  0x22   :  { %v344_v12 = vsub.f32 %v12709_v17, %v12829_v6 }
  0x24   :  { %11851 = vmatpush3.bf16.msra.mxu0 %v12495_v7  ;;  %v337_v7 = vsub.f32 %v12698_v13, %v12823_v4 }
  0x25   :  { %11852 = vmatprep.subr.bf16.mxu0 %v12496_v8 }
  0x26   :  { %v12848_v19 = vand.u32 4294901760, %v337_v7 }
  0x28   :  { %11853 = vmatpush3.bf16.msra.mxu0 %v12496_v8 }
  0x29   :  { %11896 = vmatprep.subr.mxu0 %v15378_v15 }
  0x2b   :  { %11855 = vmatmul.mubr.bf16.vlgmr.msra.gmra.mxu0 %v12498_v9 }
  0x2c   :  { %11897 = vmatpush3.msra.mxu0 %v12698_v13  ;;  %11912 = vmatprep.mubr.msk.f32.mxu0 %vm12562_vm0, %v15378_v15 }
  0x2d   :  { %11898 = vmatprep.subr.mxu0 %v15378_v15 }
  0x2e   :  { %11899 = vmatpush3.msra.mxu0 %v12709_v17 }
  0x2f   :  { %11900 = vmatprep.subr.mxu0 %v15378_v15 }
  0x30   :  { %11901 = vmatpush3.msra.mxu0 %v12721_v20 }
  0x31   :  { %11902 = vmatprep.subr.mxu0 %v15378_v15 }
  0x32   :  { %11903 = vmatpush3.msra.mxu0 %v12733_v23 }
  0x33   :  { %11904 = vmatprep.subr.mxu0 %v15378_v15 }
  0x34   :  { %11905 = vmatpush3.msra.mxu0 %v12745_v26 }
  0x35   :  { %11906 = vmatprep.subr.mxu0 %v15378_v15 }
  0x36   :  { %11907 = vmatpush3.msra.mxu0 %v12757_v29 }
  0x37   :  { %11908 = vmatprep.subr.mxu0 %v15378_v15 }
  0x38   :  { %11909 = vmatpush3.msra.mxu0 %v12769_v32 }
  0x39   :  { %11910 = vmatprep.subr.mxu0 %v15378_v15 }
  0x3a   :  { %11911 = vmatpush3.msra.mxu0 %v12779_v34 }
  0x3b   :  { %11934 = vmatprep.subr.mxu0 %v15378_v15 }
  0xeb   :  { %v12791_v35 = vpop.f32.mrf.mxu0 }
  0xec   :  { %v216_v40 = vmul.f32 %v12791_v35, %v12791_v35  ;;  %v204_v45 = vsel %vm200_vm1, %v12791_v35, 0.0 }
  0xed   :  { %v12793_v36 = vpop.f32.mrf.mxu0 }
  0xee   :  { %v214_v38 = vmul.f32 %v12793_v36, %v12793_v36  ;;  %v201_v41 = vsel %vm200_vm1, %v12793_v36, 0.0  ;;  %v221_v50 = vsel %vm200_vm1, %v216_v40, 0.0  ;;  %v12860_v40 = vand.u32 4294901760, %v12745_v26 }
  0xef   :  { %v12795_v37 = vpop.f32.mrf.mxu0 }
  0xf0   :  { %v218_v46 = vsel %vm200_vm1, %v214_v38, 0.0  ;;  %v206_v51 = vsel %vm200_vm1, %v12795_v37, 0.0  ;;  %v217_v52 = vmul.f32 %v12795_v37, %v12795_v37  ;;  %v12857_v38 = vand.u32 4294901760, %v344_v12 }
  0xf1   :  { %v12799_v39 = vpop.f32.mrf.mxu0 }
  0xf2   :  { %v202_v42 = vsel %vm200_vm1, %v12799_v39, 0.0  ;;  %v215_v43 = vmul.f32 %v12799_v39, %v12799_v39  ;;  %v223_v56 = vsel %vm200_vm1, %v217_v52, 0.0 }
  0xf3   :  { %v203_v44 = vadd.f32 %v202_v42, %v201_v41  ;;  %v358_v41 = vsub.f32 %v12733_v23, %v12851_v22  ;;  %v12867_v42 = vand.u32 4294901760, %v351_v25 }
  0xf4   :  { %v219_v47 = vsel %vm200_vm1, %v215_v43, 0.0  ;;  %v12870_v43 = vand.u32 4294901760, %v12757_v29 }
  0xf5   :  { %v205_v48 = vadd.f32 %v204_v45, %v203_v44  ;;  %v220_v49 = vadd.f32 %v219_v47, %v218_v46  ;;  %v365_v44 = vsub.f32 %v12745_v26, %v12860_v40  ;;  %v12878_v45 = vand.u32 4294901760, %v358_v41 }
  0xf6   :  { %v12881_v46 = vand.u32 4294901760, %v12769_v32  ;;  %v372_v47 = vsub.f32 %v12757_v29, %v12870_v43 }
  0xf7   :  { %v207_v53 = vadd.f32 %v206_v51, %v205_v48  ;;  %v222_v54 = vadd.f32 %v221_v50, %v220_v49  ;;  %v12889_v49 = vand.u32 4294901760, %v365_v44  ;;  %v12892_v50 = vand.u32 4294901760, %v12779_v34 }
  0xf8   :  { %v379_v51 = vsub.f32 %v12769_v32, %v12881_v46  ;;  %v12900_v52 = vand.u32 4294901760, %v372_v47 }
  0xf9   :  { %v208_v55 = vrot.slane %v207_v53, 4  ;;  %v224_v58 = vadd.f32 %v223_v56, %v222_v54 }
  0xfb   :  { %v209_v57 = vadd.f32 %v208_v55, %v207_v53  ;;  %v225_v60 = vrot.slane %v224_v58, 4  ;;  %v386_v53 = vsub.f32 %v12779_v34, %v12892_v50  ;;  %v12909_v55 = vand.u32 4294901760, %v379_v51 }
  0xfd   :  { %v210_v59 = vrot.slane %v209_v57, 2  ;;  %v226_v63 = vadd.f32 %v225_v60, %v224_v58 }
  0xff   :  { %v211_v61 = vadd.f32 %v210_v59, %v209_v57  ;;  %v227_v3 = vrot.slane %v226_v63, 2  ;;  %v12917_v57 = vand.u32 4294901760, %v386_v53 }
 0x101   :  { %v212_v62 = vrot.slane %v211_v61, 1  ;;  %v228_v9 = vadd.f32 %v227_v3, %v226_v63 }
 0x103   :  { %v213_v0 = vadd.f32 %v212_v62, %v211_v61  ;;  %v229_v31 = vrot.slane %v228_v9, 1  ;;  %v199_v62 = vld [vmem:[%s15359_s15] sm:$0xf] }
 0x104   :  { %v1326_v63 = vsel %vm1324_vm2, %v199_v62, 0 }
 0x105   :  { %v232_v1 = vsel %vm200_vm1, %v213_v0, 0  ;;  %v230_v48 = vadd.f32 %v229_v31, %v228_v9  ;;  %v13094_v0 = vand.u32 4294901760, %v1326_v63 }
 0x106   :  { %v12820_v2 = vand.u32 4294901760, %v232_v1 }
 0x107   :  { %v772_v54 = vsel %vm200_vm1, %v230_v48, 0 }
 0x108   :  { %v12826_v5 = vsub.f32 %v232_v1, %v12820_v2  ;;  %v12913_v56 = vand.u32 4294901760, %v772_v54  ;;  %v13097_v1 = vsub.f32 %v1326_v63, %v13094_v0 }
 0x10a   :  { %11913 = vmatmul.mubr.f32.vlgmr.msra.gmra.mxu0 %v12826_v5  ;;  %v309_v8 = vand.u32 4294901760, %v12826_v5  ;;  %v12926_v58 = vsub.f32 %v772_v54, %v12913_v56  ;;  %15690 = vst [vmem:[#allocation2_spill] sm:$0xff] %v13097_v1 }
 0x10b   :  { %11935 = vmatpush3.msra.mxu0 %v12823_v4  ;;  %11950 = vmatprep.mubr.msk.f32.mxu0 %vm12562_vm0, %v15378_v15 }
 0x10c   :  { %11936 = vmatprep.subr.mxu0 %v15378_v15  ;;  %v310_v16 = vsub.f32 %v12826_v5, %v309_v8  ;;  %v849_v59 = vand.u32 4294901760, %v12926_v58 }
 0x10d   :  { %11937 = vmatpush3.msra.mxu0 %v12829_v6 }
 0x10e   :  { %11938 = vmatprep.subr.mxu0 %v15378_v15  ;;  %v311_v28 = vand.u32 4294901760, %v310_v16  ;;  %v850_v60 = vsub.f32 %v12926_v58, %v849_v59 }
 0x10f   :  { %11939 = vmatpush3.msra.mxu0 %v12837_v10 }
 0x110   :  { %11940 = vmatprep.subr.mxu0 %v15378_v15  ;;  %11875 = vmatmul.mubr.f32.vlgmr.msra.gmra.mxu1 %v311_v28  ;;  %v851_v61 = vand.u32 4294901760, %v850_v60 }
 0x111   :  { %11878 = vmatpush3.msra.mxu1 %v12848_v19  ;;  %11941 = vmatpush3.msra.mxu0 %v12851_v22 }
 0x112   :  { %11879 = vmatprep.subr.mxu1 %v15378_v15  ;;  %11942 = vmatprep.subr.mxu0 %v15378_v15 }
 0x113   :  { %11880 = vmatpush3.msra.mxu1 %v12857_v38  ;;  %11943 = vmatpush3.msra.mxu0 %v12860_v40 }
 0x114   :  { %11881 = vmatprep.subr.mxu1 %v15378_v15  ;;  %11944 = vmatprep.subr.mxu0 %v15378_v15 }
 0x115   :  { %11882 = vmatpush3.msra.mxu1 %v12867_v42  ;;  %11945 = vmatpush3.msra.mxu0 %v12870_v43 }
 0x116   :  { %11883 = vmatprep.subr.mxu1 %v15378_v15  ;;  %11946 = vmatprep.subr.mxu0 %v15378_v15 }
 0x117   :  { %11884 = vmatpush3.msra.mxu1 %v12878_v45  ;;  %11947 = vmatpush3.msra.mxu0 %v12881_v46 }
 0x118   :  { %11885 = vmatprep.subr.mxu1 %v15378_v15  ;;  %11948 = vmatprep.subr.mxu0 %v15378_v15 }
 0x119   :  { %11886 = vmatpush3.msra.mxu1 %v12889_v49  ;;  %11949 = vmatpush3.msra.mxu0 %v12892_v50 }
 0x11a   :  { %11887 = vmatprep.subr.mxu1 %v15378_v15  ;;  %11951 = vmatmul.mubr.f32.vlgmr.msra.gmra.mxu0 %v12820_v2 }
 0x11b   :  { %11972 = vmatprep.subr.mxu0 %v15378_v15  ;;  %11888 = vmatpush3.msra.mxu1 %v12900_v52 }
 0x11c   :  { %11973 = vmatpush3.msra.mxu0 %v12692_v11  ;;  %11889 = vmatprep.subr.mxu1 %v15378_v15 }
 0x11d   :  { %11974 = vmatprep.subr.mxu0 %v15378_v15  ;;  %11890 = vmatpush3.msra.mxu1 %v12909_v55 }
 0x11e   :  { %11975 = vmatpush3.msra.mxu0 %v12700_v14  ;;  %11891 = vmatprep.subr.mxu1 %v15378_v15 }
 0x11f   :  { %11976 = vmatprep.subr.mxu0 %v15378_v15  ;;  %11892 = vmatpush3.msra.mxu1 %v12917_v57 }
 0x120   :  { %11893 = vmatprep.mubr.msk.f32.mxu1 %vm12562_vm0, %v15378_v15  ;;  %11977 = vmatpush3.msra.mxu0 %v12711_v18 }
 0x121   :  { %11894 = vmatmul.mubr.f32.vlgmr.msra.gmra.mxu1 %v12820_v2  ;;  %11915 = vmatprep.subr.mxu1 %v15378_v15 }
 0x122   :  { %11978 = vmatprep.subr.mxu0 %v15378_v15  ;;  %11916 = vmatpush3.msra.mxu1 %v12692_v11 }
 0x123   :  { %11979 = vmatpush3.msra.mxu0 %v12723_v21  ;;  %11917 = vmatprep.subr.mxu1 %v15378_v15 }
 0x124   :  { %11980 = vmatprep.subr.mxu0 %v15378_v15  ;;  %11918 = vmatpush3.msra.mxu1 %v12700_v14 }
 0x125   :  { %11981 = vmatpush3.msra.mxu0 %v12735_v24  ;;  %11919 = vmatprep.subr.mxu1 %v15378_v15 }
 0x126   :  { %11982 = vmatprep.subr.mxu0 %v15378_v15  ;;  %11920 = vmatpush3.msra.mxu1 %v12711_v18 }
 0x127   :  { %11983 = vmatpush3.msra.mxu0 %v12747_v27  ;;  %11921 = vmatprep.subr.mxu1 %v15378_v15 }
 0x128   :  { %11984 = vmatprep.subr.mxu0 %v15378_v15  ;;  %11922 = vmatpush3.msra.mxu1 %v12723_v21 }
 0x129   :  { %11985 = vmatpush3.msra.mxu0 %v12759_v30  ;;  %11923 = vmatprep.subr.mxu1 %v15378_v15 }
 0x12a   :  { %11986 = vmatprep.subr.mxu0 %v15378_v15  ;;  %11924 = vmatpush3.msra.mxu1 %v12735_v24 }
 0x12b   :  { %11987 = vmatpush3.msra.mxu0 %v12771_v33  ;;  %11988 = vmatprep.mubr.msk.f32.mxu0 %vm12562_vm0, %v15378_v15 }
 0x12c   :  { %11925 = vmatprep.subr.mxu1 %v15378_v15  ;;  %11989 = vmatmul.mubr.f32.vlgmr.msra.gmra.mxu0 %v851_v61 }
 0x12d   :  { %12010 = vmatprep.subr.mxu0 %v15378_v15  ;;  %11926 = vmatpush3.msra.mxu1 %v12747_v27 }
 0x12e   :  { %12011 = vmatpush3.msra.mxu0 %v12698_v13  ;;  %11927 = vmatprep.subr.mxu1 %v15378_v15 }
 0x12f   :  { %12012 = vmatprep.subr.mxu0 %v15378_v15  ;;  %11928 = vmatpush3.msra.mxu1 %v12759_v30 }
 0x130   :  { %12013 = vmatpush3.msra.mxu0 %v12709_v17  ;;  %11929 = vmatprep.subr.mxu1 %v15378_v15 }
 0x131   :  { %12014 = vmatprep.subr.mxu0 %v15378_v15  ;;  %11930 = vmatpush3.msra.mxu1 %v12771_v33 }
 0x132   :  { %11931 = vmatprep.mubr.msk.f32.mxu1 %vm12562_vm0, %v15378_v15  ;;  %12015 = vmatpush3.msra.mxu0 %v12721_v20 }
 0x133   :  { %11932 = vmatmul.mubr.f32.vlgmr.msra.gmra.mxu1 %v309_v8  ;;  %11953 = vmatprep.subr.mxu1 %v15378_v15 }
 0x134   :  { %12016 = vmatprep.subr.mxu0 %v15378_v15  ;;  %11954 = vmatpush3.msra.mxu1 %v12692_v11 }
 0x135   :  { %12017 = vmatpush3.msra.mxu0 %v12733_v23  ;;  %11955 = vmatprep.subr.mxu1 %v15378_v15 }
 0x136   :  { %12018 = vmatprep.subr.mxu0 %v15378_v15  ;;  %11956 = vmatpush3.msra.mxu1 %v12700_v14 }
 0x137   :  { %12019 = vmatpush3.msra.mxu0 %v12745_v26  ;;  %11957 = vmatprep.subr.mxu1 %v15378_v15 }
 0x138   :  { %12020 = vmatprep.subr.mxu0 %v15378_v15  ;;  %11958 = vmatpush3.msra.mxu1 %v12711_v18 }
 0x139   :  { %12021 = vmatpush3.msra.mxu0 %v12757_v29  ;;  %11959 = vmatprep.subr.mxu1 %v15378_v15 }
 0x13a   :  { %12022 = vmatprep.subr.mxu0 %v15378_v15  ;;  %11960 = vmatpush3.msra.mxu1 %v12723_v21 }
 0x13b   :  { %12023 = vmatpush3.msra.mxu0 %v12769_v32  ;;  %11961 = vmatprep.subr.mxu1 %v15378_v15 }
 0x13c   :  { %12024 = vmatprep.subr.mxu0 %v15378_v15  ;;  %11962 = vmatpush3.msra.mxu1 %v12735_v24 }
 0x13d   :  { %12025 = vmatpush3.msra.mxu0 %v12779_v34  ;;  %12026 = vmatprep.mubr.msk.f32.mxu0 %vm12562_vm0, %v15378_v15 }
 0x13e   :  { %11963 = vmatprep.subr.mxu1 %v15378_v15  ;;  %12027 = vmatmul.mubr.f32.vlgmr.msra.gmra.mxu0 %v12926_v58 }
 0x13f   :  { %12048 = vmatprep.subr.mxu0 %v15378_v15  ;;  %11964 = vmatpush3.msra.mxu1 %v12747_v27 }
 0x140   :  { %12049 = vmatpush3.msra.mxu0 %v12823_v4  ;;  %11965 = vmatprep.subr.mxu1 %v15378_v15 }
 0x141   :  { %12050 = vmatprep.subr.mxu0 %v15378_v15  ;;  %11966 = vmatpush3.msra.mxu1 %v12759_v30 }
 0x142   :  { %12051 = vmatpush3.msra.mxu0 %v12829_v6  ;;  %11967 = vmatprep.subr.mxu1 %v15378_v15 }
 0x143   :  { %12052 = vmatprep.subr.mxu0 %v15378_v15  ;;  %11968 = vmatpush3.msra.mxu1 %v12771_v33 }
 0x144   :  { %11969 = vmatprep.mubr.msk.f32.mxu1 %vm12562_vm0, %v15378_v15  ;;  %12053 = vmatpush3.msra.mxu0 %v12837_v10 }
 0x145   :  { %11970 = vmatmul.mubr.f32.vlgmr.msra.gmra.mxu1 %v12820_v2  ;;  %11991 = vmatprep.subr.mxu1 %v15378_v15  ;;  %v13102_v2 = vand.u32 4294901760, %v13097_v1 }
 0x146   :  { %12054 = vmatprep.subr.mxu0 %v15378_v15  ;;  %11992 = vmatpush3.msra.mxu1 %v12848_v19 }
 0x147   :  { %12055 = vmatpush3.msra.mxu0 %v12851_v22  ;;  %11993 = vmatprep.subr.mxu1 %v15378_v15  ;;  %v1438_v3 = vsub.f32 %v13097_v1, %v13102_v2 }
 0x148   :  { %12056 = vmatprep.subr.mxu0 %v15378_v15  ;;  %11994 = vmatpush3.msra.mxu1 %v12857_v38 }
 0x149   :  { %12057 = vmatpush3.msra.mxu0 %v12860_v40  ;;  %11995 = vmatprep.subr.mxu1 %v15378_v15  ;;  %v13106_v7 = vand.u32 4294901760, %v1438_v3 }
 0x14a   :  { %12058 = vmatprep.subr.mxu0 %v15378_v15  ;;  %11996 = vmatpush3.msra.mxu1 %v12867_v42 }
 0x14b   :  { %12059 = vmatpush3.msra.mxu0 %v12870_v43  ;;  %11997 = vmatprep.subr.mxu1 %v15378_v15 }
 0x14c   :  { %12060 = vmatprep.subr.mxu0 %v15378_v15  ;;  %11998 = vmatpush3.msra.mxu1 %v12878_v45 }
 0x14d   :  { %12061 = vmatpush3.msra.mxu0 %v12881_v46  ;;  %11999 = vmatprep.subr.mxu1 %v15378_v15 }
 0x14e   :  { %12062 = vmatprep.subr.mxu0 %v15378_v15  ;;  %12000 = vmatpush3.msra.mxu1 %v12889_v49 }
 0x14f   :  { %12063 = vmatpush3.msra.mxu0 %v12892_v50  ;;  %12064 = vmatprep.mubr.msk.f32.mxu0 %vm12562_vm0, %v15378_v15 }
 0x150   :  { %12001 = vmatprep.subr.mxu1 %v15378_v15  ;;  %12065 = vmatmul.mubr.f32.vlgmr.msra.gmra.mxu0 %v12913_v56 }
 0x151   :  { %12002 = vmatpush3.msra.mxu1 %v12900_v52  ;;  %12007 = vmatprep.mubr.msk.f32.mxu1 %vm12562_vm0, %v15378_v15 }
 0x152   :  { %12003 = vmatprep.subr.mxu1 %v15378_v15  ;;  %12086 = vmatprep.subr.mxu0 %v15378_v15 }
 0x153   :  { %12004 = vmatpush3.msra.mxu1 %v12909_v55  ;;  %12088 = vmatprep.mubr.msk.f32.mxu0 %vm12562_vm0, %v15378_v15 }
 0x154   :  { %12005 = vmatprep.subr.mxu1 %v15378_v15  ;;  %12087 = vmatpush3.msra.mxu0 %v13094_v0 }
 0x155   :  { %12006 = vmatpush3.msra.mxu1 %v12917_v57  ;;  %12096 = vmatprep.subr.mxu0 %v15378_v15 }
 0x156   :  { %12008 = vmatmul.mubr.f32.vlgmr.msra.gmra.mxu1 %v12913_v56  ;;  %12029 = vmatprep.subr.mxu1 %v15378_v15 }
 0x157   :  { %12030 = vmatpush3.msra.mxu1 %v12692_v11  ;;  %12045 = vmatprep.mubr.msk.f32.mxu1 %vm12562_vm0, %v15378_v15 }
 0x158   :  { %12031 = vmatprep.subr.mxu1 %v15378_v15 }
 0x159   :  { %12032 = vmatpush3.msra.mxu1 %v12700_v14 }
 0x15a   :  { %12033 = vmatprep.subr.mxu1 %v15378_v15 }
 0x15b   :  { %12034 = vmatpush3.msra.mxu1 %v12711_v18 }
 0x15c   :  { %12035 = vmatprep.subr.mxu1 %v15378_v15 }
 0x15d   :  { %12036 = vmatpush3.msra.mxu1 %v12723_v21 }
 0x15e   :  { %12037 = vmatprep.subr.mxu1 %v15378_v15 }
 0x15f   :  { %12038 = vmatpush3.msra.mxu1 %v12735_v24 }
 0x160   :  { %12039 = vmatprep.subr.mxu1 %v15378_v15 }
 0x161   :  { %12040 = vmatpush3.msra.mxu1 %v12747_v27 }
 0x162   :  { %12041 = vmatprep.subr.mxu1 %v15378_v15 }
 0x163   :  { %12042 = vmatpush3.msra.mxu1 %v12759_v30 }
 0x164   :  { %12043 = vmatprep.subr.mxu1 %v15378_v15 }
 0x165   :  { %12044 = vmatpush3.msra.mxu1 %v12771_v33 }
 0x166   :  { %12046 = vmatmul.mubr.f32.vlgmr.msra.gmra.mxu1 %v849_v59  ;;  %12067 = vmatprep.subr.mxu1 %v15378_v15 }
 0x167   :  { %12068 = vmatpush3.msra.mxu1 %v12692_v11  ;;  %12083 = vmatprep.mubr.msk.f32.mxu1 %vm12562_vm0, %v15378_v15 }
 0x168   :  { %12069 = vmatprep.subr.mxu1 %v15378_v15 }
 0x169   :  { %12070 = vmatpush3.msra.mxu1 %v12700_v14 }
 0x16a   :  { %12071 = vmatprep.subr.mxu1 %v15378_v15 }
 0x16b   :  { %12072 = vmatpush3.msra.mxu1 %v12711_v18 }
 0x16c   :  { %12073 = vmatprep.subr.mxu1 %v15378_v15 }
 0x16d   :  { %12074 = vmatpush3.msra.mxu1 %v12723_v21 }
 0x16e   :  { %12075 = vmatprep.subr.mxu1 %v15378_v15 }
 0x16f   :  { %12076 = vmatpush3.msra.mxu1 %v12735_v24 }
 0x170   :  { %12077 = vmatprep.subr.mxu1 %v15378_v15 }
 0x171   :  { %12078 = vmatpush3.msra.mxu1 %v12747_v27 }
 0x172   :  { %12079 = vmatprep.subr.mxu1 %v15378_v15 }
 0x173   :  { %12080 = vmatpush3.msra.mxu1 %v12759_v30 }
 0x174   :  { %12081 = vmatprep.subr.mxu1 %v15378_v15 }
 0x175   :  { %12082 = vmatpush3.msra.mxu1 %v12771_v33 }
 0x176   :  { %12084 = vmatmul.mubr.f32.vlgmr.msra.gmra.mxu1 %v12913_v56  ;;  %12091 = vmatprep.subr.mxu1 %v15378_v15 }
 0x177   :  { %12093 = vmatprep.mubr.msk.f32.mxu1 %vm12562_vm0, %v15378_v15  ;;  %12092 = vmatpush3.msra.mxu1 %v13106_v7 }
 0x178   :  { %12101 = vmatprep.subr.mxu1 %v15378_v15 }
 0x1ca   :  { %v512_v5 = vpop.f32.mrf.mxu0 }
 0x1cc   :  { %v11914_v8 = vpop.f32.mrf.mxu0 }
 0x1d0   :  { %v313_v9 = vpop.f32.mrf.mxu1 }
 0x1d2   :  { %v11876_v12 = vpop.f32.mrf.mxu1 }
 0x1da   :  { %v688_v16 = vpop.f32.mrf.mxu0 }
 0x1dc   :  { %v11952_v25 = vpop.f32.mrf.mxu0 }
 0x1e1   :  { %v424_v28 = vpop.f32.mrf.mxu1 }
 0x1e2   :  { %v425_v31 = vadd.f32 %v424_v28, %v313_v9 }
 0x1e3   :  { %v11895_v41 = vpop.f32.mrf.mxu1 }
 0x1e4   :  { %v513_v44 = vadd.f32 %v512_v5, %v425_v31 }
 0x1ec   :  { %v853_v47 = vpop.f32.mrf.mxu0 }
 0x1ee   :  { %v11990_v48 = vpop.f32.mrf.mxu0 }
 0x1f3   :  { %v593_v51 = vpop.f32.mrf.mxu1 }
 0x1f4   :  { %v594_v53 = vadd.f32 %v593_v51, %v513_v44 }
 0x1f5   :  { %v11933_v54 = vpop.f32.mrf.mxu1 }
 0x1f6   :  { %v689_v56 = vadd.f32 %v688_v16, %v594_v53 }
 0x1fe   :  { %v1052_v58 = vpop.f32.mrf.mxu0 }
 0x200   :  { %v12028_v59 = vpop.f32.mrf.mxu0 }
 0x205   :  { %v767_v60 = vpop.f32.mrf.mxu1 }
 0x206   :  { %v768_v28 = vadd.f32 %v767_v60, %v689_v56 }
 0x207   :  { %v11971_v61 = vpop.f32.mrf.mxu1 }
 0x208   :  { %v1311_v31 = vmul.f32 0.001953125, %v768_v28  ;;  %v189_v61 = vld [vmem:[%s15360_s6] sm:$0x1] }
 0x20a   :  { %v1313_v16 = vmul.f32 %v1311_v31, %v1311_v31 }
 0x210   :  { %v1228_v62 = vpop.f32.mrf.mxu0 }
 0x212   :  { %v12066_v63 = vpop.f32.mrf.mxu0 }
 0x216   :  { %v964_v3 = vpop.f32.mrf.mxu1 }
 0x217   :  { %v965_v15 = vadd.f32 %v964_v3, %v853_v47 }
 0x218   :  { %v12009_v8 = vpop.f32.mrf.mxu1 }
 0x219   :  { %v1053_v9 = vadd.f32 %v1052_v58, %v965_v15  ;;  %v190_v15 = vld [vmem:[%s15361_s7] sm:$0x1]  ;;  %v15691_v8 = vmov 0.0  }
 0x226   :  { %v1133_v12 = vpop.f32.mrf.mxu1 }
 0x227   :  { %v1134_v5 = vadd.f32 %v1133_v12, %v1053_v9 }
 0x228   :  { %v12047_v25 = vpop.f32.mrf.mxu1 }
 0x229   :  { %v1229_v41 = vadd.f32 %v1228_v62, %v1134_v5 }
 0x236   :  { %v1307_v48 = vpop.f32.mrf.mxu1 }
 0x237   :  { %v1308_v44 = vadd.f32 %v1307_v48, %v1229_v41 }
 0x238   :  { %v12085_v51 = vpop.f32.mrf.mxu1 }
 0x239   :  { %v1312_v53 = vmul.f32 0.001953125, %v1308_v44  ;;  %v12499_v51 = vld [vmem:[%s15362_s2 + $0x18] sm:$0xff]  }
 0x23b   :  { %v1314_v54 = vsub.f32 %v1312_v53, %v1313_v16  ;;  %v12500_v16 = vld [vmem:[%s15362_s2 + $0x10] sm:$0xff]   ;;  %v12501_v53 = vld [vmem:[%s15362_s2 + $0x8] sm:$0xff]  }
 0x23d   :  { %v1315_v59 = vadd.f32 1e-05, %v1314_v54  ;;  %v12502_v54 = vld [vmem:[%s15362_s2] sm:$0xff]  }
 0x23f   :  { %12551 = vrsqrt.f32 %v1315_v59  ;;  %v12503_v59 = vld [vmem:[%s15363_s5] sm:$0xff]  }
 0x24c   :  { %v12552_v63 = vpop.eup %12551 }
 0x24d   :  { %v1317_v47 = vmul.f32 %v12552_v63, %v189_v61 }
 0x24f   :  { %v1322_v56 = vsel %vm1320_vm3, %v1317_v47, 0  ;;  %v1318_v58 = vmul.f32 %v1317_v47, %v1311_v31 }
 0x250   :  { %v1394_v60 = vand.u32 4294901760, %v1322_v56 }
 0x251   :  { %v1319_v62 = vsub.f32 %v190_v15, %v1318_v58 }
 0x252   :  { %v1395_v3 = vsub.f32 %v1322_v56, %v1394_v60  ;;  %12094 = vmatmul.mubr.f32.vlgmr.msra.gmra.mxu1 %v1394_v60 }
 0x253   :  { %12102 = vmatpush3.msra.mxu1 %v13094_v0  ;;  %12103 = vmatprep.mubr.msk.f32.mxu1 %vm12562_vm0, %v15691_v8  ;;  %v1775_v12 = vsel %vm1320_vm3, %v1319_v62, 0 }
 0x254   :  { %v1396_v25 = vand.u32 4294901760, %v1395_v3  ;;  %12111 = vmatprep.subr.mxu1 %v15691_v8  ;;  %v1843_v9 = vand.u32 4294901760, %v1775_v12 }
 0x256   :  { %12104 = vmatmul.mubr.f32.vlgmr.msra.gmra.mxu1 %v1396_v25  ;;  %v1397_v28 = vsub.f32 %v1395_v3, %v1396_v25  ;;  %v1844_v31 = vsub.f32 %v1775_v12, %v1843_v9 }
 0x257   :  { %12112 = vmatpush3.msra.mxu1 %v13094_v0  ;;  %12113 = vmatprep.mubr.msk.f32.mxu1 %vm12562_vm0, %v15691_v8 }
 0x258   :  { %v1398_v5 = vand.u32 4294901760, %v1397_v28  ;;  %12121 = vmatprep.subr.mxu1 %v15691_v8  ;;  %v1845_v41 = vand.u32 4294901760, %v1844_v31 }
 0x25a   :  { %12089 = vmatmul.mubr.f32.vlgmr.msra.gmra.mxu0 %v1398_v5  ;;  %12114 = vmatmul.mubr.f32.vlgmr.msra.gmra.mxu1 %v1394_v60  ;;  %v1846_v48 = vsub.f32 %v1844_v31, %v1845_v41 }
 0x25b   :  { %12097 = vmatpush3.msra.mxu0 %v13097_v1  ;;  %12098 = vmatprep.mubr.msk.f32.mxu0 %vm12562_vm0, %v15691_v8 }
 0x25c   :  { %12106 = vmatprep.subr.mxu0 %v15691_v8  ;;  %12122 = vmatpush3.msra.mxu1 %v13106_v7  ;;  %v1847_v44 = vand.u32 4294901760, %v1846_v48  ;;  %v2223_v48 = vlaneseq }
 0x25d   :  { %12123 = vmatprep.mubr.msk.f32.mxu1 %vm12562_vm0, %v15691_v8  ;;  %12131 = vmatprep.subr.mxu1 %v15691_v8 }
 0x25e   :  { %12099 = vmatmul.mubr.f32.vlgmr.msra.gmra.mxu0 %v1395_v3  ;;  %12124 = vmatmul.mubr.f32.vlgmr.msra.gmra.mxu1 %v1843_v9 }
 0x25f   :  { %12107 = vmatpush3.msra.mxu0 %v13102_v2  ;;  %12108 = vmatprep.mubr.msk.f32.mxu0 %vm12562_vm0, %v15691_v8 }
 0x260   :  { %12116 = vmatprep.subr.mxu0 %v15691_v8  ;;  %12132 = vmatpush3.msra.mxu1 %v13094_v0 }
 0x261   :  { %12133 = vmatprep.mubr.msk.f32.mxu1 %vm12562_vm0, %v15691_v8  ;;  %12141 = vmatprep.subr.mxu1 %v15691_v8 }
 0x262   :  { %12109 = vmatmul.mubr.f32.vlgmr.msra.gmra.mxu0 %v1394_v60  ;;  %12134 = vmatmul.mubr.f32.vlgmr.msra.gmra.mxu1 %v1845_v41 }
 0x263   :  { %12117 = vmatpush3.msra.mxu0 %v13094_v0  ;;  %12118 = vmatprep.mubr.msk.f32.mxu0 %vm12562_vm0, %v15691_v8 }
 0x264   :  { %12126 = vmatprep.subr.mxu0 %v15691_v8  ;;  %12142 = vmatpush3.msra.mxu1 %v13094_v0 }
 0x265   :  { %12143 = vmatprep.mubr.msk.f32.mxu1 %vm12562_vm0, %v15691_v8  ;;  %12154 = vmatprep.subr.bf16.mxu1 %v12499_v51 }
 0x266   :  { %12119 = vmatmul.mubr.f32.vlgmr.msra.gmra.mxu0 %v1847_v44  ;;  %12144 = vmatmul.mubr.f32.vlgmr.msra.gmra.mxu1 %v1843_v9 }
 0x267   :  { %12127 = vmatpush3.msra.mxu0 %v13097_v1  ;;  %12128 = vmatprep.mubr.msk.f32.mxu0 %vm12562_vm0, %v15691_v8 }
 0x268   :  { %12136 = vmatprep.subr.mxu0 %v15691_v8  ;;  %12155 = vmatpush3.bf16.msra.mxu1 %v12499_v51 }
 0x269   :  { %12156 = vmatprep.subr.bf16.mxu1 %v12500_v16 }
 0x26a   :  { %12129 = vmatmul.mubr.f32.vlgmr.msra.gmra.mxu0 %v1844_v31 }
 0x26b   :  { %12137 = vmatpush3.msra.mxu0 %v13102_v2  ;;  %12138 = vmatprep.mubr.msk.f32.mxu0 %vm12562_vm0, %v15691_v8 }
 0x26c   :  { %12157 = vmatpush3.bf16.msra.mxu1 %v12500_v16 }
 0x26d   :  { %12158 = vmatprep.subr.bf16.mxu1 %v12501_v53 }
 0x26e   :  { %12139 = vmatmul.mubr.f32.vlgmr.msra.gmra.mxu0 %v1843_v9 }
 0x26f   :  { %12150 = vmatprep.mubr.msk.bf16.mxu0 %vm2268_vm4, %v12503_v59 }
 0x270   :  { %12159 = vmatpush3.bf16.msra.mxu1 %v12501_v53 }
 0x271   :  { %12160 = vmatprep.subr.bf16.mxu1 %v12502_v54 }
 0x274   :  { %12161 = vmatpush3.bf16.msra.mxu1 %v12502_v54  ;;  %v2224_v54 = vshrl.u32 %v2223_v48, 7 }
 0x312   :  { %v1476_v61 = vpop.f32.mrf.mxu1 }
 0x314   :  { %v12095_v63 = vpop.f32.mrf.mxu1 }
 0x316   :  { %v1624_v47 = vpop.f32.mrf.mxu1 }
 0x318   :  { %v12105_v15 = vpop.f32.mrf.mxu1 }
 0x31a   :  { %v1400_v56 = vpop.f32.mrf.mxu0  ;;  %v1770_v58 = vpop.f32.mrf.mxu1 }
 0x31b   :  { %v1477_v3 = vadd.f32 %v1476_v61, %v1400_v56  ;;  %v13172_v61 = vsub.s32 0, %v2224_v54 }
 0x31c   :  { %v12090_v60 = vpop.f32.mrf.mxu0  ;;  %v12115_v62 = vpop.f32.mrf.mxu1 }
 0x31d   :  { %15692 = vst [vmem:[#allocation3_spill] sm:$0xff] %v13172_v61 }
 0x31e   :  { %v1550_v12 = vpop.f32.mrf.mxu0  ;;  %v1925_v25 = vpop.f32.mrf.mxu1 }
 0x31f   :  { %v1551_v9 = vadd.f32 %v1550_v12, %v1477_v3 }
 0x320   :  { %v12100_v28 = vpop.f32.mrf.mxu0  ;;  %v12125_v5 = vpop.f32.mrf.mxu1 }
 0x321   :  { %v1625_v31 = vadd.f32 %v1624_v47, %v1551_v9 }
 0x322   :  { %v1698_v41 = vpop.f32.mrf.mxu0  ;;  %v2073_v44 = vpop.f32.mrf.mxu1 }
 0x323   :  { %v1699_v53 = vadd.f32 %v1698_v41, %v1625_v31 }
 0x324   :  { %v12110_v51 = vpop.f32.mrf.mxu0  ;;  %v12135_v16 = vpop.f32.mrf.mxu1 }
 0x325   :  { %v1771_v62 = vadd.f32 %v1770_v58, %v1699_v53 }
 0x326   :  { %v1849_v59 = vpop.f32.mrf.mxu0  ;;  %v2219_v63 = vpop.f32.mrf.mxu1 }
 0x327   :  { %v1926_v60 = vadd.f32 %v1925_v25, %v1849_v59  ;;  %v2226_v47 = vrot.slane %v1771_v62, %v13172_v61 }
 0x328   :  { %v12120_v15 = vpop.f32.mrf.mxu0  ;;  %v12145_v1 = vpop.f32.mrf.mxu1 }
 0x329   :  { %v2227_v31 = vmul.f32 %v2226_v47, %v12793_v36  ;;  %v2228_v41 = vmul.f32 %v2226_v47, %v12799_v39  ;;  %v2229_v1 = vmul.f32 %v12791_v35, %v2226_v47  ;;  %v2230_v58 = vmul.f32 %v12795_v37, %v2226_v47  ;;  %v12505_v35 = vld [vmem:[%s15362_s2 + $0x38] sm:$0xff]   ;;  %v12504_v37 = vld [vmem:[%s15363_s5 + $0x8] sm:$0xff]   ;;  %v12506_v39 = vld [vmem:[%s15362_s2 + $0x30] sm:$0xff]  }
 0x32a   :  { %v1999_v56 = vpop.f32.mrf.mxu0 }
 0x32b   :  { %v2000_v3 = vadd.f32 %v1999_v56, %v1926_v60 }
 0x32c   :  { %v12130_v12 = vpop.f32.mrf.mxu0 }
 0x32d   :  { %v2074_v28 = vadd.f32 %v2073_v44, %v2000_v3  ;;  %v12508_v3 = vld [vmem:[%s15362_s2 + $0x20] sm:$0xff]  }
 0x32e   :  { %v2147_v9 = vpop.f32.mrf.mxu0 }
 0x32f   :  { %v2148_v5 = vadd.f32 %v2147_v9, %v2074_v28 }
 0x330   :  { %v12140_v51 = vpop.f32.mrf.mxu0 }
 0x331   :  { %v2220_v16 = vadd.f32 %v2219_v63, %v2148_v5  ;;  %v12507_v63 = vld [vmem:[%s15362_s2 + $0x28] sm:$0xff]   ;;  %v12509_v51 = vld [vmem:[%s15363_s5 + $0x10] sm:$0xff]  }
 0x333   :  { %v2234_v25 = vrot.slane %v2220_v16, %v13172_v61 }
 0x335   :  { %v2235_v48 = vadd.f32 %v2234_v25, %v2227_v31  ;;  %v2236_v53 = vadd.f32 %v2234_v25, %v2228_v41  ;;  %v2237_v54 = vadd.f32 %v2234_v25, %v2229_v1  ;;  %v2238_v44 = vadd.f32 %v2234_v25, %v2230_v58  ;;  %v12510_v31 = vld [vmem:[%s15363_s5 + $0x18] sm:$0xff]   ;;  %v12512_v1 = vld [vmem:[%s15362_s2 + $0x50] sm:$0xff]   ;;  %v12513_v58 = vld [vmem:[%s15362_s2 + $0x48] sm:$0xff]  }
 0x336   :  { %v12511_v41 = vld [vmem:[%s15362_s2 + $0x58] sm:$0xff]   ;;  %v12514_v25 = vld [vmem:[%s15362_s2 + $0x40] sm:$0xff]  }
 0x337   :  { %v2239_v59 = vmax.f32 %v2235_v48, 0.0  ;;  %v2240_v15 = vmax.f32 %v2236_v53, 0.0  ;;  %v2241_v60 = vmax.f32 %v2237_v54, 0.0  ;;  %v2242_v62 = vmax.f32 %v2238_v44, 0.0 }
 0x339   :  { %v2244_v56 = vpack.c.bf16 %v2242_v62, %v2241_v60  ;;  %v2243_v36 = vpack.c.bf16 %v2240_v15, %v2239_v59 }
 0x33b   :  { %12146 = vmatprep.subr.bf16.mxu0 %v2244_v56  ;;  %12178 = vmatprep.subr.bf16.mxu1 %v2244_v56 }
 0x33c   :  { %12147 = vmatpush3.bf16.msra.mxu0 %v2244_v56 }
 0x33d   :  { %12148 = vmatprep.subr.bf16.mxu0 %v2243_v36 }
 0x340   :  { %12149 = vmatpush3.bf16.msra.mxu0 %v2243_v36 }
 0x341   :  { %12166 = vmatprep.subr.bf16.mxu0 %v12505_v35 }
 0x343   :  { %12151 = vmatmul.mubr.msk.bf16.vlgmr.msra.gmra.mxu0 %vm2268_vm4, %v12504_v37 }
 0x344   :  { %12167 = vmatpush3.bf16.msra.mxu0 %v12505_v35  ;;  %12174 = vmatprep.mubr.msk.bf16.mxu0 %vm200_vm1, %v2243_v36 }
 0x345   :  { %12168 = vmatprep.subr.bf16.mxu0 %v12506_v39 }
 0x348   :  { %12169 = vmatpush3.bf16.msra.mxu0 %v12506_v39 }
 0x349   :  { %12170 = vmatprep.subr.bf16.mxu0 %v12507_v63 }
 0x34c   :  { %12171 = vmatpush3.bf16.msra.mxu0 %v12507_v63 }
 0x34d   :  { %12172 = vmatprep.subr.bf16.mxu0 %v12508_v3 }
 0x350   :  { %12173 = vmatpush3.bf16.msra.mxu0 %v12508_v3 }
 0x351   :  { %12186 = vmatprep.subr.bf16.mxu0 %v12511_v41 }
 0x353   :  { %12175 = vmatmul.mubr.msk.bf16.vlgmr.msra.gmra.mxu0 %vm200_vm1, %v2244_v56 }
 0x354   :  { %12187 = vmatpush3.bf16.msra.mxu0 %v12511_v41 }
 0x355   :  { %12188 = vmatprep.subr.bf16.mxu0 %v12512_v1 }
 0x358   :  { %12189 = vmatpush3.bf16.msra.mxu0 %v12512_v1 }
 0x359   :  { %12190 = vmatprep.subr.bf16.mxu0 %v12513_v58 }
 0x35c   :  { %12191 = vmatpush3.bf16.msra.mxu0 %v12513_v58 }
 0x35d   :  { %12192 = vmatprep.subr.bf16.mxu0 %v12514_v25 }
 0x360   :  { %12193 = vmatpush3.bf16.msra.mxu0 %v12514_v25 }
 0x361   :  { %12217 = vmatprep.subr.mxu0 %v15691_v8 }
 0x403   :  { %v12152_v12 = vpop.f32.mrf.mxu0 }
 0x405   :  { %v2309_v28 = vpop.f32.mrf.mxu0 }
 0x407   :  { %v12153_v47 = vpop.f32.mrf.mxu0 }
 0x408   :  { %v2325_v16 = vpack.c.bf16 %v12153_v47, %v12152_v12 }
 0x409   :  { %v2312_v9 = vpop.f32.mrf.mxu0 }
 0x40a   :  { %v2324_v5 = vpack.c.bf16 %v2312_v9, %v2309_v28 }
 0x40c   :  { %12162 = vmatprep.mubr.msk.bf16.mxu1 %vm200_vm1, %v2324_v5 }
 0x40d   :  { %12163 = vmatmul.mubr.msk.bf16.vlgmr.msra.gmra.mxu1 %vm200_vm1, %v2325_v16 }
 0x40e   :  { %12179 = vmatpush3.bf16.msra.mxu1 %v2244_v56  ;;  %12182 = vmatprep.mubr.msk.bf16.mxu1 %vm2268_vm4, %v12509_v51 }
 0x40f   :  { %12180 = vmatprep.subr.bf16.mxu1 %v2243_v36 }
 0x412   :  { %12181 = vmatpush3.bf16.msra.mxu1 %v2243_v36 }
 0x413   :  { %12198 = vmatprep.subr.mxu1 %v15691_v8  ;;  %v12176_v35 = vpop.f32.mrf.mxu0 }
 0x415   :  { %12183 = vmatmul.mubr.msk.bf16.vlgmr.msra.gmra.mxu1 %vm2268_vm4, %v12510_v31  ;;  %v2477_v37 = vpop.f32.mrf.mxu0 }
 0x416   :  { %12199 = vmatpush3.msra.mxu1 %v12692_v11  ;;  %12214 = vmatprep.mubr.msk.f32.mxu1 %vm12562_vm0, %v15691_v8 }
 0x417   :  { %12200 = vmatprep.subr.mxu1 %v15691_v8  ;;  %v12177_v39 = vpop.f32.mrf.mxu0 }
 0x418   :  { %12201 = vmatpush3.msra.mxu1 %v12700_v14 }
 0x419   :  { %12202 = vmatprep.subr.mxu1 %v15691_v8  ;;  %v2480_v63 = vpop.f32.mrf.mxu0 }
 0x41a   :  { %12203 = vmatpush3.msra.mxu1 %v12711_v18 }
 0x41b   :  { %12204 = vmatprep.subr.mxu1 %v15691_v8 }
 0x41c   :  { %12205 = vmatpush3.msra.mxu1 %v12723_v21 }
 0x41d   :  { %12206 = vmatprep.subr.mxu1 %v15691_v8 }
 0x41e   :  { %12207 = vmatpush3.msra.mxu1 %v12735_v24 }
 0x41f   :  { %12208 = vmatprep.subr.mxu1 %v15691_v8 }
 0x420   :  { %12209 = vmatpush3.msra.mxu1 %v12747_v27 }
 0x421   :  { %12210 = vmatprep.subr.mxu1 %v15691_v8 }
 0x422   :  { %12211 = vmatpush3.msra.mxu1 %v12759_v30 }
 0x423   :  { %12212 = vmatprep.subr.mxu1 %v15691_v8 }
 0x424   :  { %12213 = vmatpush3.msra.mxu1 %v12771_v33 }
 0x425   :  { %12236 = vmatprep.subr.mxu1 %v15691_v8 }
 0x4cd   :  { %v12164_v48 = vpop.f32.mrf.mxu1 }
 0x4ce   :  { %v2486_v9 = vadd.f32 %v12176_v35, %v12164_v48 }
 0x4cf   :  { %v2398_v53 = vpop.f32.mrf.mxu1 }
 0x4d0   :  { %v2478_v28 = vadd.f32 %v2477_v37, %v2398_v53 }
 0x4d1   :  { %v12165_v54 = vpop.f32.mrf.mxu1 }
 0x4d2   :  { %v2489_v31 = vadd.f32 %v12177_v39, %v12165_v54 }
 0x4d3   :  { %v2401_v44 = vpop.f32.mrf.mxu1 }
 0x4d4   :  { %v2481_v5 = vadd.f32 %v2480_v63, %v2401_v44 }
 0x4d5   :  { %v12184_v59 = vpop.f32.mrf.mxu1 }
 0x4d7   :  { %v2547_v15 = vpop.f32.mrf.mxu1 }
 0x4d9   :  { %v12185_v60 = vpop.f32.mrf.mxu1 }
 0x4da   :  { %v2563_v36 = vpack.c.bf16 %v12185_v60, %v12184_v59 }
 0x4db   :  { %v2550_v62 = vpop.f32.mrf.mxu1 }
 0x4dc   :  { %v2562_v56 = vpack.c.bf16 %v2550_v62, %v2547_v15 }
 0x4de   :  { %12194 = vmatprep.mubr.msk.bf16.mxu0 %vm200_vm1, %v2562_v56 }
 0x4df   :  { %12195 = vmatmul.mubr.msk.bf16.vlgmr.msra.gmra.mxu0 %vm200_vm1, %v2563_v36 }
 0x4e0   :  { %12218 = vmatpush3.msra.mxu0 %v12848_v19  ;;  %12233 = vmatprep.mubr.msk.f32.mxu0 %vm12562_vm0, %v15691_v8 }
 0x4e1   :  { %12219 = vmatprep.subr.mxu0 %v15691_v8 }
 0x4e2   :  { %12220 = vmatpush3.msra.mxu0 %v12857_v38 }
 0x4e3   :  { %12221 = vmatprep.subr.mxu0 %v15691_v8 }
 0x4e4   :  { %12222 = vmatpush3.msra.mxu0 %v12867_v42 }
 0x4e5   :  { %12223 = vmatprep.subr.mxu0 %v15691_v8 }
 0x4e6   :  { %12224 = vmatpush3.msra.mxu0 %v12878_v45 }
 0x4e7   :  { %12225 = vmatprep.subr.mxu0 %v15691_v8 }
 0x4e8   :  { %12226 = vmatpush3.msra.mxu0 %v12889_v49 }
 0x4e9   :  { %12227 = vmatprep.subr.mxu0 %v15691_v8 }
 0x4ea   :  { %12228 = vmatpush3.msra.mxu0 %v12900_v52 }
 0x4eb   :  { %12229 = vmatprep.subr.mxu0 %v15691_v8 }
 0x4ec   :  { %12230 = vmatpush3.msra.mxu0 %v12909_v55 }
 0x4ed   :  { %12231 = vmatprep.subr.mxu0 %v15691_v8 }
 0x4ee   :  { %12232 = vmatpush3.msra.mxu0 %v12917_v57 }
 0x4ef   :  { %12255 = vmatprep.subr.mxu0 %v15691_v8 }
 0x59f   :  { %v12196_v3 = vpop.f32.mrf.mxu0 }
 0x5a0   :  { %v13262_v41 = vadd.f32 %v12196_v3, %v2486_v9 }
 0x5a1   :  { %v2637_v12 = vpop.f32.mrf.mxu0 }
 0x5a2   :  { %v13260_v51 = vadd.f32 %v2637_v12, %v2478_v28  ;;  %v2661_v48 = vsel %vm200_vm1, %v13262_v41, 0.0 }
 0x5a3   :  { %v12197_v47 = vpop.f32.mrf.mxu0 }
 0x5a4   :  { %v2658_v58 = vsel %vm200_vm1, %v13260_v51, 0.0  ;;  %v13268_v25 = vadd.f32 %v12197_v47, %v2489_v31  ;;  %v2671_v12 = vmul.f32 %v13260_v51, %v13260_v51 }
 0x5a5   :  { %v2640_v16 = vpop.f32.mrf.mxu0 }
 0x5a6   :  { %v13264_v1 = vadd.f32 %v2640_v16, %v2481_v5  ;;  %v2663_v54 = vsel %vm200_vm1, %v13268_v25, 0.0  ;;  %v2673_v5 = vmul.f32 %v13262_v41, %v13262_v41  ;;  %v2675_v16 = vsel %vm200_vm1, %v2671_v12, 0.0 }
 0x5a8   :  { %v2659_v59 = vsel %vm200_vm1, %v13264_v1, 0.0  ;;  %v2672_v39 = vmul.f32 %v13264_v1, %v13264_v1 }
 0x5a9   :  { %v2660_v53 = vadd.f32 %v2659_v59, %v2658_v58 }
 0x5aa   :  { %v2676_v47 = vsel %vm200_vm1, %v2672_v39, 0.0 }
 0x5ab   :  { %v2662_v44 = vadd.f32 %v2661_v48, %v2660_v53  ;;  %v2677_v31 = vadd.f32 %v2676_v47, %v2675_v16  ;;  %v2678_v53 = vsel %vm200_vm1, %v2673_v5, 0.0  ;;  %v2674_v48 = vmul.f32 %v13268_v25, %v13268_v25 }
 0x5ad   :  { %v2664_v15 = vadd.f32 %v2663_v54, %v2662_v44  ;;  %v2679_v44 = vadd.f32 %v2678_v53, %v2677_v31  ;;  %v2680_v54 = vsel %vm200_vm1, %v2674_v48, 0.0  ;;  %v2656_v48 = vld [vmem:[%s15364_s8] sm:$0x1] }
 0x5af   :  { %v2665_v60 = vrot.slane %v2664_v15, 4 }
 0x5b1   :  { %v2666_v62 = vadd.f32 %v2665_v60, %v2664_v15  ;;  %v2681_v15 = vadd.f32 %v2680_v54, %v2679_v44 }
 0x5b3   :  { %v2667_v56 = vrot.slane %v2666_v62, 2  ;;  %v2682_v60 = vrot.slane %v2681_v15, 4 }
 0x5b5   :  { %v2668_v36 = vadd.f32 %v2667_v56, %v2666_v62  ;;  %v2683_v62 = vadd.f32 %v2682_v60, %v2681_v15  ;;  %v2657_v15 = vld [vmem:[%s15365_s9] sm:$0x1] }
 0x5b7   :  { %v2669_v35 = vrot.slane %v2668_v36, 1  ;;  %v2684_v56 = vrot.slane %v2683_v62, 2 }
 0x5b9   :  { %v2670_v37 = vadd.f32 %v2669_v35, %v2668_v36  ;;  %v2685_v36 = vadd.f32 %v2684_v56, %v2683_v62 }
 0x5bb   :  { %v2689_v63 = vsel %vm200_vm1, %v2670_v37, 0  ;;  %v2686_v35 = vrot.slane %v2685_v36, 1 }
 0x5bc   :  { %v13279_v3 = vand.u32 4294901760, %v2689_v63 }
 0x5bd   :  { %v2687_v37 = vadd.f32 %v2686_v35, %v2685_v36 }
 0x5be   :  { %v2765_v28 = vsub.f32 %v2689_v63, %v13279_v3  ;;  %12234 = vmatmul.mubr.f32.vlgmr.msra.gmra.mxu0 %v13279_v3 }
 0x5bf   :  { %12256 = vmatpush3.msra.mxu0 %v12692_v11  ;;  %12271 = vmatprep.mubr.msk.f32.mxu0 %vm12562_vm0, %v15691_v8 }
 0x5c0   :  { %12257 = vmatprep.subr.mxu0 %v15691_v8  ;;  %v2766_v9 = vand.u32 4294901760, %v2765_v28 }
 0x5c1   :  { %12258 = vmatpush3.msra.mxu0 %v12700_v14 }
 0x5c2   :  { %12259 = vmatprep.subr.mxu0 %v15691_v8  ;;  %v2767_v58 = vsub.f32 %v2765_v28, %v2766_v9 }
 0x5c3   :  { %12260 = vmatpush3.msra.mxu0 %v12711_v18 }
 0x5c4   :  { %12261 = vmatprep.subr.mxu0 %v15691_v8  ;;  %v2768_v59 = vand.u32 4294901760, %v2767_v58 }
 0x5c5   :  { %12262 = vmatpush3.msra.mxu0 %v12723_v21 }
 0x5c6   :  { %12263 = vmatprep.subr.mxu0 %v15691_v8  ;;  %12215 = vmatmul.mubr.f32.vlgmr.msra.gmra.mxu1 %v2768_v59 }
 0x5c7   :  { %12237 = vmatpush3.msra.mxu1 %v12698_v13  ;;  %12264 = vmatpush3.msra.mxu0 %v12735_v24 }
 0x5c8   :  { %12238 = vmatprep.subr.mxu1 %v15691_v8  ;;  %12265 = vmatprep.subr.mxu0 %v15691_v8 }
 0x5c9   :  { %12239 = vmatpush3.msra.mxu1 %v12709_v17  ;;  %12266 = vmatpush3.msra.mxu0 %v12747_v27 }
 0x5ca   :  { %12240 = vmatprep.subr.mxu1 %v15691_v8  ;;  %12267 = vmatprep.subr.mxu0 %v15691_v8 }
 0x5cb   :  { %12241 = vmatpush3.msra.mxu1 %v12721_v20  ;;  %12268 = vmatpush3.msra.mxu0 %v12759_v30 }
 0x5cc   :  { %12242 = vmatprep.subr.mxu1 %v15691_v8  ;;  %12269 = vmatprep.subr.mxu0 %v15691_v8 }
 0x5cd   :  { %12243 = vmatpush3.msra.mxu1 %v12733_v23  ;;  %12270 = vmatpush3.msra.mxu0 %v12771_v33 }
 0x5ce   :  { %12244 = vmatprep.subr.mxu1 %v15691_v8  ;;  %12272 = vmatmul.mubr.f32.vlgmr.msra.gmra.mxu0 %v2766_v9 }
 0x5cf   :  { %12293 = vmatprep.subr.mxu0 %v15691_v8  ;;  %12245 = vmatpush3.msra.mxu1 %v12745_v26 }
 0x5d0   :  { %12294 = vmatpush3.msra.mxu0 %v12692_v11  ;;  %12246 = vmatprep.subr.mxu1 %v15691_v8 }
 0x5d1   :  { %12295 = vmatprep.subr.mxu0 %v15691_v8  ;;  %12247 = vmatpush3.msra.mxu1 %v12757_v29 }
 0x5d2   :  { %12296 = vmatpush3.msra.mxu0 %v12700_v14  ;;  %12248 = vmatprep.subr.mxu1 %v15691_v8 }
 0x5d3   :  { %12297 = vmatprep.subr.mxu0 %v15691_v8  ;;  %12249 = vmatpush3.msra.mxu1 %v12769_v32 }
 0x5d4   :  { %12298 = vmatpush3.msra.mxu0 %v12711_v18  ;;  %12250 = vmatprep.subr.mxu1 %v15691_v8 }
 0x5d5   :  { %12299 = vmatprep.subr.mxu0 %v15691_v8  ;;  %12251 = vmatpush3.msra.mxu1 %v12779_v34 }
 0x5d6   :  { %12252 = vmatprep.mubr.msk.f32.mxu1 %vm12562_vm0, %v15691_v8  ;;  %12300 = vmatpush3.msra.mxu0 %v12723_v21 }
 0x5d7   :  { %12253 = vmatmul.mubr.f32.vlgmr.msra.gmra.mxu1 %v2765_v28  ;;  %12274 = vmatprep.subr.mxu1 %v15691_v8 }
 0x5d8   :  { %12301 = vmatprep.subr.mxu0 %v15691_v8  ;;  %12275 = vmatpush3.msra.mxu1 %v12823_v4 }
 0x5d9   :  { %12302 = vmatpush3.msra.mxu0 %v12735_v24  ;;  %12276 = vmatprep.subr.mxu1 %v15691_v8 }
 0x5da   :  { %12303 = vmatprep.subr.mxu0 %v15691_v8  ;;  %12277 = vmatpush3.msra.mxu1 %v12829_v6 }
 0x5db   :  { %12304 = vmatpush3.msra.mxu0 %v12747_v27  ;;  %12278 = vmatprep.subr.mxu1 %v15691_v8 }
 0x5dc   :  { %12305 = vmatprep.subr.mxu0 %v15691_v8  ;;  %12279 = vmatpush3.msra.mxu1 %v12837_v10 }
 0x5dd   :  { %12306 = vmatpush3.msra.mxu0 %v12759_v30  ;;  %12280 = vmatprep.subr.mxu1 %v15691_v8 }
 0x5de   :  { %12307 = vmatprep.subr.mxu0 %v15691_v8  ;;  %12281 = vmatpush3.msra.mxu1 %v12851_v22 }
 0x5df   :  { %12308 = vmatpush3.msra.mxu0 %v12771_v33  ;;  %12309 = vmatprep.mubr.msk.f32.mxu0 %vm12562_vm0, %v15691_v8 }
 0x5e0   :  { %12282 = vmatprep.subr.mxu1 %v15691_v8  ;;  %12310 = vmatmul.mubr.f32.vlgmr.msra.gmra.mxu0 %v13279_v3 }
 0x5e1   :  { %12331 = vmatprep.subr.mxu0 %v15691_v8  ;;  %12283 = vmatpush3.msra.mxu1 %v12860_v40 }
 0x5e2   :  { %12332 = vmatpush3.msra.mxu0 %v12848_v19  ;;  %12284 = vmatprep.subr.mxu1 %v15691_v8  ;;  %v3229_v19 = vsel %vm200_vm1, %v2687_v37, 0 }
 0x5e3   :  { %12333 = vmatprep.subr.mxu0 %v15691_v8  ;;  %12285 = vmatpush3.msra.mxu1 %v12870_v43 }
 0x5e4   :  { %12334 = vmatpush3.msra.mxu0 %v12857_v38  ;;  %12286 = vmatprep.subr.mxu1 %v15691_v8  ;;  %v13375_v38 = vand.u32 4294901760, %v3229_v19 }
 0x5e5   :  { %12335 = vmatprep.subr.mxu0 %v15691_v8  ;;  %12287 = vmatpush3.msra.mxu1 %v12881_v46 }
 0x5e6   :  { %12336 = vmatpush3.msra.mxu0 %v12867_v42  ;;  %12288 = vmatprep.subr.mxu1 %v15691_v8  ;;  %v13386_v42 = vsub.f32 %v3229_v19, %v13375_v38 }
 0x5e7   :  { %12337 = vmatprep.subr.mxu0 %v15691_v8  ;;  %12289 = vmatpush3.msra.mxu1 %v12892_v50 }
 0x5e8   :  { %12290 = vmatprep.mubr.msk.f32.mxu1 %vm12562_vm0, %v15691_v8  ;;  %12338 = vmatpush3.msra.mxu0 %v12878_v45  ;;  %v3306_v45 = vand.u32 4294901760, %v13386_v42 }
 0x5e9   :  { %12291 = vmatmul.mubr.f32.vlgmr.msra.gmra.mxu1 %v13279_v3  ;;  %12312 = vmatprep.subr.mxu1 %v15691_v8 }
 0x5ea   :  { %12339 = vmatprep.subr.mxu0 %v15691_v8  ;;  %12313 = vmatpush3.msra.mxu1 %v12692_v11 }
 0x5eb   :  { %12340 = vmatpush3.msra.mxu0 %v12889_v49  ;;  %12314 = vmatprep.subr.mxu1 %v15691_v8  ;;  %v3307_v49 = vsub.f32 %v13386_v42, %v3306_v45 }
 0x5ec   :  { %12341 = vmatprep.subr.mxu0 %v15691_v8  ;;  %12315 = vmatpush3.msra.mxu1 %v12700_v14 }
 0x5ed   :  { %12342 = vmatpush3.msra.mxu0 %v12900_v52  ;;  %12316 = vmatprep.subr.mxu1 %v15691_v8  ;;  %v3308_v52 = vand.u32 4294901760, %v3307_v49 }
 0x5ee   :  { %12343 = vmatprep.subr.mxu0 %v15691_v8  ;;  %12317 = vmatpush3.msra.mxu1 %v12711_v18 }
 0x5ef   :  { %12344 = vmatpush3.msra.mxu0 %v12909_v55  ;;  %12318 = vmatprep.subr.mxu1 %v15691_v8 }
 0x5f0   :  { %12345 = vmatprep.subr.mxu0 %v15691_v8  ;;  %12319 = vmatpush3.msra.mxu1 %v12723_v21 }
 0x5f1   :  { %12346 = vmatpush3.msra.mxu0 %v12917_v57  ;;  %12347 = vmatprep.mubr.msk.f32.mxu0 %vm12562_vm0, %v15691_v8 }
 0x5f2   :  { %12320 = vmatprep.subr.mxu1 %v15691_v8  ;;  %12348 = vmatmul.mubr.f32.vlgmr.msra.gmra.mxu0 %v13375_v38 }
 0x5f3   :  { %12369 = vmatprep.subr.mxu0 %v15691_v8  ;;  %12321 = vmatpush3.msra.mxu1 %v12735_v24 }
 0x5f4   :  { %12370 = vmatpush3.msra.mxu0 %v12692_v11  ;;  %12322 = vmatprep.subr.mxu1 %v15691_v8 }
 0x5f5   :  { %12371 = vmatprep.subr.mxu0 %v15691_v8  ;;  %12323 = vmatpush3.msra.mxu1 %v12747_v27 }
 0x5f6   :  { %12372 = vmatpush3.msra.mxu0 %v12700_v14  ;;  %12324 = vmatprep.subr.mxu1 %v15691_v8 }
 0x5f7   :  { %12373 = vmatprep.subr.mxu0 %v15691_v8  ;;  %12325 = vmatpush3.msra.mxu1 %v12759_v30 }
 0x5f8   :  { %12374 = vmatpush3.msra.mxu0 %v12711_v18  ;;  %12326 = vmatprep.subr.mxu1 %v15691_v8 }
 0x5f9   :  { %12375 = vmatprep.subr.mxu0 %v15691_v8  ;;  %12327 = vmatpush3.msra.mxu1 %v12771_v33 }
 0x5fa   :  { %12328 = vmatprep.mubr.msk.f32.mxu1 %vm12562_vm0, %v15691_v8  ;;  %12376 = vmatpush3.msra.mxu0 %v12723_v21 }
 0x5fb   :  { %12329 = vmatmul.mubr.f32.vlgmr.msra.gmra.mxu1 %v3308_v52  ;;  %12350 = vmatprep.subr.mxu1 %v15691_v8 }
 0x5fc   :  { %12377 = vmatprep.subr.mxu0 %v15691_v8  ;;  %12351 = vmatpush3.msra.mxu1 %v12698_v13 }
 0x5fd   :  { %12378 = vmatpush3.msra.mxu0 %v12735_v24  ;;  %12352 = vmatprep.subr.mxu1 %v15691_v8 }
 0x5fe   :  { %12379 = vmatprep.subr.mxu0 %v15691_v8  ;;  %12353 = vmatpush3.msra.mxu1 %v12709_v17 }
 0x5ff   :  { %12380 = vmatpush3.msra.mxu0 %v12747_v27  ;;  %12354 = vmatprep.subr.mxu1 %v15691_v8 }
 0x600   :  { %12381 = vmatprep.subr.mxu0 %v15691_v8  ;;  %12355 = vmatpush3.msra.mxu1 %v12721_v20 }
 0x601   :  { %12382 = vmatpush3.msra.mxu0 %v12759_v30  ;;  %12356 = vmatprep.subr.mxu1 %v15691_v8 }
 0x602   :  { %12383 = vmatprep.subr.mxu0 %v15691_v8  ;;  %12357 = vmatpush3.msra.mxu1 %v12733_v23 }
 0x603   :  { %12384 = vmatpush3.msra.mxu0 %v12771_v33  ;;  %12385 = vmatprep.mubr.msk.f32.mxu0 %vm12562_vm0, %v15691_v8 }
 0x604   :  { %12358 = vmatprep.subr.mxu1 %v15691_v8  ;;  %12386 = vmatmul.mubr.f32.vlgmr.msra.gmra.mxu0 %v3306_v45 }
 0x605   :  { %12407 = vmatprep.subr.mxu0 %v15691_v8  ;;  %12359 = vmatpush3.msra.mxu1 %v12745_v26 }
 0x606   :  { %12408 = vmatpush3.msra.mxu0 %v12692_v11  ;;  %12360 = vmatprep.subr.mxu1 %v15691_v8 }
 0x607   :  { %12409 = vmatprep.subr.mxu0 %v15691_v8  ;;  %12361 = vmatpush3.msra.mxu1 %v12757_v29 }
 0x608   :  { %12410 = vmatpush3.msra.mxu0 %v12700_v14  ;;  %12362 = vmatprep.subr.mxu1 %v15691_v8 }
 0x609   :  { %12411 = vmatprep.subr.mxu0 %v15691_v8  ;;  %12363 = vmatpush3.msra.mxu1 %v12769_v32 }
 0x60a   :  { %12412 = vmatpush3.msra.mxu0 %v12711_v18  ;;  %12364 = vmatprep.subr.mxu1 %v15691_v8 }
 0x60b   :  { %12413 = vmatprep.subr.mxu0 %v15691_v8  ;;  %12365 = vmatpush3.msra.mxu1 %v12779_v34 }
 0x60c   :  { %12366 = vmatprep.mubr.msk.f32.mxu1 %vm12562_vm0, %v15691_v8  ;;  %12414 = vmatpush3.msra.mxu0 %v12723_v21 }
 0x60d   :  { %12367 = vmatmul.mubr.f32.vlgmr.msra.gmra.mxu1 %v13386_v42  ;;  %12388 = vmatprep.subr.mxu1 %v15691_v8 }
 0x60e   :  { %12415 = vmatprep.subr.mxu0 %v15691_v8  ;;  %12389 = vmatpush3.msra.mxu1 %v12823_v4 }
 0x60f   :  { %12416 = vmatpush3.msra.mxu0 %v12735_v24  ;;  %12390 = vmatprep.subr.mxu1 %v15691_v8 }
 0x610   :  { %12417 = vmatprep.subr.mxu0 %v15691_v8  ;;  %12391 = vmatpush3.msra.mxu1 %v12829_v6 }
 0x611   :  { %12418 = vmatpush3.msra.mxu0 %v12747_v27  ;;  %12392 = vmatprep.subr.mxu1 %v15691_v8 }
 0x612   :  { %12419 = vmatprep.subr.mxu0 %v15691_v8  ;;  %12393 = vmatpush3.msra.mxu1 %v12837_v10 }
 0x613   :  { %12420 = vmatpush3.msra.mxu0 %v12759_v30  ;;  %12394 = vmatprep.subr.mxu1 %v15691_v8 }
 0x614   :  { %12421 = vmatprep.subr.mxu0 %v15691_v8  ;;  %12395 = vmatpush3.msra.mxu1 %v12851_v22 }
 0x615   :  { %12422 = vmatpush3.msra.mxu0 %v12771_v33  ;;  %12423 = vmatprep.mubr.msk.f32.mxu0 %vm12562_vm0, %v15691_v8 }
 0x616   :  { %12396 = vmatprep.subr.mxu1 %v15691_v8  ;;  %12424 = vmatmul.mubr.f32.vlgmr.msra.gmra.mxu0 %v13375_v38 }
 0x617   :  { %12397 = vmatpush3.msra.mxu1 %v12860_v40  ;;  %12404 = vmatprep.mubr.msk.f32.mxu1 %vm12562_vm0, %v15691_v8 }
 0x618   :  { %12398 = vmatprep.subr.mxu1 %v15691_v8  ;;  %12446 = vmatprep.subr.mxu0 %v15691_v8 }
 0x619   :  { %12399 = vmatpush3.msra.mxu1 %v12870_v43  ;;  %12447 = vmatpush3.msra.mxu0 %v13102_v2 }
 0x61a   :  { %12400 = vmatprep.subr.mxu1 %v15691_v8  ;;  %12448 = vmatprep.mubr.msk.f32.mxu0 %vm12562_vm0, %v15691_v8 }
 0x61b   :  { %12401 = vmatpush3.msra.mxu1 %v12881_v46  ;;  %12456 = vmatprep.subr.mxu0 %v15691_v8 }
 0x61c   :  { %12402 = vmatprep.subr.mxu1 %v15691_v8 }
 0x61d   :  { %12403 = vmatpush3.msra.mxu1 %v12892_v50 }
 0x61e   :  { %12405 = vmatmul.mubr.f32.vlgmr.msra.gmra.mxu1 %v13375_v38  ;;  %12426 = vmatprep.subr.mxu1 %v15691_v8 }
 0x61f   :  { %12427 = vmatpush3.msra.mxu1 %v13094_v0  ;;  %12428 = vmatprep.mubr.msk.f32.mxu1 %vm12562_vm0, %v15691_v8 }
 0x620   :  { %12431 = vmatprep.subr.mxu1 %v15691_v8 }
 0x67e   :  { %v2881_v11 = vpop.f32.mrf.mxu0 }
 0x680   :  { %v12235_v13 = vpop.f32.mrf.mxu0 }
 0x686   :  { %v2770_v14 = vpop.f32.mrf.mxu1 }
 0x687   :  { %v2882_v17 = vadd.f32 %v2881_v11, %v2770_v14  ;;  %v15693_v14 = vld [vmem:[#allocation2_spill] sm:$0xff] }
 0x688   :  { %v12216_v18 = vpop.f32.mrf.mxu1 }
 0x689   :  { %v12523_v18 = vld [vmem:[%s15366_s3 + $0x14] ss:$8 sps:$4 sm:$0xff]  }
 0x68e   :  { %v3050_v20 = vpop.f32.mrf.mxu0 }
 0x690   :  { %v12273_v21 = vpop.f32.mrf.mxu0 }
 0x691   :  { %v12526_v21 = vld [vmem:[%s15366_s3 + $0x4] ss:$8 sps:$4 sm:$0xff]  }
 0x697   :  { %v2969_v23 = vpop.f32.mrf.mxu1 }
 0x698   :  { %v2970_v24 = vadd.f32 %v2969_v23, %v2882_v17  ;;  %v12518_v17 = vld [vmem:[%s15366_s3 + $0x20] ss:$8 sps:$4 sm:$0xff]  }
 0x699   :  { %v12254_v26 = vpop.f32.mrf.mxu1  ;;  %v12524_v23 = vld [vmem:[%s15366_s3] ss:$8 sps:$4 sm:$0xff]  }
 0x69a   :  { %v3051_v27 = vadd.f32 %v3050_v20, %v2970_v24  ;;  %v12521_v20 = vld [vmem:[%s15366_s3 + $0x10] ss:$8 sps:$4 sm:$0xff]   ;;  %v15382_v24 = vmov 0  }
 0x69b   :  { %v4837_v26 = vld [vmem:[%s15367_s16 + $0xf8] sm:$0xff] }
 0x6a0   :  { %v3224_v29 = vpop.f32.mrf.mxu0 }
 0x6a2   :  { %v12311_v30 = vpop.f32.mrf.mxu0 }
 0x6a9   :  { %v3145_v32 = vpop.f32.mrf.mxu1 }
 0x6aa   :  { %v3146_v55 = vadd.f32 %v3145_v32, %v3051_v27  ;;  %v13569_v27 = vand.u32 4294901760, %v4837_v26 }
 0x6ab   :  { %v12292_v33 = vpop.f32.mrf.mxu1 }
 0x6ac   :  { %v3225_v3 = vadd.f32 %v3224_v29, %v3146_v55  ;;  %15694 = vst [vmem:[#allocation2_spill] sm:$0xff] %v13569_v27  ;;  %v13572_v29 = vsub.f32 %v4837_v26, %v13569_v27 }
 0x6ae   :  { %v3768_v47 = vmul.f32 0.001953125, %v3225_v3  ;;  %15695 = vst [vmem:[#allocation4_spill] sm:$0xff] %v13572_v29  ;;  %v13576_v30 = vand.u32 4294901760, %v13572_v29 }
 0x6b0   :  { %v3770_v31 = vmul.f32 %v3768_v47, %v3768_v47  ;;  %15696 = vst [vmem:[#allocation5_spill] sm:$0xff] %v13576_v30  ;;  %v5114_v32 = vsub.f32 %v13572_v29, %v13576_v30 }
 0x6b2   :  { %v3421_v34 = vpop.f32.mrf.mxu0  ;;  %v13580_v33 = vand.u32 4294901760, %v5114_v32 }
 0x6b4   :  { %v12349_v4 = vpop.f32.mrf.mxu0  ;;  %15697 = vst [vmem:[#allocation6_spill] sm:$0xff] %v13580_v33 }
 0x6bb   :  { %v3310_v6 = vpop.f32.mrf.mxu1 }
 0x6bc   :  { %v3422_v57 = vadd.f32 %v3421_v34, %v3310_v6 }
 0x6bd   :  { %v12330_v10 = vpop.f32.mrf.mxu1 }
 0x6c4   :  { %v3590_v22 = vpop.f32.mrf.mxu0 }
 0x6c6   :  { %v12387_v40 = vpop.f32.mrf.mxu0 }
 0x6cd   :  { %v3509_v43 = vpop.f32.mrf.mxu1 }
 0x6ce   :  { %v3510_v63 = vadd.f32 %v3509_v43, %v3422_v57 }
 0x6cf   :  { %v12368_v46 = vpop.f32.mrf.mxu1 }
 0x6d0   :  { %v3591_v12 = vadd.f32 %v3590_v22, %v3510_v63 }
 0x6d6   :  { %v3764_v50 = vpop.f32.mrf.mxu0 }
 0x6d8   :  { %v12425_v39 = vpop.f32.mrf.mxu0 }
 0x6de   :  { %v3685_v28 = vpop.f32.mrf.mxu1 }
 0x6df   :  { %v3686_v9 = vadd.f32 %v3685_v28, %v3591_v12 }
 0x6e0   :  { %v12406_v5 = vpop.f32.mrf.mxu1 }
 0x6e1   :  { %v3765_v16 = vadd.f32 %v3764_v50, %v3686_v9 }
 0x6e3   :  { %v3769_v58 = vmul.f32 0.001953125, %v3765_v16 }
 0x6e5   :  { %v3771_v59 = vsub.f32 %v3769_v58, %v3770_v31 }
 0x6e7   :  { %v3772_v53 = vadd.f32 1e-05, %v3771_v59 }
 0x6e9   :  { %12553 = vrsqrt.f32 %v3772_v53 }
 0x6f6   :  { %v12554_v44 = vpop.eup %12553 }
 0x6f7   :  { %v3774_v54 = vmul.f32 %v12554_v44, %v2656_v48 }
 0x6f9   :  { %v3775_v60 = vmul.f32 %v3774_v54, %v3768_v47  ;;  %v3778_v62 = vsel %vm1320_vm3, %v3774_v54, 0 }
 0x6fa   :  { %v3846_v56 = vand.u32 4294901760, %v3778_v62 }
 0x6fb   :  { %v3776_v36 = vsub.f32 %v2657_v15, %v3775_v60 }
 0x6fc   :  { %v3847_v35 = vsub.f32 %v3778_v62, %v3846_v56  ;;  %12449 = vmatmul.mubr.f32.vlgmr.msra.gmra.mxu0 %v3846_v56 }
 0x6fd   :  { %12457 = vmatpush3.msra.mxu0 %v13094_v0  ;;  %12458 = vmatprep.mubr.msk.f32.mxu0 %vm12562_vm0, %v15691_v8  ;;  %v4227_v37 = vsel %vm1320_vm3, %v3776_v36, 0 }
 0x6fe   :  { %v3848_v19 = vand.u32 4294901760, %v3847_v35  ;;  %v4295_v38 = vand.u32 4294901760, %v4227_v37  ;;  %12466 = vmatprep.subr.mxu0 %v15691_v8 }
 0x700   :  { %v3849_v42 = vsub.f32 %v3847_v35, %v3848_v19  ;;  %v4296_v45 = vsub.f32 %v4227_v37, %v4295_v38 }
 0x702   :  { %v3850_v49 = vand.u32 4294901760, %v3849_v42  ;;  %v4297_v52 = vand.u32 4294901760, %v4296_v45 }
 0x704   :  { %12429 = vmatmul.mubr.f32.vlgmr.msra.gmra.mxu1 %v3850_v49  ;;  %v4298_v11 = vsub.f32 %v4296_v45, %v4297_v52 }
 0x705   :  { %12432 = vmatpush3.msra.mxu1 %v13106_v7  ;;  %12433 = vmatprep.mubr.msk.f32.mxu1 %vm12562_vm0, %v15691_v8 }
 0x706   :  { %12436 = vmatprep.subr.mxu1 %v15691_v8  ;;  %v4299_v13 = vand.u32 4294901760, %v4298_v11 }
 0x708   :  { %12434 = vmatmul.mubr.f32.vlgmr.msra.gmra.mxu1 %v3846_v56  ;;  %12459 = vmatmul.mubr.f32.vlgmr.msra.gmra.mxu0 %v4299_v13 }
 0x709   :  { %12437 = vmatpush3.msra.mxu1 %v15693_v14  ;;  %12438 = vmatprep.mubr.msk.f32.mxu1 %vm12562_vm0, %v15691_v8 }
 0x70a   :  { %12441 = vmatprep.subr.mxu1 %v15691_v8  ;;  %12467 = vmatpush3.msra.mxu0 %v15693_v14 }
 0x70b   :  { %12468 = vmatprep.mubr.msk.f32.mxu0 %vm12562_vm0, %v15691_v8  ;;  %12476 = vmatprep.subr.mxu0 %v15691_v8 }
 0x70c   :  { %12439 = vmatmul.mubr.f32.vlgmr.msra.gmra.mxu1 %v3847_v35  ;;  %12469 = vmatmul.mubr.f32.vlgmr.msra.gmra.mxu0 %v4296_v45 }
 0x70d   :  { %12442 = vmatpush3.msra.mxu1 %v13094_v0  ;;  %12443 = vmatprep.mubr.msk.f32.mxu1 %vm12562_vm0, %v15691_v8 }
 0x70e   :  { %12451 = vmatprep.subr.mxu1 %v15691_v8  ;;  %12477 = vmatpush3.msra.mxu0 %v13102_v2  ;;  %v12515_v2 = vld [vmem:[%s15366_s3 + $0x30] ss:$8 sps:$4 sm:$0xff]  }
 0x70f   :  { %12478 = vmatprep.mubr.msk.f32.mxu0 %vm12562_vm0, %v15691_v8 }
 0x710   :  { %12444 = vmatmul.mubr.f32.vlgmr.msra.gmra.mxu1 %v3848_v19  ;;  %12479 = vmatmul.mubr.f32.vlgmr.msra.gmra.mxu0 %v4295_v38 }
 0x711   :  { %12452 = vmatpush3.msra.mxu1 %v13094_v0  ;;  %12453 = vmatprep.mubr.msk.f32.mxu1 %vm12562_vm0, %v15691_v8 }
 0x712   :  { %12461 = vmatprep.subr.mxu1 %v15691_v8  ;;  %4783 = vmatprep.mubr.bf16.mxu0 %v15382_v24 }
 0x714   :  { %12454 = vmatmul.mubr.f32.vlgmr.msra.gmra.mxu1 %v3846_v56 }
 0x715   :  { %12462 = vmatpush3.msra.mxu1 %v13106_v7  ;;  %12463 = vmatprep.mubr.msk.f32.mxu1 %vm12562_vm0, %v15691_v8  ;;  %v12517_v7 = vld [vmem:[%s15366_s3 + $0x34] ss:$8 sps:$4 sm:$0xff]  }
 0x716   :  { %12471 = vmatprep.subr.mxu1 %v15691_v8  ;;  %4759 = vmatprep.subr.bf16.mxu0 %v12517_v7 }
 0x717   :  { %4760 = vmatpush1.bf16.msra.mxu0 %v12515_v2 }
 0x718   :  { %12464 = vmatmul.mubr.f32.vlgmr.msra.gmra.mxu1 %v4295_v38 }
 0x719   :  { %12472 = vmatpush3.msra.mxu1 %v13094_v0  ;;  %12473 = vmatprep.mubr.msk.f32.mxu1 %vm12562_vm0, %v15691_v8 }
 0x71a   :  { %12481 = vmatprep.subr.mxu1 %v15691_v8 }
 0x71c   :  { %12474 = vmatmul.mubr.f32.vlgmr.msra.gmra.mxu1 %v4297_v52 }
 0x71d   :  { %12482 = vmatpush3.msra.mxu1 %v13094_v0  ;;  %12483 = vmatprep.mubr.msk.f32.mxu1 %vm12562_vm0, %v15691_v8  ;;  %v12520_v0 = vld [vmem:[%s15366_s3 + $0x24] ss:$8 sps:$4 sm:$0xff]  }
 0x71e   :  { %4761 = vmatprep.subr.bf16.mxu0 %v12520_v0  ;;  %10998 = vmatprep.subr.mxu1 %v13569_v27 }
 0x71f   :  { %4762 = vmatpush1.bf16.msra.mxu0 %v12518_v17 }
 0x720   :  { %12484 = vmatmul.mubr.f32.vlgmr.msra.gmra.mxu1 %v4295_v38  ;;  %4763 = vmatprep.subr.bf16.mxu0 %v12523_v18 }
 0x723   :  { %4764 = vmatpush1.bf16.msra.mxu0 %v12521_v20 }
 0x724   :  { %4765 = vmatprep.subr.bf16.mxu0 %v12526_v21 }
 0x727   :  { %4766 = vmatpush1.bf16.msra.mxu0 %v12524_v23  ;;  %v4820_v23 = vld [vmem:[%s15367_s16 + $0x70] sm:$0xff] }
 0x728   :  { %11033 = vmatprep.subr.mxu0 %v13580_v33  ;;  %v13608_v32 = vand.u32 4294901760, %v4820_v23  ;;  %v4811_v33 = vld [vmem:[%s15367_s16 + $0x28] sm:$0xff] }
 0x7bc   :  { %v4150_v34 = vpop.f32.mrf.mxu0 }
 0x7be   :  { %v12450_v4 = vpop.f32.mrf.mxu0 }
 0x7c4   :  { %v3852_v6 = vpop.f32.mrf.mxu1 }
 0x7c6   :  { %v12430_v10 = vpop.f32.mrf.mxu1 }
 0x7c7   :  { %v4819_v10 = vld [vmem:[%s15367_s16 + $0x68] sm:$0xff] }
 0x7c8   :  { %v3928_v22 = vpop.f32.mrf.mxu1  ;;  %v4301_v40 = vpop.f32.mrf.mxu0 }
 0x7c9   :  { %v3929_v63 = vadd.f32 %v3928_v22, %v3852_v6 }
 0x7ca   :  { %v12435_v43 = vpop.f32.mrf.mxu1  ;;  %v12460_v46 = vpop.f32.mrf.mxu0 }
 0x7cb   :  { %v13629_v43 = vand.u32 4294901760, %v4819_v10  ;;  %v4834_v46 = vld [vmem:[%s15367_s16 + $0xe0] sm:$0xff] }
 0x7cc   :  { %v4002_v50 = vpop.f32.mrf.mxu1  ;;  %v4451_v55 = vpop.f32.mrf.mxu0 }
 0x7cd   :  { %v4003_v28 = vadd.f32 %v4002_v50, %v3929_v63 }
 0x7ce   :  { %v12440_v57 = vpop.f32.mrf.mxu1  ;;  %v12470_v39 = vpop.f32.mrf.mxu0 }
 0x7cf   :  { %v13641_v57 = vand.u32 4294901760, %v4834_v46  ;;  %v4818_v39 = vld [vmem:[%s15367_s16 + $0x60] sm:$0xff] }
 0x7d0   :  { %v4076_v3 = vpop.f32.mrf.mxu1  ;;  %v4599_v12 = vpop.f32.mrf.mxu0 }
 0x7d1   :  { %v4077_v5 = vadd.f32 %v4076_v3, %v4003_v28  ;;  %v13655_v28 = vand.u32 4294901760, %v4818_v39 }
 0x7d2   :  { %v12445_v47 = vpop.f32.mrf.mxu1  ;;  %v12480_v9 = vpop.f32.mrf.mxu0 }
 0x7d3   :  { %v4151_v58 = vadd.f32 %v4150_v34, %v4077_v5  ;;  %v4835_v34 = vld [vmem:[%s15367_s16 + $0xe8] sm:$0xff]  ;;  %v4833_v47 = vld [vmem:[%s15367_s16 + $0xd8] sm:$0xff] }
 0x7d4   :  { %v4222_v16 = vpop.f32.mrf.mxu1  ;;  %v13617_v6 = vand.u32 4294901760, %v4835_v34 }
 0x7d5   :  { %v4223_v44 = vadd.f32 %v4222_v16, %v4151_v58  ;;  %v13667_v16 = vsub.f32 %v4834_v46, %v13641_v57  ;;  %v4817_v58 = vld [vmem:[%s15367_s16 + $0x58] sm:$0xff] }
 0x7d6   :  { %v12455_v31 = vpop.f32.mrf.mxu1 }
 0x7d7   :  { %v4678_v56 = vrot.slane %v4223_v44, %v13172_v61  ;;  %15707 = vst [vmem:[#allocation16_spill] sm:$0xff] %v13667_v16  ;;  %v13669_v31 = vand.u32 4294901760, %v4833_v47  ;;  %v13683_v44 = vsub.f32 %v4818_v39, %v13655_v28  ;;  %v4829_v39 = vld [vmem:[%s15367_s16 + $0xb8] sm:$0xff] }
 0x7d8   :  { %v4377_v59 = vpop.f32.mrf.mxu1 }
 0x7d9   :  { %v4378_v53 = vadd.f32 %v4377_v59, %v4301_v40  ;;  %v4679_v38 = vmul.f32 %v4678_v56, %v13260_v51  ;;  %v4680_v42 = vmul.f32 %v4678_v56, %v13264_v1  ;;  %v4681_v11 = vmul.f32 %v4678_v56, %v13262_v41  ;;  %v4821_v41 = vld [vmem:[%s15367_s16 + $0x78] sm:$0xff]  ;;  %15710 = vst [vmem:[#allocation19_spill] sm:$0xff] %v13683_v44 }
 0x7da   :  { %v12465_v48 = vpop.f32.mrf.mxu1  ;;  %v4682_v13 = vmul.f32 %v4678_v56, %v13268_v25  ;;  %v13595_v20 = vand.u32 4294901760, %v4821_v41  ;;  %v4836_v25 = vld [vmem:[%s15367_s16 + $0xf0] sm:$0xff]  ;;  %v13627_v40 = vsub.f32 %v4820_v23, %v13608_v32  ;;  %v13697_v56 = vsub.f32 %v4833_v47, %v13669_v31 }
 0x7db   :  { %v4452_v54 = vadd.f32 %v4451_v55, %v4378_v53  ;;  %v13600_v21 = vand.u32 4294901760, %v4836_v25  ;;  %v13639_v55 = vsub.f32 %v4835_v34, %v13617_v6 }
 0x7dc   :  { %v4525_v15 = vpop.f32.mrf.mxu1  ;;  %v13606_v26 = vsub.f32 %v4821_v41, %v13595_v20  ;;  %10999 = vmatpush3.msra.mxu1 %v13595_v20  ;;  %15701 = vst [vmem:[#allocation10_spill] sm:$0xff] %v13627_v40  ;;  %v13650_v3 = vand.u32 4294901760, %v13627_v40  ;;  %15713 = vst [vmem:[#allocation22_spill] sm:$0xff] %v13697_v56 }
 0x7dd   :  { %v4526_v60 = vadd.f32 %v4525_v15, %v4452_v54  ;;  %v13615_v4 = vsub.f32 %v4836_v25, %v13600_v21  ;;  %11000 = vmatprep.subr.mxu1 %v13600_v21  ;;  %15703 = vst [vmem:[#allocation12_spill] sm:$0xff] %v13639_v55  ;;  %v13664_v5 = vand.u32 4294901760, %v13639_v55  ;;  %v4832_v54 = vld [vmem:[%s15367_s16 + $0xd0] sm:$0xff]  ;;  %v4814_v25 = vld [vmem:[%s15367_s16 + $0x40] sm:$0xff] }
 0x7de   :  { %v12475_v62 = vpop.f32.mrf.mxu1  ;;  %15698 = vst [vmem:[#allocation7_spill] sm:$0xff] %v13606_v26  ;;  %v13624_v22 = vand.u32 4294901760, %v13606_v26  ;;  %11001 = vmatpush3.msra.mxu1 %v13608_v32  ;;  %15704 = vst [vmem:[#allocation13_spill] sm:$0xff] %v13650_v3  ;;  %v5009_v53 = vsub.f32 %v13627_v40, %v13650_v3 }
 0x7df   :  { %v4600_v36 = vadd.f32 %v4599_v12, %v4526_v60  ;;  %15699 = vst [vmem:[#allocation8_spill] sm:$0xff] %v13615_v4  ;;  %v13636_v50 = vand.u32 4294901760, %v13615_v4  ;;  %11002 = vmatprep.subr.mxu1 %v13617_v6  ;;  %v13653_v12 = vsub.f32 %v4819_v10, %v13629_v43  ;;  %15706 = vst [vmem:[#allocation15_spill] sm:$0xff] %v13664_v5  ;;  %v13694_v62 = vand.u32 4294901760, %v13667_v16 }
 0x7e0   :  { %v4671_v35 = vpop.f32.mrf.mxu1  ;;  %15700 = vst [vmem:[#allocation9_spill] sm:$0xff] %v13624_v22  ;;  %v5002_v63 = vsub.f32 %v13606_v26, %v13624_v22  ;;  %11003 = vmatpush3.msra.mxu1 %v13629_v43  ;;  %v5128_v60 = vsub.f32 %v13639_v55, %v13664_v5 }
 0x7e1   :  { %v4672_v37 = vadd.f32 %v4671_v35, %v4600_v36  ;;  %15702 = vst [vmem:[#allocation11_spill] sm:$0xff] %v13636_v50  ;;  %15705 = vst [vmem:[#allocation14_spill] sm:$0xff] %v13653_v12  ;;  %v5121_v9 = vsub.f32 %v13615_v4, %v13636_v50  ;;  %11004 = vmatprep.subr.mxu1 %v13641_v57  ;;  %v13680_v48 = vand.u32 4294901760, %v13653_v12  ;;  %v4816_v36 = vld [vmem:[%s15367_s16 + $0x50] sm:$0xff]  ;;  %v13704_v35 = vand.u32 4294901760, %v5009_v53 }
 0x7e2   :  { %v12485_v19 = vpop.f32.mrf.mxu1  ;;  %v13675_v59 = vand.u32 4294901760, %v5002_v63  ;;  %11005 = vmatpush3.msra.mxu1 %v13655_v28  ;;  %15712 = vst [vmem:[#allocation21_spill] sm:$0xff] %v13694_v62 }
 0x7e3   :  { %v4686_v45 = vrot.slane %v4672_v37, %v13172_v61  ;;  %15709 = vst [vmem:[#allocation18_spill] sm:$0xff] %v13680_v48  ;;  %v13689_v15 = vand.u32 4294901760, %v5121_v9  ;;  %11006 = vmatprep.subr.mxu1 %v13669_v31  ;;  %15714 = vst [vmem:[#allocation23_spill] sm:$0xff] %v13704_v35  ;;  %v5016_v37 = vsub.f32 %v13653_v12, %v13680_v48  ;;  %v13709_v19 = vand.u32 4294901760, %v13683_v44 }
 0x7e4   :  { %15708 = vst [vmem:[#allocation17_spill] sm:$0xff] %v13675_v59 }
 0x7e5   :  { %v4687_v49 = vadd.f32 %v4686_v45, %v4679_v38  ;;  %v4688_v52 = vadd.f32 %v4686_v45, %v4680_v42  ;;  %v4689_v17 = vadd.f32 %v4686_v45, %v4681_v11  ;;  %v4690_v0 = vadd.f32 %v4686_v45, %v4682_v13  ;;  %15711 = vst [vmem:[#allocation20_spill] sm:$0xff] %v13689_v15  ;;  %v4831_v42 = vld [vmem:[%s15367_s16 + $0xc8] sm:$0xff] }
 0x7e6   :  { %15715 = vst [vmem:[#allocation24_spill] sm:$0xff] %v13709_v19  ;;  %v13711_v38 = vand.u32 4294901760, %v4817_v58  ;;  %v13717_v45 = vand.u32 4294901760, %v5128_v60  ;;  %v13724_v11 = vand.u32 4294901760, %v4832_v54  ;;  %v4815_v13 = vld [vmem:[%s15367_s16 + $0x48] sm:$0xff]  ;;  %v13751_v41 = vand.u32 4294901760, %v4831_v42 }
 0x7e7   :  { %v4691_v14 = vmax.f32 %v4687_v49, 0.0  ;;  %v4692_v2 = vmax.f32 %v4688_v52, 0.0  ;;  %v4693_v51 = vmax.f32 %v4689_v17, 0.0  ;;  %v4694_v18 = vmax.f32 %v4690_v0, 0.0  ;;  %v4830_v0 = vld [vmem:[%s15367_s16 + $0xc0] sm:$0xff] }
 0x7e8   :  { %15716 = vst [vmem:[#allocation25_spill] sm:$0xff] %v13717_v45  ;;  %v5135_v49 = vsub.f32 %v13667_v16, %v13694_v62  ;;  %v13722_v52 = vand.u32 4294901760, %v13697_v56  ;;  %v13737_v17 = vand.u32 4294901760, %v4816_v36  ;;  %11007 = vmatpush3.msra.mxu1 %v13711_v38  ;;  %v13766_v46 = vand.u32 4294901760, %v4815_v13 }
 0x7e9   :  { %v4695_v7 = vpack.c.bf16 %v4692_v2, %v4691_v14  ;;  %v4696_v1 = vpack.c.bf16 %v4694_v18, %v4693_v51  ;;  %v13730_v14 = vand.u32 4294901760, %v5016_v37  ;;  %v5023_v2 = vsub.f32 %v13683_v44, %v13709_v19  ;;  %11008 = vmatprep.subr.mxu1 %v13724_v11 }
 0x7ea   :  { %15717 = vst [vmem:[#allocation26_spill] sm:$0xff] %v13722_v52  ;;  %v13744_v51 = vand.u32 4294901760, %v5135_v49  ;;  %v5142_v18 = vsub.f32 %v13697_v56, %v13722_v52  ;;  %v13764_v10 = vsub.f32 %v4816_v36, %v13737_v17  ;;  %11009 = vmatpush3.msra.mxu1 %v13737_v17  ;;  %v13779_v9 = vsub.f32 %v4831_v42, %v13751_v41 }
 0x7eb   :  { %10680 = vmatmul.mubr.msk.bf16.vlgmr.msra.gmra.mxu0 %vm200_vm1, %v4695_v7  ;;  %15718 = vst [vmem:[#allocation27_spill] sm:$0xff] %v13730_v14  ;;  %v13735_v7 = vsub.f32 %v4817_v58, %v13711_v38  ;;  %v13758_v23 = vand.u32 4294901760, %v5023_v2  ;;  %v13781_v58 = vand.u32 4294901760, %v4830_v0  ;;  %11010 = vmatprep.subr.mxu1 %v13751_v41  ;;  %v13791_v60 = vsub.f32 %v4815_v13, %v13766_v46  ;;  %v4813_v13 = vld [vmem:[%s15367_s16 + $0x38] sm:$0xff] }
 0x7ec   :  { %4793 = vmatprep.mubr.bf16.mxu0 %v15382_v24  ;;  %11034 = vmatpush3.msra.mxu0 %v13675_v59  ;;  %15720 = vst [vmem:[#allocation29_spill] sm:$0xff] %v13744_v51  ;;  %15724 = vst [vmem:[#allocation33_spill] sm:$0xff] %v13764_v10  ;;  %v13773_v63 = vand.u32 4294901760, %v5142_v18  ;;  %v13793_v36 = vand.u32 4294901760, %v4814_v25  ;;  %v13800_v42 = vand.u32 4294901760, %v13779_v9  ;;  %v13805_v2 = vand.u32 4294901760, %v4829_v39 }
 0x7ed   :  { %11035 = vmatprep.subr.mxu0 %v13689_v15  ;;  %15719 = vst [vmem:[#allocation28_spill] sm:$0xff] %v13735_v7  ;;  %15722 = vst [vmem:[#allocation31_spill] sm:$0xff] %v13758_v23  ;;  %v13761_v34 = vand.u32 4294901760, %v13735_v7  ;;  %11011 = vmatpush3.msra.mxu1 %v13766_v46  ;;  %v13803_v49 = vsub.f32 %v4830_v0, %v13781_v58  ;;  %v13816_v61 = vand.u32 4294901760, %v13791_v60  ;;  %v4828_v0 = vld [vmem:[%s15367_s16 + $0xb0] sm:$0xff] }
 0x7ee   :  { %11036 = vmatpush3.msra.mxu0 %v13704_v35  ;;  %15725 = vst [vmem:[#allocation34_spill] sm:$0xff] %v13773_v63  ;;  %15727 = vst [vmem:[#allocation36_spill] sm:$0xff] %v13779_v9  ;;  %11012 = vmatprep.subr.mxu1 %v13781_v58  ;;  %v13819_v8 = vsub.f32 %v4814_v25, %v13793_v36  ;;  %v4812_v25 = vld [vmem:[%s15367_s16 + $0x30] sm:$0xff]  ;;  %v13847_v35 = vand.u32 4294901760, %v4813_v13  ;;  %v13860_v59 = vand.u32 4294901760, %v4828_v0 }
 0x7ef   :  { %11037 = vmatprep.subr.mxu0 %v13717_v45  ;;  %15723 = vst [vmem:[#allocation32_spill] sm:$0xff] %v13761_v34  ;;  %v5030_v53 = vsub.f32 %v13735_v7, %v13761_v34  ;;  %15729 = vst [vmem:[#allocation38_spill] sm:$0xff] %v13791_v60  ;;  %11013 = vmatpush3.msra.mxu1 %v13793_v36 }
 0x7f0   :  { %11038 = vmatpush3.msra.mxu0 %v13730_v14  ;;  %15730 = vst [vmem:[#allocation39_spill] sm:$0xff] %v13800_v42  ;;  %15731 = vst [vmem:[#allocation40_spill] sm:$0xff] %v13803_v49  ;;  %11014 = vmatprep.subr.mxu1 %v13805_v2  ;;  %v13845_v45 = vand.u32 4294901760, %v13819_v8 }
 0x7f1   :  { %11039 = vmatprep.subr.mxu0 %v13744_v51  ;;  %15732 = vst [vmem:[#allocation41_spill] sm:$0xff] %v13805_v2  ;;  %v13811_v18 = vand.u32 4294901760, %v5030_v53  ;;  %15734 = vst [vmem:[#allocation43_spill] sm:$0xff] %v13816_v61  ;;  %v5156_v53 = vsub.f32 %v13779_v9, %v13800_v42  ;;  %v13833_v51 = vsub.f32 %v4829_v39, %v13805_v2  ;;  %v4827_v39 = vld [vmem:[%s15367_s16 + $0xa8] sm:$0xff]  ;;  %v4826_v42 = vld [vmem:[%s15367_s16 + $0xa0] sm:$0xff]  ;;  %11015 = vmatpush3.msra.mxu1 %v13847_v35 }
 0x7f2   :  { %11040 = vmatpush3.msra.mxu0 %v13758_v23  ;;  %15735 = vst [vmem:[#allocation44_spill] sm:$0xff] %v13819_v8  ;;  %v13830_v23 = vand.u32 4294901760, %v13803_v49  ;;  %15740 = vst [vmem:[#allocation49_spill] sm:$0xff] %v13845_v45  ;;  %11016 = vmatprep.subr.mxu1 %v13860_v59 }
 0x7f3   :  { %10681 = vmatmul.mubr.msk.bf16.gmra.mxu0 %vm200_vm1, %v4696_v1  ;;  %v13749_v1 = vsub.f32 %v4832_v54, %v13724_v11  ;;  %v13788_v54 = vand.u32 4294901760, %v13764_v10  ;;  %11041 = vmatprep.subr.mxu0 %v13773_v63  ;;  %15733 = vst [vmem:[#allocation42_spill] sm:$0xff] %v13811_v18  ;;  %15738 = vst [vmem:[#allocation47_spill] sm:$0xff] %v13833_v51  ;;  %v13853_v15 = vand.u32 4294901760, %v5156_v53 }
 0x7f4   :  { %15737 = vst [vmem:[#allocation46_spill] sm:$0xff] %v13830_v23  ;;  %11042 = vmatpush3.msra.mxu0 %v13811_v18  ;;  %15741 = vst [vmem:[#allocation50_spill] sm:$0xff] %v13847_v35  ;;  %v13858_v18 = vand.u32 4294901760, %v13833_v51  ;;  %v5051_v53 = vsub.f32 %v13819_v8, %v13845_v45  ;;  %v4810_v45 = vld [vmem:[%s15367_s16 + $0x20] sm:$0xff] }
 0x7f5   :  { %15721 = vst [vmem:[#allocation30_spill] sm:$0xff] %v13749_v1  ;;  %v13776_v47 = vand.u32 4294901760, %v13749_v1  ;;  %15728 = vst [vmem:[#allocation37_spill] sm:$0xff] %v13788_v54  ;;  %v5037_v24 = vsub.f32 %v13764_v10, %v13788_v54 }
 0x7f6   :  { %15742 = vst [vmem:[#allocation51_spill] sm:$0xff] %v13853_v15  ;;  %15743 = vst [vmem:[#allocation52_spill] sm:$0xff] %v13858_v18 }
 0x7f7   :  { %15726 = vst [vmem:[#allocation35_spill] sm:$0xff] %v13776_v47  ;;  %v5149_v37 = vsub.f32 %v13749_v1, %v13776_v47  ;;  %v13840_v14 = vand.u32 4294901760, %v5037_v24  ;;  %v5163_v24 = vsub.f32 %v13803_v49, %v13830_v23  ;;  %15744 = vst [vmem:[#allocation53_spill] sm:$0xff] %v13860_v59  ;;  %v13873_v23 = vand.u32 4294901760, %v4812_v25 }
 0x7f8   :  { %v13894_v47 = vand.u32 4294901760, %v5051_v53 }
 0x7f9   :  { %v13825_v63 = vand.u32 4294901760, %v5149_v37  ;;  %15739 = vst [vmem:[#allocation48_spill] sm:$0xff] %v13840_v14  ;;  %v5044_v37 = vsub.f32 %v13791_v60, %v13816_v61  ;;  %15747 = vst [vmem:[#allocation56_spill] sm:$0xff] %v13873_v23  ;;  %v13880_v54 = vand.u32 4294901760, %v5163_v24  ;;  %11017 = vmatpush3.msra.mxu1 %v13873_v23 }
 0x7fa   :  { %15751 = vst [vmem:[#allocation60_spill] sm:$0xff] %v13894_v47 }
 0x7fb   :  { %15736 = vst [vmem:[#allocation45_spill] sm:$0xff] %v13825_v63  ;;  %11043 = vmatprep.subr.mxu0 %v13825_v63  ;;  %v13866_v61 = vand.u32 4294901760, %v5044_v37  ;;  %v13871_v63 = vsub.f32 %v4813_v13, %v13847_v35  ;;  %15748 = vst [vmem:[#allocation57_spill] sm:$0xff] %v13880_v54  ;;  %v5170_v37 = vsub.f32 %v13833_v51, %v13858_v18  ;;  %v13887_v13 = vand.u32 4294901760, %v4827_v39  ;;  %v4825_v18 = vld [vmem:[%s15367_s16 + $0x98] sm:$0xff] }
 0x7fc   :  { %11044 = vmatpush3.msra.mxu0 %v13840_v14  ;;  %v13885_v14 = vsub.f32 %v4828_v0, %v13860_v59  ;;  %v13902_v0 = vand.u32 4294901760, %v4811_v33  ;;  %v13941_v62 = vand.u32 4294901760, %v4825_v18 }
 0x7fd   :  { %15745 = vst [vmem:[#allocation54_spill] sm:$0xff] %v13866_v61  ;;  %15746 = vst [vmem:[#allocation55_spill] sm:$0xff] %v13871_v63  ;;  %11045 = vmatprep.subr.mxu0 %v13853_v15  ;;  %v13897_v24 = vand.u32 4294901760, %v13871_v63  ;;  %v13900_v15 = vsub.f32 %v4812_v25, %v13873_v23  ;;  %v13909_v34 = vand.u32 4294901760, %v5170_v37  ;;  %v13917_v25 = vand.u32 4294901760, %v4826_v42  ;;  %11018 = vmatprep.subr.mxu1 %v13887_v13 }
 0x7fe   :  { %15749 = vst [vmem:[#allocation58_spill] sm:$0xff] %v13885_v14  ;;  %15750 = vst [vmem:[#allocation59_spill] sm:$0xff] %v13887_v13  ;;  %11046 = vmatpush3.msra.mxu0 %v13866_v61  ;;  %v13912_v53 = vand.u32 4294901760, %v13885_v14  ;;  %v13915_v61 = vsub.f32 %v4827_v39, %v13887_v13  ;;  %v13927_v37 = vsub.f32 %v4811_v33, %v13902_v0  ;;  %11019 = vmatpush3.msra.mxu1 %v13902_v0  ;;  %v4809_v33 = vld [vmem:[%s15367_s16 + $0x18] sm:$0xff] }
 0x7ff   :  { %15752 = vst [vmem:[#allocation61_spill] sm:$0xff] %v13897_v24  ;;  %15753 = vst [vmem:[#allocation62_spill] sm:$0xff] %v13900_v15  ;;  %11047 = vmatprep.subr.mxu0 %v13880_v54  ;;  %v5058_v52 = vsub.f32 %v13871_v63, %v13897_v24  ;;  %v13924_v19 = vand.u32 4294901760, %v13900_v15  ;;  %v13929_v54 = vand.u32 4294901760, %v4810_v45  ;;  %v13939_v24 = vsub.f32 %v4826_v42, %v13917_v25  ;;  %v4824_v42 = vld [vmem:[%s15367_s16 + $0x90] sm:$0xff] }
 0x800   :  { %15754 = vst [vmem:[#allocation63_spill] sm:$0xff] %v13902_v0  ;;  %15755 = vst [vmem:[#allocation64_spill] sm:$0xff] %v13909_v34  ;;  %11048 = vmatpush3.msra.mxu0 %v13894_v47  ;;  %v5177_v39 = vsub.f32 %v13885_v14, %v13912_v53  ;;  %v13936_v47 = vand.u32 4294901760, %v13915_v61  ;;  %11020 = vmatprep.subr.mxu1 %v13917_v25  ;;  %v13983_v30 = vand.u32 4294901760, %v4809_v33 }
 0x801   :  { %15756 = vst [vmem:[#allocation65_spill] sm:$0xff] %v13912_v53  ;;  %15757 = vst [vmem:[#allocation66_spill] sm:$0xff] %v13915_v61  ;;  %11049 = vmatprep.subr.mxu0 %v13909_v34  ;;  %v13947_v48 = vand.u32 4294901760, %v5058_v52  ;;  %v5065_v34 = vsub.f32 %v13900_v15, %v13924_v19  ;;  %v13952_v53 = vand.u32 4294901760, %v13927_v37  ;;  %v13955_v5 = vsub.f32 %v4810_v45, %v13929_v54  ;;  %v4808_v45 = vld [vmem:[%s15367_s16 + $0x10] sm:$0xff] }
 0x802   :  { %15758 = vst [vmem:[#allocation67_spill] sm:$0xff] %v13917_v25  ;;  %15759 = vst [vmem:[#allocation68_spill] sm:$0xff] %v13924_v19  ;;  %11021 = vmatpush3.msra.mxu1 %v13929_v54  ;;  %v13961_v3 = vand.u32 4294901760, %v5177_v39  ;;  %v5184_v52 = vsub.f32 %v13915_v61, %v13936_v47  ;;  %v13966_v50 = vand.u32 4294901760, %v13939_v24  ;;  %v13969_v19 = vsub.f32 %v4825_v18, %v13941_v62  ;;  %v4823_v18 = vld [vmem:[%s15367_s16 + $0x88] sm:$0xff] }
 0x803   :  { %15760 = vst [vmem:[#allocation69_spill] sm:$0xff] %v13927_v37  ;;  %15761 = vst [vmem:[#allocation70_spill] sm:$0xff] %v13929_v54  ;;  %11022 = vmatprep.subr.mxu1 %v13941_v62  ;;  %11050 = vmatpush3.msra.mxu0 %v13947_v48  ;;  %v13976_v22 = vand.u32 4294901760, %v5065_v34  ;;  %v5072_v39 = vsub.f32 %v13927_v37, %v13952_v53  ;;  %v4807_v37 = vld [vmem:[%s15367_s16 + $0x8] sm:$0xff] }
 0x804   :  { %15762 = vst [vmem:[#allocation71_spill] sm:$0xff] %v13936_v47  ;;  %15763 = vst [vmem:[#allocation72_spill] sm:$0xff] %v13939_v24  ;;  %v13981_v47 = vand.u32 4294901760, %v13955_v5  ;;  %11051 = vmatprep.subr.mxu0 %v13961_v3  ;;  %v13989_v61 = vand.u32 4294901760, %v5184_v52  ;;  %v5191_v34 = vsub.f32 %v13939_v24, %v13966_v50  ;;  %v4822_v24 = vld [vmem:[%s15367_s16 + $0x80] sm:$0xff]  ;;  %11023 = vmatpush3.msra.mxu1 %v13983_v30 }
 0x805   :  { %15764 = vst [vmem:[#allocation73_spill] sm:$0xff] %v13941_v62  ;;  %15765 = vst [vmem:[#allocation74_spill] sm:$0xff] %v13947_v48  ;;  %v13994_v48 = vand.u32 4294901760, %v13969_v19  ;;  %11052 = vmatpush3.msra.mxu0 %v13976_v22  ;;  %v14002_v15 = vand.u32 4294901760, %v5072_v39 }
 0x806   :  { %15766 = vst [vmem:[#allocation75_spill] sm:$0xff] %v13952_v53  ;;  %15767 = vst [vmem:[#allocation76_spill] sm:$0xff] %v13955_v5  ;;  %v13996_v53 = vand.u32 4294901760, %v4824_v42  ;;  %v5079_v52 = vsub.f32 %v13955_v5, %v13981_v47  ;;  %11053 = vmatprep.subr.mxu0 %v13989_v61  ;;  %v14016_v14 = vand.u32 4294901760, %v5191_v34 }
 0x807   :  { %15768 = vst [vmem:[#allocation77_spill] sm:$0xff] %v13961_v3  ;;  %15769 = vst [vmem:[#allocation78_spill] sm:$0xff] %v13966_v50  ;;  %v14007_v3 = vsub.f32 %v4809_v33, %v13983_v30  ;;  %v14009_v50 = vand.u32 4294901760, %v4808_v45  ;;  %v5198_v39 = vsub.f32 %v13969_v19, %v13994_v48  ;;  %v14023_v33 = vand.u32 4294901760, %v4823_v18  ;;  %11054 = vmatpush3.msra.mxu0 %v14002_v15 }
 0x808   :  { %15770 = vst [vmem:[#allocation79_spill] sm:$0xff] %v13969_v19  ;;  %15771 = vst [vmem:[#allocation80_spill] sm:$0xff] %v13976_v22  ;;  %v14021_v22 = vsub.f32 %v4824_v42, %v13996_v53  ;;  %11024 = vmatprep.subr.mxu1 %v13996_v53  ;;  %v14030_v5 = vand.u32 4294901760, %v5079_v52  ;;  %v14038_v42 = vand.u32 4294901760, %v4807_v37  ;;  %11055 = vmatprep.subr.mxu0 %v14016_v14 }
 0x809   :  { %15772 = vst [vmem:[#allocation81_spill] sm:$0xff] %v13981_v47  ;;  %15773 = vst [vmem:[#allocation82_spill] sm:$0xff] %v13983_v30  ;;  %v4806_v47 = vld [vmem:[%s15367_s16] sm:$0xff]  ;;  %v14033_v34 = vand.u32 4294901760, %v14007_v3  ;;  %11025 = vmatpush3.msra.mxu1 %v14009_v50  ;;  %v14048_v52 = vsub.f32 %v4823_v18, %v14023_v33 }
 0x80a   :  { %15774 = vst [vmem:[#allocation83_spill] sm:$0xff] %v13989_v61  ;;  %15775 = vst [vmem:[#allocation84_spill] sm:$0xff] %v13994_v48  ;;  %v14036_v61 = vsub.f32 %v4808_v45, %v14009_v50  ;;  %v14042_v48 = vand.u32 4294901760, %v5198_v39  ;;  %v14045_v19 = vand.u32 4294901760, %v14021_v22  ;;  %11026 = vmatprep.subr.mxu1 %v14023_v33  ;;  %11056 = vmatpush3.msra.mxu0 %v14030_v5 }
 0x80b   :  { %15776 = vst [vmem:[#allocation85_spill] sm:$0xff] %v13996_v53  ;;  %15777 = vst [vmem:[#allocation86_spill] sm:$0xff] %v14002_v15  ;;  %v14050_v15 = vand.u32 4294901760, %v4822_v24  ;;  %v5086_v45 = vsub.f32 %v14007_v3, %v14033_v34  ;;  %v14060_v39 = vsub.f32 %v4807_v37, %v14038_v42  ;;  %11027 = vmatpush3.msra.mxu1 %v14038_v42 }
 0x80c   :  { %15778 = vst [vmem:[#allocation87_spill] sm:$0xff] %v14007_v3  ;;  %15779 = vst [vmem:[#allocation88_spill] sm:$0xff] %v14009_v50  ;;  %v14057_v50 = vand.u32 4294901760, %v14036_v61  ;;  %11057 = vmatprep.subr.mxu0 %v14042_v48  ;;  %v5205_v18 = vsub.f32 %v14021_v22, %v14045_v19 }
 0x80d   :  { %15780 = vst [vmem:[#allocation89_spill] sm:$0xff] %v14016_v14  ;;  %15781 = vst [vmem:[#allocation90_spill] sm:$0xff] %v14021_v22  ;;  %v14062_v14 = vand.u32 4294901760, %v4806_v47  ;;  %11028 = vmatprep.subr.mxu1 %v14050_v15  ;;  %v14075_v3 = vand.u32 4294901760, %v5086_v45 }
 0x80e   :  { %15782 = vst [vmem:[#allocation91_spill] sm:$0xff] %v14023_v33  ;;  %15783 = vst [vmem:[#allocation92_spill] sm:$0xff] %v14030_v5  ;;  %v14069_v5 = vand.u32 4294901760, %v14048_v52  ;;  %v5093_v37 = vsub.f32 %v14036_v61, %v14057_v50 }
 0x80f   :  { %15784 = vst [vmem:[#allocation93_spill] sm:$0xff] %v14033_v34  ;;  %15785 = vst [vmem:[#allocation94_spill] sm:$0xff] %v14036_v61  ;;  %v14072_v34 = vsub.f32 %v4822_v24, %v14050_v15  ;;  %11029 = vmatpush3.msra.mxu1 %v14062_v14  ;;  %11058 = vmatpush3.msra.mxu0 %v14075_v3 }
 0x810   :  { %15786 = vst [vmem:[#allocation95_spill] sm:$0xff] %v14038_v42  ;;  %15787 = vst [vmem:[#allocation96_spill] sm:$0xff] %v14042_v48  ;;  %v14080_v42 = vand.u32 4294901760, %v14060_v39  ;;  %v14083_v48 = vsub.f32 %v4806_v47, %v14062_v14  ;;  %v5212_v24 = vsub.f32 %v14048_v52, %v14069_v5  ;;  %11068 = vmatprep.subr.mxu1 %v13572_v29  ;;  %v14095_v45 = vand.u32 4294901760, %v5093_v37 }
 0x811   :  { %15788 = vst [vmem:[#allocation97_spill] sm:$0xff] %v14045_v19  ;;  %15789 = vst [vmem:[#allocation98_spill] sm:$0xff] %v14048_v52  ;;  %v14086_v19 = vand.u32 4294901760, %v5205_v18  ;;  %v14091_v22 = vand.u32 4294901760, %v14072_v34 }
 0x812   :  { %15790 = vst [vmem:[#allocation99_spill] sm:$0xff] %v14050_v15  ;;  %15791 = vst [vmem:[#allocation100_spill] sm:$0xff] %v14057_v50  ;;  %v5100_v47 = vsub.f32 %v14060_v39, %v14080_v42  ;;  %v14100_v50 = vand.u32 4294901760, %v14083_v48  ;;  %v14103_v18 = vand.u32 4294901760, %v5212_v24 }
 0x813   :  { %15792 = vst [vmem:[#allocation101_spill] sm:$0xff] %v14060_v39  ;;  %15793 = vst [vmem:[#allocation102_spill] sm:$0xff] %v14062_v14  ;;  %11059 = vmatprep.subr.mxu0 %v14086_v19 }
 0x814   :  { %15794 = vst [vmem:[#allocation103_spill] sm:$0xff] %v14069_v5  ;;  %15795 = vst [vmem:[#allocation104_spill] sm:$0xff] %v14072_v34  ;;  %v5219_v5 = vsub.f32 %v14072_v34, %v14091_v22  ;;  %11060 = vmatpush3.msra.mxu0 %v14095_v45  ;;  %v14108_v29 = vand.u32 4294901760, %v5100_v47  ;;  %v5107_v37 = vsub.f32 %v14083_v48, %v14100_v50 }
 0x815   :  { %15796 = vst [vmem:[#allocation105_spill] sm:$0xff] %v14075_v3  ;;  %15797 = vst [vmem:[#allocation106_spill] sm:$0xff] %v14080_v42  ;;  %11061 = vmatprep.subr.mxu0 %v14103_v18 }
 0x816   :  { %15798 = vst [vmem:[#allocation107_spill] sm:$0xff] %v14083_v48  ;;  %15799 = vst [vmem:[#allocation108_spill] sm:$0xff] %v14086_v19  ;;  %v14113_v3 = vand.u32 4294901760, %v5219_v5  ;;  %11062 = vmatpush3.msra.mxu0 %v14108_v29  ;;  %v14116_v42 = vand.u32 4294901760, %v5107_v37 }
 0x817   :  { %15800 = vst [vmem:[#allocation109_spill] sm:$0xff] %v14091_v22  ;;  %15801 = vst [vmem:[#allocation110_spill] sm:$0xff] %v14095_v45 }
 0x818   :  { %15802 = vst [vmem:[#allocation111_spill] sm:$0xff] %v14100_v50  ;;  %15803 = vst [vmem:[#allocation112_spill] sm:$0xff] %v14103_v18  ;;  %11063 = vmatprep.subr.mxu0 %v14113_v3 }
 0x819   :  { %15804 = vst [vmem:[#allocation113_spill] sm:$0xff] %v14108_v29  ;;  %15805 = vst [vmem:[#allocation114_spill] sm:$0xff] %v14113_v3  ;;  %11064 = vmatpush3.msra.mxu0 %v14116_v42 }
 0x81a   :  { %15806 = vst [vmem:[#allocation115_spill] sm:$0xff] %v14116_v42  ;;  %11103 = vmatprep.subr.mxu0 %v13569_v27 }
 0x8ab   :  { %v14121_v24 = vpop.f32.mrf.mxu0 }
 0x8ac   :  { %15807 = vst [vmem:[#allocation116_spill] sm:$0xff] %v14121_v24 }
 0x8ad   :  { %v14123_v47 = vpop.f32.mrf.mxu0 }
 0x8ae   :  { %15808 = vst [vmem:[#allocation117_spill] sm:$0xff] %v14123_v47 }
 0x8af   :  { %v14125_v45 = vpop.f32.mrf.mxu0 }
 0x8b0   :  { %15809 = vst [vmem:[#allocation118_spill] sm:$0xff] %v14125_v45  ;;  %v4842_v37 = vadd.f32 %v14125_v45, %v14121_v24 }
 0x8b1   :  { %v14127_v19 = vpop.f32.mrf.mxu0 }
 0x8b2   :  { %15810 = vst [vmem:[#allocation119_spill] sm:$0xff] %v14127_v19  ;;  %v4851_v42 = vadd.f32 %v14127_v19, %v14123_v47 }
 0x8b3   :  { %v14129_v5 = vpop.f32.mrf.mxu0 }
 0x8b4   :  { %15811 = vst [vmem:[#allocation120_spill] sm:$0xff] %v14129_v5  ;;  %v4843_v3 = vadd.f32 %v4842_v37, %v14129_v5 }
 0x8b5   :  { %v14133_v29 = vpop.f32.mrf.mxu0 }
 0x8b6   :  { %15812 = vst [vmem:[#allocation121_spill] sm:$0xff] %v14133_v29  ;;  %v4852_v50 = vadd.f32 %v4851_v42, %v14133_v29 }
 0x8b7   :  { %v14138_v18 = vpop.f32.mrf.mxu0 }
 0x8b8   :  { %15813 = vst [vmem:[#allocation122_spill] sm:$0xff] %v14138_v18  ;;  %v4844_v22 = vadd.f32 %v4843_v3, %v14138_v18 }
 0x8b9   :  { %v14142_v48 = vpop.f32.mrf.mxu0 }
 0x8ba   :  { %15814 = vst [vmem:[#allocation123_spill] sm:$0xff] %v14142_v48  ;;  %v4845_v34 = vrot.slane %v4844_v22, 4  ;;  %v4853_v39 = vadd.f32 %v4852_v50, %v14142_v48 }
 0x8bc   :  { %v4846_v52 = vadd.f32 %v4845_v34, %v4844_v22  ;;  %v4854_v24 = vrot.slane %v4853_v39, 4  ;;  %v4863_v34 = vmul.f32 %v14127_v19, %v14127_v19  ;;  %v15827_v19 = vld [vmem:[#allocation79_spill] sm:$0xff] }
 0x8be   :  { %v4847_v45 = vrot.slane %v4846_v52, 2  ;;  %v4855_v61 = vadd.f32 %v4854_v24, %v4853_v39  ;;  %v4865_v39 = vmul.f32 %v14133_v29, %v14133_v29  ;;  %v15826_v29 = vld [vmem:[#allocation102_spill] sm:$0xff] }
 0x8c0   :  { %v4848_v27 = vadd.f32 %v4847_v45, %v4846_v52  ;;  %v4856_v14 = vrot.slane %v4855_v61, 2  ;;  %v4861_v52 = vmul.f32 %v14123_v47, %v14123_v47  ;;  %v15815_v45 = vld [vmem:[#allocation58_spill] sm:$0xff] }
 0x8c2   :  { %v4849_v15 = vrot.slane %v4848_v27, 1  ;;  %v4857_v33 = vadd.f32 %v4856_v14, %v4855_v61  ;;  %v4877_v24 = vadd.f32 %v4863_v34, %v4861_v52  ;;  %v15824_v52 = vld [vmem:[#allocation99_spill] sm:$0xff] }
 0x8c4   :  { %v4850_v37 = vadd.f32 %v4849_v15, %v4848_v27  ;;  %v4858_v5 = vrot.slane %v4857_v33, 1 }
 0x8c6   :  { %v14145_v53 = vand.u32 4294901760, %v4850_v37  ;;  %v4859_v42 = vadd.f32 %v4858_v5, %v4857_v33  ;;  %v4867_v5 = vmul.f32 %v14142_v48, %v14142_v48  ;;  %v15825_v48 = vld [vmem:[#allocation76_spill] sm:$0xff] }
 0x8c8   :  { %v14148_v3 = vsub.f32 %v4850_v37, %v14145_v53  ;;  %v14150_v18 = vand.u32 4294901760, %v4859_v42  ;;  %v15816_v37 = vld [vmem:[#allocation85_spill] sm:$0xff] }
 0x8ca   :  { %5223 = vmatprep.mubr.f32.mxu0 %v14150_v18  ;;  %v4983_v22 = vsub.f32 %v4859_v42, %v14150_v18  ;;  %v15567_v50 = vand.u32 4294901760, %v14148_v3  ;;  %v15817_v42 = vld [vmem:[#allocation62_spill] sm:$0xff]  ;;  %v15828_v47 = vand.u32 4294901760, %v14148_v3 }
 0x8cb   :  { %5225 = vmatmul.mubr.f32.vlgmr.msra.gmra.mxu0 %v14145_v53 }
 0x8cc   :  { %11104 = vmatpush3.msra.mxu0 %v13595_v20  ;;  %v4984_v61 = vand.u32 4294901760, %v4983_v22  ;;  %v4991_v27 = vsub.f32 %v14148_v3, %v15567_v50  ;;  %v15823_v50 = vld [vmem:[#allocation72_spill] sm:$0xff] }
 0x8cd   :  { %11105 = vmatprep.subr.mxu0 %v13600_v21 }
 0x8ce   :  { %11106 = vmatpush3.msra.mxu0 %v13608_v32  ;;  %5467 = vmatprep.mubr.f32.mxu0 %v4984_v61  ;;  %v4985_v15 = vsub.f32 %v4983_v22, %v4984_v61  ;;  %v4992_v33 = vand.u32 4294901760, %v4991_v27  ;;  %v15819_v61 = vld [vmem:[#allocation66_spill] sm:$0xff]  ;;  %v4878_v27 = vadd.f32 %v4877_v24, %v4865_v39  ;;  %v15830_v24 = vld [vmem:[#allocation87_spill] sm:$0xff] }
 0x8cf   :  { %11107 = vmatprep.subr.mxu0 %v13617_v6  ;;  %v15829_v39 = vld [vmem:[#allocation2_spill] sm:$0xff] }
 0x8d0   :  { %11108 = vmatpush3.msra.mxu0 %v13629_v43  ;;  %v4986_v14 = vand.u32 4294901760, %v4985_v15  ;;  %v15820_v15 = vld [vmem:[#allocation91_spill] sm:$0xff]  ;;  %v4879_v34 = vadd.f32 %v4878_v27, %v4867_v5  ;;  %v15831_v5 = vld [vmem:[#allocation90_spill] sm:$0xff] }
 0x8d1   :  { %11109 = vmatprep.subr.mxu0 %v13641_v57  ;;  %v15832_v27 = vld [vmem:[#allocation94_spill] sm:$0xff] }
 0x8d2   :  { %11110 = vmatpush3.msra.mxu0 %v13655_v28  ;;  %4987 = vmatprep.mubr.f32.mxu1 %v4986_v14  ;;  %v15821_v14 = vld [vmem:[#allocation69_spill] sm:$0xff] }
 0x8d3   :  { %11111 = vmatprep.subr.mxu0 %v13669_v31  ;;  %4993 = vmatmul.mubr.f32.vlgmr.msra.gmra.mxu1 %v4992_v33  ;;  %v15822_v33 = vld [vmem:[#allocation95_spill] sm:$0xff] }
 0x8d4   :  { %11069 = vmatpush3.msra.mxu1 %v13606_v26  ;;  %11112 = vmatpush3.msra.mxu0 %v13711_v38 }
 0x8d5   :  { %11070 = vmatprep.subr.mxu1 %v13615_v4  ;;  %5360 = vmatprep.mubr.f32.mxu1 %v4983_v22  ;;  %v15818_v22 = vld [vmem:[#allocation88_spill] sm:$0xff] }
 0x8d6   :  { %11113 = vmatprep.subr.mxu0 %v13724_v11  ;;  %11071 = vmatpush3.msra.mxu1 %v13627_v40 }
 0x8d7   :  { %11114 = vmatpush3.msra.mxu0 %v13737_v17  ;;  %11072 = vmatprep.subr.mxu1 %v13639_v55 }
 0x8d8   :  { %11115 = vmatprep.subr.mxu0 %v13751_v41  ;;  %11073 = vmatpush3.msra.mxu1 %v13653_v12 }
 0x8d9   :  { %11116 = vmatpush3.msra.mxu0 %v13766_v46  ;;  %11074 = vmatprep.subr.mxu1 %v13667_v16 }
 0x8da   :  { %11117 = vmatprep.subr.mxu0 %v13781_v58  ;;  %11075 = vmatpush3.msra.mxu1 %v13683_v44 }
 0x8db   :  { %11118 = vmatpush3.msra.mxu0 %v13793_v36  ;;  %11076 = vmatprep.subr.mxu1 %v13697_v56 }
 0x8dc   :  { %11119 = vmatprep.subr.mxu0 %v13805_v2  ;;  %11077 = vmatpush3.msra.mxu1 %v13735_v7 }
 0x8dd   :  { %11120 = vmatpush3.msra.mxu0 %v13847_v35  ;;  %11078 = vmatprep.subr.mxu1 %v13749_v1 }
 0x8de   :  { %11121 = vmatprep.subr.mxu0 %v13860_v59  ;;  %11079 = vmatpush3.msra.mxu1 %v13764_v10 }
 0x8df   :  { %11122 = vmatpush3.msra.mxu0 %v13873_v23  ;;  %11080 = vmatprep.subr.mxu1 %v13779_v9 }
 0x8e0   :  { %11123 = vmatprep.subr.mxu0 %v13887_v13  ;;  %11081 = vmatpush3.msra.mxu1 %v13791_v60 }
 0x8e1   :  { %11124 = vmatpush3.msra.mxu0 %v13902_v0  ;;  %11082 = vmatprep.subr.mxu1 %v13803_v49 }
 0x8e2   :  { %11125 = vmatprep.subr.mxu0 %v13917_v25  ;;  %11083 = vmatpush3.msra.mxu1 %v13819_v8 }
 0x8e3   :  { %11126 = vmatpush3.msra.mxu0 %v13929_v54  ;;  %11084 = vmatprep.subr.mxu1 %v13833_v51 }
 0x8e4   :  { %11127 = vmatprep.subr.mxu0 %v13941_v62  ;;  %11085 = vmatpush3.msra.mxu1 %v13871_v63 }
 0x8e5   :  { %11128 = vmatpush3.msra.mxu0 %v13983_v30  ;;  %11086 = vmatprep.subr.mxu1 %v15815_v45  ;;  %v15874_v45 = vld [vmem:[#allocation103_spill] sm:$0xff] }
 0x8e6   :  { %11129 = vmatprep.subr.mxu0 %v15816_v37  ;;  %11087 = vmatpush3.msra.mxu1 %v15817_v42 }
 0x8e7   :  { %11130 = vmatpush3.msra.mxu0 %v15818_v22  ;;  %11088 = vmatprep.subr.mxu1 %v15819_v61 }
 0x8e8   :  { %11131 = vmatprep.subr.mxu0 %v15820_v15  ;;  %11089 = vmatpush3.msra.mxu1 %v15821_v14  ;;  %v4880_v14 = vrot.slane %v4879_v34, 4 }
 0x8e9   :  { %11132 = vmatpush3.msra.mxu0 %v15822_v33  ;;  %11090 = vmatprep.subr.mxu1 %v15823_v50  ;;  %v15838_v50 = vld [vmem:[#allocation9_spill] sm:$0xff] }
 0x8ea   :  { %11133 = vmatprep.subr.mxu0 %v15824_v52  ;;  %11091 = vmatpush3.msra.mxu1 %v15825_v48  ;;  %v15835_v48 = vld [vmem:[#allocation104_spill] sm:$0xff] }
 0x8eb   :  { %11134 = vmatpush3.msra.mxu0 %v15826_v29  ;;  %11092 = vmatprep.subr.mxu1 %v15827_v19  ;;  %v15833_v19 = vld [vmem:[#allocation98_spill] sm:$0xff] }
 0x8ec   :  { %5471 = vmatmul.mubr.f32.vlgmr.msra.gmra.mxu0 %v15828_v47  ;;  %11173 = vmatprep.subr.mxu0 %v15829_v39  ;;  %v15834_v47 = vld [vmem:[#allocation101_spill] sm:$0xff] }
 0x8ed   :  { %11093 = vmatpush3.msra.mxu1 %v15830_v24  ;;  %11174 = vmatpush3.msra.mxu0 %v13595_v20  ;;  %v4881_v24 = vadd.f32 %v4880_v14, %v4879_v34  ;;  %v15839_v14 = vld [vmem:[#allocation11_spill] sm:$0xff]  ;;  %v15840_v34 = vld [vmem:[#allocation13_spill] sm:$0xff] }
 0x8ee   :  { %5741 = vmatprep.mubr.f32.mxu0 %v14150_v18  ;;  %11094 = vmatprep.subr.mxu1 %v15831_v5  ;;  %v15836_v5 = vld [vmem:[#allocation107_spill] sm:$0xff] }
 0x8ef   :  { %11175 = vmatprep.subr.mxu0 %v13600_v21  ;;  %11095 = vmatpush3.msra.mxu1 %v15832_v27  ;;  %v15837_v27 = vld [vmem:[#allocation5_spill] sm:$0xff] }
 0x8f0   :  { %11176 = vmatpush3.msra.mxu0 %v13608_v32  ;;  %11096 = vmatprep.subr.mxu1 %v15833_v19  ;;  %v4882_v19 = vrot.slane %v4881_v24, 2 }
 0x8f1   :  { %11177 = vmatprep.subr.mxu0 %v13617_v6  ;;  %11097 = vmatpush3.msra.mxu1 %v15834_v47 }
 0x8f2   :  { %11178 = vmatpush3.msra.mxu0 %v13629_v43  ;;  %11098 = vmatprep.subr.mxu1 %v15835_v48  ;;  %v15852_v48 = vld [vmem:[#allocation46_spill] sm:$0xff] }
 0x8f3   :  { %11179 = vmatprep.subr.mxu0 %v13641_v57  ;;  %11099 = vmatpush3.msra.mxu1 %v15836_v5  ;;  %v15842_v5 = vld [vmem:[#allocation18_spill] sm:$0xff] }
 0x8f4   :  { %11180 = vmatpush3.msra.mxu0 %v13655_v28  ;;  %5363 = vmatmul.mubr.f32.vlgmr.msra.gmra.mxu1 %v14148_v3  ;;  %v15841_v3 = vld [vmem:[#allocation15_spill] sm:$0xff] }
 0x8f5   :  { %11138 = vmatprep.subr.mxu1 %v15837_v27  ;;  %11181 = vmatprep.subr.mxu0 %v13669_v31  ;;  %v4883_v27 = vadd.f32 %v4882_v19, %v4881_v24  ;;  %v15847_v24 = vld [vmem:[#allocation35_spill] sm:$0xff] }
 0x8f6   :  { %11139 = vmatpush3.msra.mxu1 %v15838_v50  ;;  %5637 = vmatprep.mubr.f32.mxu1 %v14150_v18  ;;  %v15843_v18 = vld [vmem:[#allocation21_spill] sm:$0xff]  ;;  %v15851_v50 = vld [vmem:[#allocation43_spill] sm:$0xff] }
 0x8f7   :  { %11182 = vmatpush3.msra.mxu0 %v13711_v38  ;;  %11140 = vmatprep.subr.mxu1 %v15839_v14  ;;  %v15844_v14 = vld [vmem:[#allocation24_spill] sm:$0xff]  ;;  %v4884_v19 = vrot.slane %v4883_v27, 1 }
 0x8f8   :  { %11183 = vmatprep.subr.mxu0 %v13724_v11  ;;  %11141 = vmatpush3.msra.mxu1 %v15840_v34  ;;  %v15845_v34 = vld [vmem:[#allocation26_spill] sm:$0xff] }
 0x8f9   :  { %11184 = vmatpush3.msra.mxu0 %v13737_v17  ;;  %11142 = vmatprep.subr.mxu1 %v15841_v3  ;;  %v15846_v3 = vld [vmem:[#allocation32_spill] sm:$0xff] }
 0x8fa   :  { %11185 = vmatprep.subr.mxu0 %v13751_v41  ;;  %11143 = vmatpush3.msra.mxu1 %v15842_v5  ;;  %v15850_v5 = vld [vmem:[#allocation118_spill] sm:$0xff] }
 0x8fb   :  { %11186 = vmatpush3.msra.mxu0 %v13766_v46  ;;  %11144 = vmatprep.subr.mxu1 %v15843_v18  ;;  %v15848_v18 = vld [vmem:[#allocation37_spill] sm:$0xff] }
 0x8fc   :  { %11187 = vmatprep.subr.mxu0 %v13781_v58  ;;  %11145 = vmatpush3.msra.mxu1 %v15844_v14  ;;  %v15849_v14 = vld [vmem:[#allocation39_spill] sm:$0xff] }
 0x8fd   :  { %11188 = vmatpush3.msra.mxu0 %v13793_v36  ;;  %11146 = vmatprep.subr.mxu1 %v15845_v34  ;;  %v4862_v34 = vmul.f32 %v15850_v5, %v15850_v5  ;;  %v15856_v5 = vld [vmem:[#allocation52_spill] sm:$0xff] }
 0x8fe   :  { %11189 = vmatprep.subr.mxu0 %v13805_v2  ;;  %11147 = vmatpush3.msra.mxu1 %v15846_v3  ;;  %v4885_v3 = vadd.f32 %v4884_v19, %v4883_v27  ;;  %v15857_v27 = vld [vmem:[#allocation122_spill] sm:$0xff] }
 0x8ff   :  { %11190 = vmatpush3.msra.mxu0 %v13847_v35  ;;  %11148 = vmatprep.subr.mxu1 %v15847_v24  ;;  %v15853_v24 = vld [vmem:[#allocation116_spill] sm:$0xff]  ;;  %v4866_v19 = vmul.f32 %v15857_v27, %v15857_v27  ;;  %v15863_v27 = vld [vmem:[#allocation75_spill] sm:$0xff] }
 0x900   :  { %11191 = vmatprep.subr.mxu0 %v13860_v59  ;;  %11149 = vmatpush3.msra.mxu1 %v15848_v18  ;;  %v4860_v47 = vmul.f32 %v15853_v24, %v15853_v24  ;;  %v15854_v18 = vld [vmem:[#allocation120_spill] sm:$0xff]  ;;  %v14285_v24 = vand.u32 4294901760, %v4885_v3 }
 0x901   :  { %11192 = vmatpush3.msra.mxu0 %v13873_v23  ;;  %11150 = vmatprep.subr.mxu1 %v15849_v14  ;;  %v4864_v61 = vmul.f32 %v15854_v18, %v15854_v18  ;;  %v15855_v14 = vld [vmem:[#allocation49_spill] sm:$0xff] }
 0x902   :  { %11193 = vmatprep.subr.mxu0 %v13887_v13  ;;  %11151 = vmatpush3.msra.mxu1 %v15851_v50  ;;  %v4868_v50 = vadd.f32 %v4862_v34, %v4860_v47  ;;  %15859 = vst [vmem:[#allocation2_spill] sm:$0xff] %v14285_v24  ;;  %v15860_v18 = vld [vmem:[#allocation65_spill] sm:$0xff]  ;;  %v15862_v47 = vld [vmem:[#allocation71_spill] sm:$0xff] }
 0x903   :  { %11194 = vmatpush3.msra.mxu0 %v13902_v0  ;;  %11152 = vmatprep.subr.mxu1 %v15852_v48  ;;  %v15858_v48 = vld [vmem:[#allocation61_spill] sm:$0xff] }
 0x904   :  { %11195 = vmatprep.subr.mxu0 %v13917_v25  ;;  %11153 = vmatpush3.msra.mxu1 %v15855_v14  ;;  %v4869_v42 = vadd.f32 %v4868_v50, %v4864_v61  ;;  %v15861_v14 = vld [vmem:[#allocation68_spill] sm:$0xff]  ;;  %v15865_v50 = vld [vmem:[#allocation81_spill] sm:$0xff] }
 0x905   :  { %11196 = vmatpush3.msra.mxu0 %v13929_v54  ;;  %11154 = vmatprep.subr.mxu1 %v15856_v5  ;;  %v15866_v61 = vld [vmem:[#allocation84_spill] sm:$0xff]  ;;  %v15873_v5 = vld [vmem:[#allocation23_spill] sm:$0xff] }
 0x906   :  { %11197 = vmatprep.subr.mxu0 %v13941_v62  ;;  %11155 = vmatpush3.msra.mxu1 %v15858_v48  ;;  %v4870_v34 = vadd.f32 %v4869_v42, %v4866_v19  ;;  %v14296_v48 = vsub.f32 %v4885_v3, %v14285_v24  ;;  %v15867_v19 = vld [vmem:[#allocation6_spill] sm:$0xff] }
 0x907   :  { %11198 = vmatpush3.msra.mxu0 %v13983_v30  ;;  %11156 = vmatprep.subr.mxu1 %v15860_v18  ;;  %v15864_v18 = vld [vmem:[#allocation78_spill] sm:$0xff] }
 0x908   :  { %11199 = vmatprep.subr.mxu0 %v15816_v37  ;;  %11157 = vmatpush3.msra.mxu1 %v15861_v14  ;;  %v4871_v42 = vrot.slane %v4870_v34, 4  ;;  %v15574_v3 = vand.u32 4294901760, %v14296_v48  ;;  %v15872_v14 = vld [vmem:[#allocation100_spill] sm:$0xff] }
 0x909   :  { %11200 = vmatpush3.msra.mxu0 %v15818_v22  ;;  %11158 = vmatprep.subr.mxu1 %v15862_v47  ;;  %v15869_v47 = vld [vmem:[#allocation17_spill] sm:$0xff] }
 0x90a   :  { %11201 = vmatprep.subr.mxu0 %v15820_v15  ;;  %11159 = vmatpush3.msra.mxu1 %v15863_v27  ;;  %v15868_v27 = vld [vmem:[#allocation93_spill] sm:$0xff] }
 0x90b   :  { %11202 = vmatpush3.msra.mxu0 %v15822_v33  ;;  %11160 = vmatprep.subr.mxu1 %v15864_v18  ;;  %v15870_v18 = vld [vmem:[#allocation97_spill] sm:$0xff] }
 0x90c   :  { %11203 = vmatprep.subr.mxu0 %v15824_v52  ;;  %11161 = vmatpush3.msra.mxu1 %v15865_v50  ;;  %v15871_v50 = vld [vmem:[#allocation20_spill] sm:$0xff] }
 0x90d   :  { %11204 = vmatpush3.msra.mxu0 %v15826_v29  ;;  %11162 = vmatprep.subr.mxu1 %v15866_v61  ;;  %v4872_v61 = vadd.f32 %v4871_v42, %v4870_v34  ;;  %v15881_v42 = vld [vmem:[#allocation31_spill] sm:$0xff] }
 0x90e   :  { %5743 = vmatmul.mubr.f32.vlgmr.msra.gmra.mxu0 %v14145_v53  ;;  %11243 = vmatprep.subr.mxu0 %v15867_v19  ;;  %v5847_v19 = vsub.f32 %v14296_v48, %v15574_v3  ;;  %v15882_v3 = vld [vmem:[#allocation34_spill] sm:$0xff] }
 0x90f   :  { %11163 = vmatpush3.msra.mxu1 %v15868_v27  ;;  %11244 = vmatpush3.msra.mxu0 %v15869_v47  ;;  %v15875_v27 = vld [vmem:[#allocation25_spill] sm:$0xff]  ;;  %v15876_v47 = vld [vmem:[#allocation106_spill] sm:$0xff]  ;;  %v4873_v34 = vrot.slane %v4872_v61, 2 }
 0x910   :  { %6085 = vmatprep.mubr.f32.mxu0 %v14285_v24  ;;  %11164 = vmatprep.subr.mxu1 %v15870_v18  ;;  %v15877_v24 = vld [vmem:[#allocation27_spill] sm:$0xff]  ;;  %v15878_v18 = vld [vmem:[#allocation109_spill] sm:$0xff] }
 0x911   :  { %11245 = vmatprep.subr.mxu0 %v15871_v50  ;;  %11165 = vmatpush3.msra.mxu1 %v15872_v14  ;;  %v15879_v50 = vld [vmem:[#allocation29_spill] sm:$0xff]  ;;  %v15880_v14 = vld [vmem:[#allocation111_spill] sm:$0xff] }
 0x912   :  { %11246 = vmatpush3.msra.mxu0 %v15873_v5  ;;  %11166 = vmatprep.subr.mxu1 %v15874_v45  ;;  %v5848_v5 = vand.u32 4294901760, %v5847_v19  ;;  %v15887_v19 = vld [vmem:[#allocation54_spill] sm:$0xff] }
 0x913   :  { %11247 = vmatprep.subr.mxu0 %v15875_v27  ;;  %11167 = vmatpush3.msra.mxu1 %v15876_v47  ;;  %v15884_v27 = vld [vmem:[#allocation45_spill] sm:$0xff] }
 0x914   :  { %11248 = vmatpush3.msra.mxu0 %v15877_v24  ;;  %11168 = vmatprep.subr.mxu1 %v15878_v18  ;;  %v15883_v24 = vld [vmem:[#allocation42_spill] sm:$0xff] }
 0x915   :  { %11249 = vmatprep.subr.mxu0 %v15879_v50  ;;  %11169 = vmatpush3.msra.mxu1 %v15880_v14  ;;  %v4874_v50 = vadd.f32 %v4873_v34, %v4872_v61  ;;  %v15889_v34 = vld [vmem:[#allocation60_spill] sm:$0xff] }
 0x916   :  { %11250 = vmatpush3.msra.mxu0 %v15881_v42  ;;  %5639 = vmatmul.mubr.f32.vlgmr.msra.gmra.mxu1 %v14145_v53  ;;  %v15885_v42 = vld [vmem:[#allocation48_spill] sm:$0xff]  ;;  %v15886_v53 = vld [vmem:[#allocation51_spill] sm:$0xff] }
 0x917   :  { %11208 = vmatprep.subr.mxu1 %v15829_v39  ;;  %11251 = vmatprep.subr.mxu0 %v15882_v3  ;;  %v4875_v61 = vrot.slane %v4874_v50, 1 }
 0x918   :  { %11209 = vmatpush3.msra.mxu1 %v13595_v20  ;;  %5849 = vmatprep.mubr.f32.mxu1 %v5848_v5  ;;  %v15888_v5 = vld [vmem:[#allocation57_spill] sm:$0xff] }
 0x919   :  { %11252 = vmatpush3.msra.mxu0 %v15883_v24  ;;  %11210 = vmatprep.subr.mxu1 %v13600_v21  ;;  %v15897_v24 = vld [vmem:[#allocation92_spill] sm:$0xff] }
 0x91a   :  { %11253 = vmatprep.subr.mxu0 %v15884_v27  ;;  %11211 = vmatpush3.msra.mxu1 %v13608_v32  ;;  %v15893_v27 = vld [vmem:[#allocation80_spill] sm:$0xff] }
 0x91b   :  { %11254 = vmatpush3.msra.mxu0 %v15885_v42  ;;  %11212 = vmatprep.subr.mxu1 %v13617_v6  ;;  %v15890_v42 = vld [vmem:[#allocation64_spill] sm:$0xff] }
 0x91c   :  { %11255 = vmatprep.subr.mxu0 %v15886_v53  ;;  %11213 = vmatpush3.msra.mxu1 %v13629_v43  ;;  %v15891_v53 = vld [vmem:[#allocation74_spill] sm:$0xff] }
 0x91d   :  { %11256 = vmatpush3.msra.mxu0 %v15887_v19  ;;  %11214 = vmatprep.subr.mxu1 %v13641_v57  ;;  %v15892_v19 = vld [vmem:[#allocation77_spill] sm:$0xff] }
 0x91e   :  { %11257 = vmatprep.subr.mxu0 %v15888_v5  ;;  %11215 = vmatpush3.msra.mxu1 %v13655_v28  ;;  %v4876_v5 = vadd.f32 %v4875_v61, %v4874_v50  ;;  %v15898_v50 = vld [vmem:[#allocation96_spill] sm:$0xff]  ;;  %v15899_v61 = vld [vmem:[#allocation105_spill] sm:$0xff] }
 0x91f   :  { %11258 = vmatpush3.msra.mxu0 %v15889_v34  ;;  %11216 = vmatprep.subr.mxu1 %v13669_v31  ;;  %v15894_v34 = vld [vmem:[#allocation83_spill] sm:$0xff] }
 0x920   :  { %11259 = vmatprep.subr.mxu0 %v15890_v42  ;;  %11217 = vmatpush3.msra.mxu1 %v13711_v38  ;;  %v15895_v42 = vld [vmem:[#allocation86_spill] sm:$0xff] }
 0x921   :  { %11260 = vmatpush3.msra.mxu0 %v15891_v53  ;;  %11218 = vmatprep.subr.mxu1 %v13724_v11  ;;  %v15896_v53 = vld [vmem:[#allocation89_spill] sm:$0xff] }
 0x922   :  { %11261 = vmatprep.subr.mxu0 %v15892_v19  ;;  %11219 = vmatpush3.msra.mxu1 %v13737_v17  ;;  %v14357_v19 = vand.u32 4294901760, %v4876_v5 }
 0x923   :  { %11262 = vmatpush3.msra.mxu0 %v15893_v27  ;;  %11220 = vmatprep.subr.mxu1 %v13751_v41 }
 0x924   :  { %11263 = vmatprep.subr.mxu0 %v15894_v34  ;;  %11221 = vmatpush3.msra.mxu1 %v13766_v46  ;;  %v15901_v34 = vld [vmem:[#allocation110_spill] sm:$0xff] }
 0x925   :  { %11264 = vmatpush3.msra.mxu0 %v15895_v42  ;;  %11222 = vmatprep.subr.mxu1 %v13781_v58  ;;  %v15900_v42 = vld [vmem:[#allocation108_spill] sm:$0xff] }
 0x926   :  { %11265 = vmatprep.subr.mxu0 %v15896_v53  ;;  %11223 = vmatpush3.msra.mxu1 %v13793_v36  ;;  %v14368_v53 = vsub.f32 %v4876_v5, %v14357_v19  ;;  %v15905_v5 = vld [vmem:[#allocation115_spill] sm:$0xff] }
 0x927   :  { %11266 = vmatpush3.msra.mxu0 %v15897_v24  ;;  %11224 = vmatprep.subr.mxu1 %v13805_v2  ;;  %v15902_v24 = vld [vmem:[#allocation112_spill] sm:$0xff] }
 0x928   :  { %11267 = vmatprep.subr.mxu0 %v15898_v50  ;;  %11225 = vmatpush3.msra.mxu1 %v13847_v35  ;;  %v15903_v50 = vld [vmem:[#allocation113_spill] sm:$0xff] }
 0x929   :  { %11268 = vmatpush3.msra.mxu0 %v15899_v61  ;;  %11226 = vmatprep.subr.mxu1 %v13860_v59  ;;  %v15904_v61 = vld [vmem:[#allocation114_spill] sm:$0xff] }
 0x92a   :  { %11269 = vmatprep.subr.mxu0 %v15900_v42  ;;  %11227 = vmatpush3.msra.mxu1 %v13873_v23  ;;  %v15575_v42 = vand.u32 4294901760, %v14368_v53 }
 0x92b   :  { %11270 = vmatpush3.msra.mxu0 %v15901_v34  ;;  %11228 = vmatprep.subr.mxu1 %v13887_v13 }
 0x92c   :  { %11271 = vmatprep.subr.mxu0 %v15902_v24  ;;  %11229 = vmatpush3.msra.mxu1 %v13902_v0 }
 0x92d   :  { %11272 = vmatpush3.msra.mxu0 %v15903_v50  ;;  %11230 = vmatprep.subr.mxu1 %v13917_v25  ;;  %v15906_v50 = vand.u32 4294901760, %v14296_v48 }
 0x92e   :  { %11273 = vmatprep.subr.mxu0 %v15904_v61  ;;  %11231 = vmatpush3.msra.mxu1 %v13929_v54  ;;  %v5853_v61 = vsub.f32 %v14368_v53, %v15575_v42  ;;  %v15907_v42 = vld [vmem:[#allocation4_spill] sm:$0xff] }
 0x92f   :  { %11274 = vmatpush3.msra.mxu0 %v15905_v5  ;;  %11232 = vmatprep.subr.mxu1 %v13941_v62 }
 0x930   :  { %6087 = vmatmul.mubr.f32.vlgmr.msra.gmra.mxu0 %v14357_v19  ;;  %11313 = vmatprep.subr.mxu0 %v15829_v39 }
 0x931   :  { %11233 = vmatpush3.msra.mxu1 %v13983_v30  ;;  %11314 = vmatpush3.msra.mxu0 %v13595_v20 }
 0x932   :  { %6329 = vmatprep.mubr.f32.mxu0 %v15906_v50  ;;  %11234 = vmatprep.subr.mxu1 %v15816_v37  ;;  %v5854_v50 = vand.u32 4294901760, %v5853_v61  ;;  %v15909_v61 = vld [vmem:[#allocation62_spill] sm:$0xff] }
 0x933   :  { %11315 = vmatprep.subr.mxu0 %v13600_v21  ;;  %11235 = vmatpush3.msra.mxu1 %v15818_v22 }
 0x934   :  { %11316 = vmatpush3.msra.mxu0 %v13608_v32  ;;  %11236 = vmatprep.subr.mxu1 %v15820_v15 }
 0x935   :  { %11317 = vmatprep.subr.mxu0 %v13617_v6  ;;  %11237 = vmatpush3.msra.mxu1 %v15822_v33 }
 0x936   :  { %11318 = vmatpush3.msra.mxu0 %v13629_v43  ;;  %11238 = vmatprep.subr.mxu1 %v15824_v52 }
 0x937   :  { %11319 = vmatprep.subr.mxu0 %v13641_v57  ;;  %11239 = vmatpush3.msra.mxu1 %v15826_v29 }
 0x938   :  { %11320 = vmatpush3.msra.mxu0 %v13655_v28  ;;  %5855 = vmatmul.mubr.f32.vlgmr.msra.gmra.mxu1 %v5854_v50  ;;  %v15910_v50 = vld [vmem:[#allocation66_spill] sm:$0xff] }
 0x939   :  { %11278 = vmatprep.subr.mxu1 %v15907_v42  ;;  %11321 = vmatprep.subr.mxu0 %v13669_v31 }
 0x93a   :  { %11279 = vmatpush3.msra.mxu1 %v13606_v26  ;;  %6222 = vmatprep.mubr.f32.mxu1 %v14296_v48  ;;  %v15908_v48 = vld [vmem:[#allocation58_spill] sm:$0xff] }
 0x93b   :  { %11322 = vmatpush3.msra.mxu0 %v13711_v38  ;;  %11280 = vmatprep.subr.mxu1 %v13615_v4 }
 0x93c   :  { %11323 = vmatprep.subr.mxu0 %v13724_v11  ;;  %11281 = vmatpush3.msra.mxu1 %v13627_v40 }
 0x93d   :  { %11324 = vmatpush3.msra.mxu0 %v13737_v17  ;;  %11282 = vmatprep.subr.mxu1 %v13639_v55 }
 0x93e   :  { %11325 = vmatprep.subr.mxu0 %v13751_v41  ;;  %11283 = vmatpush3.msra.mxu1 %v13653_v12 }
 0x93f   :  { %11326 = vmatpush3.msra.mxu0 %v13766_v46  ;;  %11284 = vmatprep.subr.mxu1 %v13667_v16 }
 0x940   :  { %11327 = vmatprep.subr.mxu0 %v13781_v58  ;;  %11285 = vmatpush3.msra.mxu1 %v13683_v44 }
 0x941   :  { %11328 = vmatpush3.msra.mxu0 %v13793_v36  ;;  %11286 = vmatprep.subr.mxu1 %v13697_v56 }
 0x942   :  { %11329 = vmatprep.subr.mxu0 %v13805_v2  ;;  %11287 = vmatpush3.msra.mxu1 %v13735_v7 }
 0x943   :  { %11330 = vmatpush3.msra.mxu0 %v13847_v35  ;;  %11288 = vmatprep.subr.mxu1 %v13749_v1 }
 0x944   :  { %11331 = vmatprep.subr.mxu0 %v13860_v59  ;;  %11289 = vmatpush3.msra.mxu1 %v13764_v10 }
 0x945   :  { %11332 = vmatpush3.msra.mxu0 %v13873_v23  ;;  %11290 = vmatprep.subr.mxu1 %v13779_v9 }
 0x946   :  { %11333 = vmatprep.subr.mxu0 %v13887_v13  ;;  %11291 = vmatpush3.msra.mxu1 %v13791_v60 }
 0x947   :  { %11334 = vmatpush3.msra.mxu0 %v13902_v0  ;;  %11292 = vmatprep.subr.mxu1 %v13803_v49  ;;  %v15923_v49 = vld [vmem:[#allocation107_spill] sm:$0xff] }
 0x948   :  { %11335 = vmatprep.subr.mxu0 %v13917_v25  ;;  %11293 = vmatpush3.msra.mxu1 %v13819_v8  ;;  %v15911_v8 = vld [vmem:[#allocation69_spill] sm:$0xff] }
 0x949   :  { %11336 = vmatpush3.msra.mxu0 %v13929_v54  ;;  %11294 = vmatprep.subr.mxu1 %v13833_v51  ;;  %v15912_v51 = vld [vmem:[#allocation72_spill] sm:$0xff] }
 0x94a   :  { %11337 = vmatprep.subr.mxu0 %v13941_v62  ;;  %11295 = vmatpush3.msra.mxu1 %v13871_v63  ;;  %v15913_v63 = vld [vmem:[#allocation76_spill] sm:$0xff] }
 0x94b   :  { %11338 = vmatpush3.msra.mxu0 %v13983_v30  ;;  %11296 = vmatprep.subr.mxu1 %v15908_v48  ;;  %v15914_v48 = vld [vmem:[#allocation79_spill] sm:$0xff] }
 0x94c   :  { %11339 = vmatprep.subr.mxu0 %v15816_v37  ;;  %11297 = vmatpush3.msra.mxu1 %v15909_v61  ;;  %v15915_v61 = vand.u32 4294901760, %v14368_v53 }
 0x94d   :  { %11340 = vmatpush3.msra.mxu0 %v15818_v22  ;;  %11298 = vmatprep.subr.mxu1 %v15910_v50  ;;  %v15916_v50 = vld [vmem:[#allocation87_spill] sm:$0xff] }
 0x94e   :  { %11341 = vmatprep.subr.mxu0 %v15820_v15  ;;  %11299 = vmatpush3.msra.mxu1 %v15911_v8  ;;  %v15917_v8 = vld [vmem:[#allocation2_spill] sm:$0xff] }
 0x94f   :  { %11342 = vmatpush3.msra.mxu0 %v15822_v33  ;;  %11300 = vmatprep.subr.mxu1 %v15912_v51  ;;  %v15918_v51 = vld [vmem:[#allocation90_spill] sm:$0xff] }
 0x950   :  { %11343 = vmatprep.subr.mxu0 %v15824_v52  ;;  %11301 = vmatpush3.msra.mxu1 %v15913_v63  ;;  %v15919_v63 = vld [vmem:[#allocation94_spill] sm:$0xff] }
 0x951   :  { %11344 = vmatpush3.msra.mxu0 %v15826_v29  ;;  %11302 = vmatprep.subr.mxu1 %v15914_v48  ;;  %v15920_v48 = vld [vmem:[#allocation98_spill] sm:$0xff] }
 0x952   :  { %6333 = vmatmul.mubr.f32.vlgmr.msra.gmra.mxu0 %v15915_v61  ;;  %11383 = vmatprep.subr.mxu0 %v15829_v39  ;;  %v15921_v61 = vld [vmem:[#allocation101_spill] sm:$0xff] }
 0x953   :  { %11303 = vmatpush3.msra.mxu1 %v15916_v50  ;;  %11384 = vmatpush3.msra.mxu0 %v13595_v20  ;;  %v15922_v50 = vld [vmem:[#allocation104_spill] sm:$0xff] }
 0x954   :  { %6603 = vmatprep.mubr.f32.mxu0 %v15917_v8  ;;  %11304 = vmatprep.subr.mxu1 %v15918_v51 }
 0x955   :  { %11385 = vmatprep.subr.mxu0 %v13600_v21  ;;  %11305 = vmatpush3.msra.mxu1 %v15919_v63  ;;  %v15924_v63 = vld [vmem:[#allocation5_spill] sm:$0xff] }
 0x956   :  { %11386 = vmatpush3.msra.mxu0 %v13608_v32  ;;  %11306 = vmatprep.subr.mxu1 %v15920_v48  ;;  %v15925_v48 = vld [vmem:[#allocation9_spill] sm:$0xff] }
 0x957   :  { %11387 = vmatprep.subr.mxu0 %v13617_v6  ;;  %11307 = vmatpush3.msra.mxu1 %v15921_v61  ;;  %v15926_v61 = vld [vmem:[#allocation11_spill] sm:$0xff] }
 0x958   :  { %11388 = vmatpush3.msra.mxu0 %v13629_v43  ;;  %11308 = vmatprep.subr.mxu1 %v15922_v50  ;;  %v15927_v50 = vld [vmem:[#allocation13_spill] sm:$0xff] }
 0x959   :  { %11389 = vmatprep.subr.mxu0 %v13641_v57  ;;  %11309 = vmatpush3.msra.mxu1 %v15923_v49  ;;  %v15928_v49 = vld [vmem:[#allocation15_spill] sm:$0xff] }
 0x95a   :  { %11390 = vmatpush3.msra.mxu0 %v13655_v28  ;;  %6225 = vmatmul.mubr.f32.vlgmr.msra.gmra.mxu1 %v14368_v53  ;;  %v15929_v53 = vld [vmem:[#allocation18_spill] sm:$0xff] }
 0x95b   :  { %11348 = vmatprep.subr.mxu1 %v15924_v63  ;;  %11391 = vmatprep.subr.mxu0 %v13669_v31  ;;  %v15951_v63 = vmov 0.0  }
 0x95c   :  { %11349 = vmatpush3.msra.mxu1 %v15925_v48  ;;  %6499 = vmatprep.mubr.f32.mxu1 %v15917_v8  ;;  %v15930_v48 = vld [vmem:[#allocation21_spill] sm:$0xff]  ;;  %v15931_v8 = vld [vmem:[#allocation24_spill] sm:$0xff] }
 0x95d   :  { %11392 = vmatpush3.msra.mxu0 %v13711_v38  ;;  %11350 = vmatprep.subr.mxu1 %v15926_v61  ;;  %v15932_v61 = vld [vmem:[#allocation26_spill] sm:$0xff] }
 0x95e   :  { %11393 = vmatprep.subr.mxu0 %v13724_v11  ;;  %11351 = vmatpush3.msra.mxu1 %v15927_v50  ;;  %v15933_v50 = vld [vmem:[#allocation32_spill] sm:$0xff] }
 0x95f   :  { %11394 = vmatpush3.msra.mxu0 %v13737_v17  ;;  %11352 = vmatprep.subr.mxu1 %v15928_v49  ;;  %v15934_v49 = vld [vmem:[#allocation35_spill] sm:$0xff] }
 0x960   :  { %11395 = vmatprep.subr.mxu0 %v13751_v41  ;;  %11353 = vmatpush3.msra.mxu1 %v15929_v53  ;;  %v15935_v53 = vld [vmem:[#allocation37_spill] sm:$0xff] }
 0x961   :  { %11396 = vmatpush3.msra.mxu0 %v13766_v46  ;;  %11354 = vmatprep.subr.mxu1 %v15930_v48  ;;  %v15936_v48 = vld [vmem:[#allocation39_spill] sm:$0xff] }
 0x962   :  { %11397 = vmatprep.subr.mxu0 %v13781_v58  ;;  %11355 = vmatpush3.msra.mxu1 %v15931_v8  ;;  %v15937_v8 = vld [vmem:[#allocation43_spill] sm:$0xff] }
 0x963   :  { %11398 = vmatpush3.msra.mxu0 %v13793_v36  ;;  %11356 = vmatprep.subr.mxu1 %v15932_v61  ;;  %v15938_v61 = vld [vmem:[#allocation46_spill] sm:$0xff] }
 0x964   :  { %11399 = vmatprep.subr.mxu0 %v13805_v2  ;;  %11357 = vmatpush3.msra.mxu1 %v15933_v50  ;;  %v15939_v50 = vld [vmem:[#allocation49_spill] sm:$0xff] }
 0x965   :  { %11400 = vmatpush3.msra.mxu0 %v13847_v35  ;;  %11358 = vmatprep.subr.mxu1 %v15934_v49  ;;  %v15940_v49 = vld [vmem:[#allocation52_spill] sm:$0xff] }
 0x966   :  { %11401 = vmatprep.subr.mxu0 %v13860_v59  ;;  %11359 = vmatpush3.msra.mxu1 %v15935_v53  ;;  %v15941_v53 = vld [vmem:[#allocation61_spill] sm:$0xff] }
 0x967   :  { %11402 = vmatpush3.msra.mxu0 %v13873_v23  ;;  %11360 = vmatprep.subr.mxu1 %v15936_v48  ;;  %v15942_v48 = vld [vmem:[#allocation65_spill] sm:$0xff] }
 0x968   :  { %11403 = vmatprep.subr.mxu0 %v13887_v13  ;;  %11361 = vmatpush3.msra.mxu1 %v15937_v8  ;;  %v15943_v8 = vld [vmem:[#allocation68_spill] sm:$0xff] }
 0x969   :  { %11404 = vmatpush3.msra.mxu0 %v13902_v0  ;;  %11362 = vmatprep.subr.mxu1 %v15938_v61  ;;  %v15944_v61 = vld [vmem:[#allocation71_spill] sm:$0xff] }
 0x96a   :  { %11405 = vmatprep.subr.mxu0 %v13917_v25  ;;  %11363 = vmatpush3.msra.mxu1 %v15939_v50  ;;  %v15945_v50 = vld [vmem:[#allocation75_spill] sm:$0xff] }
 0x96b   :  { %11406 = vmatpush3.msra.mxu0 %v13929_v54  ;;  %11364 = vmatprep.subr.mxu1 %v15940_v49  ;;  %v15946_v49 = vld [vmem:[#allocation78_spill] sm:$0xff] }
 0x96c   :  { %11407 = vmatprep.subr.mxu0 %v13941_v62  ;;  %11365 = vmatpush3.msra.mxu1 %v15941_v53  ;;  %v15947_v53 = vld [vmem:[#allocation81_spill] sm:$0xff] }
 0x96d   :  { %11408 = vmatpush3.msra.mxu0 %v13983_v30  ;;  %11366 = vmatprep.subr.mxu1 %v15942_v48  ;;  %v15948_v48 = vld [vmem:[#allocation84_spill] sm:$0xff] }
 0x96e   :  { %11409 = vmatprep.subr.mxu0 %v15816_v37  ;;  %11367 = vmatpush3.msra.mxu1 %v15943_v8  ;;  %v15949_v8 = vld [vmem:[#allocation93_spill] sm:$0xff] }
 0x96f   :  { %11410 = vmatpush3.msra.mxu0 %v15818_v22  ;;  %11368 = vmatprep.subr.mxu1 %v15944_v61  ;;  %v15950_v61 = vld [vmem:[#allocation97_spill] sm:$0xff] }
 0x970   :  { %11411 = vmatprep.subr.mxu0 %v15820_v15  ;;  %11369 = vmatpush3.msra.mxu1 %v15945_v50  ;;  %v15952_v50 = vld [vmem:[#allocation100_spill] sm:$0xff] }
 0x971   :  { %11412 = vmatpush3.msra.mxu0 %v15822_v33  ;;  %11370 = vmatprep.subr.mxu1 %v15946_v49 }
 0x972   :  { %11413 = vmatprep.subr.mxu0 %v15824_v52  ;;  %11371 = vmatpush3.msra.mxu1 %v15947_v53 }
 0x973   :  { %11414 = vmatpush3.msra.mxu0 %v15826_v29  ;;  %11372 = vmatprep.subr.mxu1 %v15948_v48 }
 0x974   :  { %6605 = vmatmul.mubr.f32.vlgmr.msra.gmra.mxu0 %v14357_v19  ;;  %11373 = vmatpush3.msra.mxu1 %v15949_v8 }
 0x975   :  { %11374 = vmatprep.subr.mxu1 %v15950_v61  ;;  %7030 = vmatprep.mubr.f32.mxu0 %v15951_v63  ;;  %v4841_v61 = vld [vmem:[%s15368_s17 + $0x18] sm:$0xff] }
 0x976   :  { %11375 = vmatpush3.msra.mxu1 %v15952_v50  ;;  %v4840_v50 = vld [vmem:[%s15368_s17 + $0x10] sm:$0xff] }
 0x977   :  { %11376 = vmatprep.subr.mxu1 %v15874_v45  ;;  %v14541_v45 = vand.u32 4294901760, %v4841_v61 }
 0x978   :  { %11377 = vmatpush3.msra.mxu1 %v15876_v47  ;;  %v4839_v47 = vld [vmem:[%s15368_s17 + $0x8] sm:$0xff] }
 0x979   :  { %11378 = vmatprep.subr.mxu1 %v15878_v18  ;;  %15953 = vst [vmem:[#allocation2_spill] sm:$0xff] %v14541_v45  ;;  %v14543_v18 = vand.u32 4294901760, %v4840_v50  ;;  %v14553_v48 = vsub.f32 %v4841_v61, %v14541_v45 }
 0x97a   :  { %11379 = vmatpush3.msra.mxu1 %v15880_v14  ;;  %v14545_v14 = vand.u32 4294901760, %v4839_v47 }
 0x97b   :  { %6501 = vmatmul.mubr.f32.vlgmr.msra.gmra.mxu1 %v14357_v19  ;;  %15954 = vst [vmem:[#allocation124_spill] sm:$0xff] %v14543_v18  ;;  %v4838_v19 = vld [vmem:[%s15368_s17] sm:$0xff]  ;;  %15957 = vst [vmem:[#allocation127_spill] sm:$0xff] %v14553_v48  ;;  %v14556_v53 = vsub.f32 %v4840_v50, %v14543_v18  ;;  %6652 = vmatprep.subr.mxu1 %v14541_v45  ;;  %v14567_v60 = vand.u32 4294901760, %v14553_v48 }
 0x97c   :  { %6691 = vmatprep.mubr.f32.mxu1 %v15951_v63  ;;  %15955 = vst [vmem:[#allocation125_spill] sm:$0xff] %v14545_v14  ;;  %v14550_v8 = vand.u32 4294901760, %v4838_v19  ;;  %v14559_v49 = vsub.f32 %v4839_v47, %v14545_v14  ;;  %6654 = vmatpush1.msra.mxu1 %v14543_v18 }
 0x97d   :  { %15958 = vst [vmem:[#allocation128_spill] sm:$0xff] %v14556_v53  ;;  %15961 = vst [vmem:[#allocation131_spill] sm:$0xff] %v14567_v60  ;;  %v14570_v9 = vand.u32 4294901760, %v14556_v53  ;;  %6656 = vmatprep.subr.mxu1 %v14545_v14  ;;  %6985 = vmatprep.subr.mxu0 %v14567_v60  ;;  %v6734_v50 = vsub.f32 %v14553_v48, %v14567_v60 }
 0x97e   :  { %15956 = vst [vmem:[#allocation126_spill] sm:$0xff] %v14550_v8  ;;  %15959 = vst [vmem:[#allocation129_spill] sm:$0xff] %v14559_v49  ;;  %v14563_v51 = vsub.f32 %v4838_v19, %v14550_v8  ;;  %v14573_v61 = vand.u32 4294901760, %v14559_v49  ;;  %6658 = vmatpush1.msra.mxu1 %v14550_v8 }
 0x97f   :  { %15962 = vst [vmem:[#allocation132_spill] sm:$0xff] %v14570_v9  ;;  %6989 = vmatpush1.msra.mxu0 %v14570_v9  ;;  %v14587_v19 = vand.u32 4294901760, %v6734_v50 }
 0x980   :  { %15960 = vst [vmem:[#allocation130_spill] sm:$0xff] %v14563_v51  ;;  %15963 = vst [vmem:[#allocation133_spill] sm:$0xff] %v14573_v61  ;;  %v14577_v47 = vand.u32 4294901760, %v14563_v51  ;;  %6993 = vmatprep.subr.mxu0 %v14573_v61 }
 0x981   :  { %15965 = vst [vmem:[#allocation135_spill] sm:$0xff] %v14587_v19  ;;  %6736 = vmatprep.subr.mxu1 %v14587_v19 }
 0x982   :  { %15964 = vst [vmem:[#allocation134_spill] sm:$0xff] %v14577_v47  ;;  %6997 = vmatpush1.msra.mxu0 %v14577_v47 }
 0x983   :  { %7146 = vmatprep.subr.mxu0 %v14541_v45 }
 0x98b   :  { %v11065_v1 = vpop.f32.mrf.mxu0 }
 0x98d   :  { %v11066_v44 = vpop.f32.mrf.mxu0 }
 0x98e   :  { %v11067_v50 = vadd.f32 %v11066_v44, %v11065_v1 }
 0x993   :  { %v11030_v10 = vpop.f32.mrf.mxu1 }
 0x995   :  { %v11031_v7 = vpop.f32.mrf.mxu1 }
 0x996   :  { %v11032_v34 = vadd.f32 %v11031_v7, %v11030_v10 }
 0x998   :  { %v5227_v33 = vadd.f32 %v11067_v50, %v11032_v34 }
 0x9ac   :  { %v11135_v16 = vpop.f32.mrf.mxu0 }
 0x9ae   :  { %v11136_v40 = vpop.f32.mrf.mxu0 }
 0x9af   :  { %v11137_v62 = vadd.f32 %v11136_v40, %v11135_v16 }
 0x9b4   :  { %v11100_v56 = vpop.f32.mrf.mxu1 }
 0x9b6   :  { %v11101_v12 = vpop.f32.mrf.mxu1 }
 0x9b7   :  { %v11102_v29 = vadd.f32 %v11101_v12, %v11100_v56 }
 0x9b9   :  { %v5365_v22 = vadd.f32 %v11102_v29, %v5227_v33 }
 0x9bb   :  { %v5473_v25 = vadd.f32 %v11137_v62, %v5365_v22 }
 0x9ce   :  { %v11205_v4 = vpop.f32.mrf.mxu0 }
 0x9d0   :  { %v11206_v24 = vpop.f32.mrf.mxu0 }
 0x9d1   :  { %v11207_v10 = vadd.f32 %v11206_v24, %v11205_v4  ;;  %v4804_v4 = vld [vmem:[%s15370_s10] sm:$0x1]  ;;  %v6746_v24 = vsub.f32 %v14559_v49, %v14573_v61 }
 0x9d6   :  { %v11170_v55 = vpop.f32.mrf.mxu1 }
 0x9d8   :  { %v11171_v26 = vpop.f32.mrf.mxu1 }
 0x9d9   :  { %v11172_v54 = vadd.f32 %v11171_v26, %v11170_v55 }
 0x9db   :  { %v5641_v59 = vadd.f32 %v11172_v54, %v5473_v25 }
 0x9dd   :  { %v5745_v12 = vadd.f32 %v11207_v10, %v5641_v59 }
 0x9df   :  { %v6610_v50 = vmul.f32 0.001953125, %v5745_v12 }
 0x9e1   :  { %v6612_v16 = vmul.f32 %v6610_v50, %v6610_v50 }
 0x9f0   :  { %v11275_v27 = vpop.f32.mrf.mxu0 }
 0x9f2   :  { %v11276_v15 = vpop.f32.mrf.mxu0 }
 0x9f3   :  { %v11277_v0 = vadd.f32 %v11276_v15, %v11275_v27 }
 0x9f8   :  { %v11240_v5 = vpop.f32.mrf.mxu1 }
 0x9fa   :  { %v11241_v42 = vpop.f32.mrf.mxu1 }
 0x9fb   :  { %v11242_v3 = vadd.f32 %v11241_v42, %v11240_v5 }
 0x9fd   :  { %v6089_v35 = vadd.f32 %v11277_v0, %v11242_v3  ;;  %v6752_v3 = vsub.f32 %v14563_v51, %v14577_v47 }
 0xa12   :  { %v11345_v37 = vpop.f32.mrf.mxu0 }
 0xa14   :  { %v11346_v23 = vpop.f32.mrf.mxu0 }
 0xa15   :  { %v11347_v56 = vadd.f32 %v11346_v23, %v11345_v37  ;;  %v4805_v23 = vld [vmem:[%s15371_s11] sm:$0x1]  ;;  %v6740_v37 = vsub.f32 %v14556_v53, %v14570_v9 }
 0xa1a   :  { %v11310_v52 = vpop.f32.mrf.mxu1 }
 0xa1c   :  { %v11311_v30 = vpop.f32.mrf.mxu1 }
 0xa1d   :  { %v11312_v13 = vadd.f32 %v11311_v30, %v11310_v52 }
 0xa1f   :  { %v6227_v2 = vadd.f32 %v11312_v13, %v6089_v35 }
 0xa21   :  { %v6335_v29 = vadd.f32 %v11347_v56, %v6227_v2  ;;  %v14623_v56 = vand.u32 4294901760, %v6752_v3  ;;  %v15976_v3 = vld [vmem:[#allocation53_spill] sm:$0xff] }
 0xa23   :  { %15968 = vst [vmem:[#allocation138_spill] sm:$0xff] %v14623_v56 }
 0xa34   :  { %v11415_v7 = vpop.f32.mrf.mxu0 }
 0xa36   :  { %v11416_v1 = vpop.f32.mrf.mxu0 }
 0xa37   :  { %v11417_v40 = vadd.f32 %v11416_v1, %v11415_v7  ;;  %v14618_v7 = vand.u32 4294901760, %v6740_v37  ;;  %v15971_v37 = vld [vmem:[#allocation41_spill] sm:$0xff] }
 0xa39   :  { %15966 = vst [vmem:[#allocation136_spill] sm:$0xff] %v14618_v7 }
 0xa3b   :  { %v11380_v44 = vpop.f32.mrf.mxu1 }
 0xa3d   :  { %v11381_v34 = vpop.f32.mrf.mxu1 }
 0xa3e   :  { %v11382_v33 = vadd.f32 %v11381_v34, %v11380_v44  ;;  %v14620_v44 = vand.u32 4294901760, %v6746_v24  ;;  %v15974_v24 = vld [vmem:[#allocation50_spill] sm:$0xff] }
 0xa40   :  { %v6503_v26 = vadd.f32 %v11382_v33, %v6335_v29  ;;  %15967 = vst [vmem:[#allocation137_spill] sm:$0xff] %v14620_v44  ;;  %v12529_v29 = vld [vmem:[%s15369_s4 + $0x74] ss:$8 sps:$4 sm:$0xff]   ;;  %v12527_v33 = vld [vmem:[%s15369_s4 + $0x70] ss:$8 sps:$4 sm:$0xff]  }
 0xa42   :  { %v6607_v55 = vadd.f32 %v11417_v40, %v6503_v26  ;;  %v12530_v40 = vld [vmem:[%s15369_s4 + $0x60] ss:$8 sps:$4 sm:$0xff]   ;;  %v12535_v26 = vld [vmem:[%s15369_s4 + $0x54] ss:$8 sps:$4 sm:$0xff]  }
 0xa44   :  { %v6611_v62 = vmul.f32 0.001953125, %v6607_v55  ;;  %v12533_v55 = vld [vmem:[%s15369_s4 + $0x50] ss:$8 sps:$4 sm:$0xff]  }
 0xa46   :  { %v6613_v30 = vsub.f32 %v6611_v62, %v6612_v16  ;;  %v12538_v16 = vld [vmem:[%s15369_s4 + $0x44] ss:$8 sps:$4 sm:$0xff]   ;;  %v15969_v62 = vmov 0  }
 0xa48   :  { %v6614_v22 = vadd.f32 1e-05, %v6613_v30  ;;  %v12536_v30 = vld [vmem:[%s15369_s4 + $0x40] ss:$8 sps:$4 sm:$0xff]  }
 0xa4a   :  { %12555 = vrsqrt.f32 %v6614_v22  ;;  %v12541_v22 = vld [vmem:[%s15369_s4 + $0x34] ss:$8 sps:$4 sm:$0xff]  }
 0xa57   :  { %v12556_v35 = vpop.eup %12555 }
 0xa58   :  { %v6616_v59 = vmul.f32 %v12556_v35, %v4804_v4  ;;  %v12539_v4 = vld [vmem:[%s15369_s4 + $0x30] ss:$8 sps:$4 sm:$0xff]   ;;  %v12544_v35 = vld [vmem:[%s15369_s4 + $0x24] ss:$8 sps:$4 sm:$0xff]  }
 0xa5a   :  { %v6617_v54 = vmul.f32 %v6616_v59, %v6610_v50  ;;  %v6621_v2 = vsel %vm6619_vm5, %v6616_v59, 0  ;;  %v12532_v50 = vld [vmem:[%s15369_s4 + $0x64] ss:$8 sps:$4 sm:$0xff]   ;;  %v12542_v59 = vld [vmem:[%s15369_s4 + $0x20] ss:$8 sps:$4 sm:$0xff]  }
 0xa5b   :  { %v14597_v13 = vand.u32 4294901760, %v6621_v2 }
 0xa5c   :  { %v6618_v0 = vsub.f32 %v4805_v23, %v6617_v54  ;;  %v12547_v23 = vld [vmem:[%s15369_s4 + $0x14] ss:$8 sps:$4 sm:$0xff]   ;;  %v12545_v54 = vld [vmem:[%s15369_s4 + $0x10] ss:$8 sps:$4 sm:$0xff]  }
 0xa5d   :  { %v6693_v25 = vsub.f32 %v6621_v2, %v14597_v13  ;;  %7032 = vmatmul.mubr.f32.vlgmr.msra.gmra.mxu0 %v14597_v13  ;;  %v12550_v2 = vld [vmem:[%s15369_s4 + $0x4] ss:$8 sps:$4 sm:$0xff]  }
 0xa5e   :  { %7148 = vmatpush1.msra.mxu0 %v14543_v18  ;;  %7185 = vmatprep.mubr.f32.mxu0 %v15951_v63  ;;  %v7115_v15 = vsel %vm6619_vm5, %v6618_v0, 0  ;;  %v15970_v0 = vld [vmem:[#allocation6_spill] sm:$0xff] }
 0xa5f   :  { %v6694_v52 = vand.u32 4294901760, %v6693_v25  ;;  %7150 = vmatprep.subr.mxu0 %v14545_v14  ;;  %v14609_v27 = vand.u32 4294901760, %v7115_v15 }
 0xa60   :  { %7152 = vmatpush1.msra.mxu0 %v14550_v8 }
 0xa61   :  { %v6695_v42 = vsub.f32 %v6693_v25, %v6694_v52  ;;  %7319 = vmatprep.subr.mxu0 %v14553_v48  ;;  %v14616_v5 = vsub.f32 %v7115_v15, %v14609_v27  ;;  %v15972_v15 = vld [vmem:[#allocation17_spill] sm:$0xff] }
 0xa63   :  { %v6696_v10 = vand.u32 4294901760, %v6695_v42  ;;  %v7188_v12 = vand.u32 4294901760, %v14616_v5  ;;  %v15977_v42 = vld [vmem:[#allocation25_spill] sm:$0xff] }
 0xa65   :  { %6697 = vmatmul.mubr.f32.vlgmr.msra.gmra.mxu1 %v6696_v10  ;;  %v7189_v1 = vsub.f32 %v14616_v5, %v7188_v12  ;;  %v15979_v10 = vld [vmem:[#allocation27_spill] sm:$0xff] }
 0xa66   :  { %6742 = vmatpush1.msra.mxu1 %v14618_v7  ;;  %6787 = vmatprep.mubr.f32.mxu1 %v15951_v63 }
 0xa67   :  { %6748 = vmatprep.subr.mxu1 %v14620_v44  ;;  %v7190_v34 = vand.u32 4294901760, %v7189_v1  ;;  %v15981_v1 = vld [vmem:[#allocation29_spill] sm:$0xff] }
 0xa68   :  { %6754 = vmatpush1.msra.mxu1 %v14623_v56 }
 0xa69   :  { %6789 = vmatmul.mubr.f32.vlgmr.msra.gmra.mxu1 %v14597_v13  ;;  %6825 = vmatprep.subr.mxu1 %v14553_v48  ;;  %v16017_v48 = vld [vmem:[#allocation114_spill] sm:$0xff] }
 0xa6a   :  { %7191 = vmatmul.mubr.f32.vlgmr.msra.gmra.mxu0 %v7190_v34  ;;  %6828 = vmatpush1.msra.mxu1 %v14556_v53  ;;  %v15982_v34 = vld [vmem:[#allocation63_spill] sm:$0xff] }
 0xa6b   :  { %7322 = vmatpush1.msra.mxu0 %v14556_v53  ;;  %6831 = vmatprep.subr.mxu1 %v14559_v49  ;;  %v16016_v53 = vld [vmem:[#allocation113_spill] sm:$0xff] }
 0xa6c   :  { %7325 = vmatprep.subr.mxu0 %v14559_v49  ;;  %6834 = vmatpush1.msra.mxu1 %v14563_v51  ;;  %v16015_v49 = vld [vmem:[#allocation112_spill] sm:$0xff] }
 0xa6d   :  { %7328 = vmatpush1.msra.mxu0 %v14563_v51  ;;  %6867 = vmatprep.mubr.f32.mxu1 %v15951_v63  ;;  %v16014_v51 = vld [vmem:[#allocation110_spill] sm:$0xff] }
 0xa6e   :  { %7361 = vmatprep.mubr.f32.mxu0 %v15951_v63  ;;  %7479 = vmatprep.subr.mxu0 %v14567_v60  ;;  %v16012_v60 = vld [vmem:[#allocation105_spill] sm:$0xff] }
 0xa6f   :  { %6870 = vmatmul.mubr.f32.vlgmr.msra.gmra.mxu1 %v6693_v25  ;;  %6905 = vmatprep.subr.mxu1 %v14541_v45  ;;  %v12559_v25 = vld [vmem:[%s15688_s23] sm:$0xff]  }
 0xa70   :  { %7364 = vmatmul.mubr.f32.vlgmr.msra.gmra.mxu0 %v14616_v5  ;;  %6907 = vmatpush1.msra.mxu1 %v14543_v18  ;;  %v15978_v5 = vld [vmem:[#allocation56_spill] sm:$0xff] }
 0xa71   :  { %7483 = vmatpush1.msra.mxu0 %v14570_v9  ;;  %6909 = vmatprep.subr.mxu1 %v14545_v14  ;;  %v16006_v9 = vld [vmem:[#allocation80_spill] sm:$0xff] }
 0xa72   :  { %7487 = vmatprep.subr.mxu0 %v14573_v61  ;;  %6911 = vmatpush1.msra.mxu1 %v14550_v8  ;;  %v16005_v61 = vld [vmem:[#allocation4_spill] sm:$0xff] }
 0xa73   :  { %7491 = vmatpush1.msra.mxu0 %v14577_v47  ;;  %6944 = vmatprep.mubr.f32.mxu1 %v15951_v63  ;;  %v16003_v47 = vld [vmem:[#allocation102_spill] sm:$0xff] }
 0xa74   :  { %7524 = vmatprep.mubr.f32.mxu0 %v15951_v63  ;;  %7736 = vmatprep.subr.bf16.mxu0 %v12529_v29  ;;  %v15983_v29 = vld [vmem:[#allocation31_spill] sm:$0xff] }
 0xa75   :  { %6948 = vmatmul.mubr.f32.vlgmr.msra.gmra.mxu1 %v6694_v52  ;;  %7067 = vmatprep.subr.mxu1 %v14541_v45  ;;  %v15973_v52 = vld [vmem:[#allocation20_spill] sm:$0xff] }
 0xa76   :  { %7526 = vmatmul.mubr.f32.vlgmr.msra.gmra.mxu0 %v14609_v27  ;;  %7069 = vmatpush1.msra.mxu1 %v14543_v18 }
 0xa77   :  { %7737 = vmatpush1.bf16.msra.mxu0 %v12527_v33  ;;  %7071 = vmatprep.subr.mxu1 %v14545_v14  ;;  %v15984_v33 = vld [vmem:[#allocation67_spill] sm:$0xff] }
 0xa78   :  { %7073 = vmatpush1.msra.mxu1 %v14550_v8  ;;  %7106 = vmatprep.mubr.f32.mxu1 %v15951_v63 }
 0xa79   :  { %7738 = vmatprep.subr.bf16.mxu0 %v12532_v50  ;;  %7108 = vmatmul.mubr.f32.vlgmr.msra.gmra.mxu1 %v14597_v13  ;;  %v12548_v13 = vld [vmem:[%s15369_s4] ss:$8 sps:$4 sm:$0xff]  }
 0xa7a   :  { %7230 = vmatprep.subr.mxu1 %v14587_v19  ;;  %7281 = vmatprep.mubr.f32.mxu1 %v15951_v63  ;;  %v12560_v50 = vld [vmem:[%s15688_s23 + $0x8] sm:$0xff]  }
 0xa7b   :  { %7739 = vmatpush1.bf16.msra.mxu0 %v12530_v40  ;;  %7236 = vmatpush1.msra.mxu1 %v14618_v7  ;;  %v15985_v40 = vld [vmem:[#allocation34_spill] sm:$0xff]  ;;  %v16004_v7 = vld [vmem:[#allocation77_spill] sm:$0xff]  ;;  %v16007_v19 = vld [vmem:[#allocation83_spill] sm:$0xff] }
 0xa7c   :  { %7242 = vmatprep.subr.mxu1 %v14620_v44  ;;  %7740 = vmatprep.subr.bf16.mxu0 %v12535_v26  ;;  %v15986_v26 = vld [vmem:[#allocation42_spill] sm:$0xff] }
 0xa7d   :  { %7248 = vmatpush1.msra.mxu1 %v14623_v56  ;;  %7768 = vmatprep.mubr.bf16.mxu0 %v15969_v62  ;;  %v16001_v56 = vld [vmem:[#allocation99_spill] sm:$0xff]  ;;  %v16002_v44 = vld [vmem:[#allocation74_spill] sm:$0xff] }
 0xa7e   :  { %7283 = vmatmul.mubr.f32.vlgmr.msra.gmra.mxu1 %v14609_v27  ;;  %7399 = vmatprep.subr.mxu1 %v14541_v45 }
 0xa7f   :  { %7741 = vmatpush1.bf16.msra.mxu0 %v12533_v55  ;;  %7401 = vmatpush1.msra.mxu1 %v14543_v18  ;;  %v15987_v55 = vld [vmem:[#allocation70_spill] sm:$0xff] }
 0xa80   :  { %7403 = vmatprep.subr.mxu1 %v14545_v14  ;;  %7438 = vmatprep.mubr.f32.mxu1 %v15951_v63 }
 0xa81   :  { %7405 = vmatpush1.msra.mxu1 %v14550_v8  ;;  %7742 = vmatprep.subr.bf16.mxu0 %v12538_v16  ;;  %v15988_v16 = vld [vmem:[#allocation45_spill] sm:$0xff] }
 0xa82   :  { %7442 = vmatmul.mubr.f32.vlgmr.msra.gmra.mxu1 %v7188_v12  ;;  %7561 = vmatprep.subr.mxu1 %v14541_v45  ;;  %v15980_v12 = vld [vmem:[#allocation59_spill] sm:$0xff]  ;;  %v16011_v45 = vld [vmem:[#allocation96_spill] sm:$0xff] }
 0xa83   :  { %7743 = vmatpush1.bf16.msra.mxu0 %v12536_v30  ;;  %7563 = vmatpush1.msra.mxu1 %v14543_v18  ;;  %v15990_v30 = vld [vmem:[#allocation48_spill] sm:$0xff] }
 0xa84   :  { %7565 = vmatprep.subr.mxu1 %v14545_v14  ;;  %7600 = vmatprep.mubr.f32.mxu1 %v15951_v63  ;;  %v16009_v14 = vld [vmem:[#allocation89_spill] sm:$0xff]  ;;  %v16010_v18 = vld [vmem:[#allocation92_spill] sm:$0xff] }
 0xa85   :  { %7567 = vmatpush1.msra.mxu1 %v14550_v8  ;;  %7744 = vmatprep.subr.bf16.mxu0 %v12541_v22  ;;  %v15991_v22 = vld [vmem:[#allocation82_spill] sm:$0xff]  ;;  %v16013_v63 = vld [vmem:[#allocation108_spill] sm:$0xff] }
 0xa86   :  { %7602 = vmatmul.mubr.f32.vlgmr.msra.gmra.mxu1 %v14609_v27  ;;  %11418 = vmatprep.subr.mxu1 %v15829_v39  ;;  %v15975_v27 = vld [vmem:[#allocation23_spill] sm:$0xff]  ;;  %v16008_v8 = vld [vmem:[#allocation86_spill] sm:$0xff] }
 0xa87   :  { %7745 = vmatpush1.bf16.msra.mxu0 %v12539_v4  ;;  %11419 = vmatpush3.msra.mxu1 %v13595_v20  ;;  %v15992_v4 = vld [vmem:[#allocation51_spill] sm:$0xff] }
 0xa88   :  { %7746 = vmatprep.subr.bf16.mxu0 %v12544_v35  ;;  %11420 = vmatprep.subr.mxu1 %v13600_v21  ;;  %v15993_v35 = vld [vmem:[#allocation85_spill] sm:$0xff] }
 0xa89   :  { %11421 = vmatpush3.msra.mxu1 %v13608_v32 }
 0xa8a   :  { %11422 = vmatprep.subr.mxu1 %v13617_v6 }
 0xa8b   :  { %7747 = vmatpush1.bf16.msra.mxu0 %v12542_v59  ;;  %11423 = vmatpush3.msra.mxu1 %v13629_v43  ;;  %v15994_v59 = vld [vmem:[#allocation54_spill] sm:$0xff] }
 0xa8c   :  { %7748 = vmatprep.subr.bf16.mxu0 %v12547_v23  ;;  %11424 = vmatprep.subr.mxu1 %v13641_v57  ;;  %v15995_v23 = vld [vmem:[#allocation88_spill] sm:$0xff] }
 0xa8d   :  { %11425 = vmatpush3.msra.mxu1 %v13655_v28 }
 0xa8e   :  { %11426 = vmatprep.subr.mxu1 %v13669_v31 }
 0xa8f   :  { %7749 = vmatpush1.bf16.msra.mxu0 %v12545_v54  ;;  %11427 = vmatpush3.msra.mxu1 %v13711_v38  ;;  %v15996_v54 = vld [vmem:[#allocation57_spill] sm:$0xff] }
 0xa90   :  { %7750 = vmatprep.subr.bf16.mxu0 %v12550_v2  ;;  %11428 = vmatprep.subr.mxu1 %v13724_v11  ;;  %v15997_v2 = vld [vmem:[#allocation91_spill] sm:$0xff] }
 0xa91   :  { %11429 = vmatpush3.msra.mxu1 %v13737_v17 }
 0xa92   :  { %11430 = vmatprep.subr.mxu1 %v13751_v41 }
 0xa93   :  { %7751 = vmatpush1.bf16.msra.mxu0 %v12548_v13  ;;  %11431 = vmatpush3.msra.mxu1 %v13766_v46  ;;  %v15998_v13 = vld [vmem:[#allocation60_spill] sm:$0xff] }
 0xa94   :  { %11453 = vmatprep.subr.mxu0 %v15970_v0  ;;  %11432 = vmatprep.subr.mxu1 %v13781_v58 }
 0xa95   :  { %11433 = vmatpush3.msra.mxu1 %v13793_v36 }
 0xa96   :  { %7769 = vmatmul.mubr.bf16.vlgmr.msra.gmra.mxu0 %v12559_v25  ;;  %11434 = vmatprep.subr.mxu1 %v15971_v37  ;;  %v15999_v25 = vld [vmem:[#allocation95_spill] sm:$0xff] }
 0xa97   :  { %7778 = vmatprep.mubr.bf16.mxu0 %v15969_v62  ;;  %11454 = vmatpush3.msra.mxu0 %v15972_v15  ;;  %v15989_v62 = vld [vmem:[#allocation73_spill] sm:$0xff] }
 0xa98   :  { %11455 = vmatprep.subr.mxu0 %v15973_v52  ;;  %11435 = vmatpush3.msra.mxu1 %v15974_v24 }
 0xa99   :  { %11456 = vmatpush3.msra.mxu0 %v15975_v27  ;;  %11436 = vmatprep.subr.mxu1 %v15976_v3 }
 0xa9a   :  { %11457 = vmatprep.subr.mxu0 %v15977_v42  ;;  %11437 = vmatpush3.msra.mxu1 %v15978_v5 }
 0xa9b   :  { %11458 = vmatpush3.msra.mxu0 %v15979_v10  ;;  %11438 = vmatprep.subr.mxu1 %v15980_v12  ;;  %v16019_v10 = vld [vmem:[#allocation3_spill] sm:$0xff] }
 0xa9c   :  { %11459 = vmatprep.subr.mxu0 %v15981_v1  ;;  %11439 = vmatpush3.msra.mxu1 %v15982_v34 }
 0xa9d   :  { %11460 = vmatpush3.msra.mxu0 %v15983_v29  ;;  %11440 = vmatprep.subr.mxu1 %v15984_v33 }
 0xa9e   :  { %7779 = vmatmul.mubr.bf16.gmra.mxu0 %v12560_v50  ;;  %11461 = vmatprep.subr.mxu0 %v15985_v40  ;;  %v16000_v50 = vld [vmem:[#allocation64_spill] sm:$0xff] }
 0xa9f   :  { %11462 = vmatpush3.msra.mxu0 %v15986_v26  ;;  %11441 = vmatpush3.msra.mxu1 %v15987_v55 }
 0xaa0   :  { %11463 = vmatprep.subr.mxu0 %v15988_v16  ;;  %11442 = vmatprep.subr.mxu1 %v15989_v62 }
 0xaa1   :  { %11464 = vmatpush3.msra.mxu0 %v15990_v30  ;;  %11443 = vmatpush3.msra.mxu1 %v15991_v22 }
 0xaa2   :  { %11465 = vmatprep.subr.mxu0 %v15992_v4  ;;  %11444 = vmatprep.subr.mxu1 %v15993_v35 }
 0xaa3   :  { %11466 = vmatpush3.msra.mxu0 %v15994_v59  ;;  %11445 = vmatpush3.msra.mxu1 %v15995_v23 }
 0xaa4   :  { %11467 = vmatprep.subr.mxu0 %v15996_v54  ;;  %11446 = vmatprep.subr.mxu1 %v15997_v2 }
 0xaa5   :  { %11468 = vmatpush3.msra.mxu0 %v15998_v13  ;;  %11447 = vmatpush3.msra.mxu1 %v15999_v25 }
 0xaa6   :  { %11469 = vmatprep.subr.mxu0 %v16000_v50  ;;  %11448 = vmatprep.subr.mxu1 %v16001_v56 }
 0xaa7   :  { %11470 = vmatpush3.msra.mxu0 %v16002_v44  ;;  %11449 = vmatpush3.msra.mxu1 %v16003_v47 }
 0xaa8   :  { %11471 = vmatprep.subr.mxu0 %v16004_v7  ;;  %11488 = vmatprep.subr.mxu1 %v16005_v61  ;;  %v16018_v61 = vld [vmem:[#allocation115_spill] sm:$0xff] }
 0xaa9   :  { %11472 = vmatpush3.msra.mxu0 %v16006_v9 }
 0xaaa   :  { %11473 = vmatprep.subr.mxu0 %v16007_v19 }
 0xaab   :  { %11474 = vmatpush3.msra.mxu0 %v16008_v8 }
 0xaac   :  { %11475 = vmatprep.subr.mxu0 %v16009_v14 }
 0xaad   :  { %11476 = vmatpush3.msra.mxu0 %v16010_v18 }
 0xaae   :  { %11477 = vmatprep.subr.mxu0 %v16011_v45 }
 0xaaf   :  { %11478 = vmatpush3.msra.mxu0 %v16012_v60 }
 0xab0   :  { %11479 = vmatprep.subr.mxu0 %v16013_v63 }
 0xab1   :  { %11480 = vmatpush3.msra.mxu0 %v16014_v51 }
 0xab2   :  { %11481 = vmatprep.subr.mxu0 %v16015_v49 }
 0xab3   :  { %11482 = vmatpush3.msra.mxu0 %v16016_v53 }
 0xab4   :  { %11483 = vmatprep.subr.mxu0 %v16017_v48 }
 0xab5   :  { %11484 = vmatpush3.msra.mxu0 %v16018_v61 }
 0xab6   :  { %11523 = vmatprep.subr.mxu0 %v15829_v39 }
 0xb1d   :  { %v7033_v9 = vpop.f32.mrf.mxu0 }
 0xb1f   :  { %v7035_v51 = vpop.f32.mrf.mxu0 }
 0xb25   :  { %v6698_v14 = vpop.f32.mrf.mxu1 }
 0xb27   :  { %v6700_v18 = vpop.f32.mrf.mxu1 }
 0xb29   :  { %v6790_v8 = vpop.f32.mrf.mxu1 }
 0xb2a   :  { %v6791_v45 = vadd.f32 %v6790_v8, %v6698_v14  ;;  %v7192_v50 = vpop.f32.mrf.mxu0 }
 0xb2b   :  { %v6792_v19 = vpop.f32.mrf.mxu1 }
 0xb2c   :  { %v6793_v60 = vadd.f32 %v6792_v19, %v6700_v18  ;;  %v7194_v48 = vpop.f32.mrf.mxu0 }
 0xb2f   :  { %v6871_v63 = vpop.f32.mrf.mxu1 }
 0xb30   :  { %v6872_v7 = vadd.f32 %v6871_v63, %v6791_v45  ;;  %v7365_v26 = vpop.f32.mrf.mxu0 }
 0xb31   :  { %v6873_v44 = vpop.f32.mrf.mxu1 }
 0xb32   :  { %v6874_v49 = vadd.f32 %v6873_v44, %v6793_v60  ;;  %v7367_v19 = vpop.f32.mrf.mxu0 }
 0xb35   :  { %v6949_v53 = vpop.f32.mrf.mxu1 }
 0xb36   :  { %v6950_v13 = vadd.f32 %v6949_v53, %v6872_v7  ;;  %v7527_v44 = vpop.f32.mrf.mxu0 }
 0xb37   :  { %v6951_v54 = vpop.f32.mrf.mxu1 }
 0xb38   :  { %v6952_v61 = vadd.f32 %v6951_v54, %v6874_v49  ;;  %v7034_v59 = vadd.f32 %v7033_v9, %v6950_v13 }
 0xb39   :  { %v7109_v4 = vpop.f32.mrf.mxu1 }
 0xb3a   :  { %v7110_v30 = vadd.f32 %v7109_v4, %v7034_v59  ;;  %v7036_v16 = vadd.f32 %v7035_v51, %v6952_v61  ;;  %v7529_v51 = vpop.f32.mrf.mxu0 }
 0xb3b   :  { %v7111_v14 = vpop.f32.mrf.mxu1 }
 0xb3c   :  { %v7112_v8 = vadd.f32 %v7111_v14, %v7036_v16  ;;  %v7611_v49 = vrot.slane %v7110_v30, %v16019_v10 }
 0xb3e   :  { %v7284_v18 = vpop.f32.mrf.mxu1  ;;  %v7615_v61 = vrot.slane %v7112_v8, %v16019_v10 }
 0xb3f   :  { %v7285_v40 = vadd.f32 %v7284_v18, %v7192_v50  ;;  %v16020_v50 = vld [vmem:[#allocation116_spill] sm:$0xff] }
 0xb40   :  { %v7286_v63 = vpop.f32.mrf.mxu1  ;;  %v7616_v14 = vmul.f32 %v7611_v49, %v16020_v50 }
 0xb41   :  { %v7287_v45 = vadd.f32 %v7286_v63, %v7194_v48  ;;  %v7366_v29 = vadd.f32 %v7365_v26, %v7285_v40  ;;  %v16021_v48 = vld [vmem:[#allocation118_spill] sm:$0xff]  ;;  %v16022_v26 = vld [vmem:[#allocation120_spill] sm:$0xff] }
 0xb42   :  { %v7443_v60 = vpop.f32.mrf.mxu1  ;;  %v7618_v40 = vmul.f32 %v7611_v49, %v16021_v48  ;;  %v7620_v18 = vmul.f32 %v7611_v49, %v16022_v26 }
 0xb43   :  { %v7444_v1 = vadd.f32 %v7443_v60, %v7366_v29  ;;  %v7368_v53 = vadd.f32 %v7367_v19, %v7287_v45  ;;  %v16023_v29 = vld [vmem:[#allocation122_spill] sm:$0xff]  ;;  %v16024_v45 = vld [vmem:[#allocation117_spill] sm:$0xff] }
 0xb44   :  { %v7445_v7 = vpop.f32.mrf.mxu1  ;;  %v7622_v19 = vmul.f32 %v7611_v49, %v16023_v29 }
 0xb45   :  { %v7446_v9 = vadd.f32 %v7445_v7, %v7368_v53  ;;  %v7528_v54 = vadd.f32 %v7527_v44, %v7444_v1  ;;  %v7617_v1 = vmul.f32 %v7615_v61, %v16024_v45  ;;  %v16029_v7 = vld [vmem:[#allocation119_spill] sm:$0xff] }
 0xb46   :  { %v7603_v4 = vpop.f32.mrf.mxu1 }
 0xb47   :  { %v7604_v16 = vadd.f32 %v7603_v4, %v7528_v54  ;;  %v7530_v59 = vadd.f32 %v7529_v51, %v7446_v9  ;;  %v7619_v9 = vmul.f32 %v7615_v61, %v16029_v7  ;;  %v16030_v54 = vld [vmem:[#allocation121_spill] sm:$0xff]  ;;  %v16031_v51 = vld [vmem:[#allocation123_spill] sm:$0xff] }
 0xb48   :  { %v7605_v13 = vpop.f32.mrf.mxu1  ;;  %v7621_v4 = vmul.f32 %v7615_v61, %v16030_v54  ;;  %v7623_v50 = vmul.f32 %v7615_v61, %v16031_v51 }
 0xb49   :  { %v7627_v63 = vrot.slane %v7604_v16, %v16019_v10  ;;  %v7606_v30 = vadd.f32 %v7605_v13, %v7530_v59 }
 0xb4b   :  { %v14809_v60 = vadd.f32 %v7627_v63, %v7616_v14  ;;  %v14811_v44 = vadd.f32 %v7627_v63, %v7618_v40  ;;  %v14813_v8 = vadd.f32 %v7627_v63, %v7620_v18  ;;  %v14815_v53 = vadd.f32 %v7627_v63, %v7622_v19 }
 0xb4c   :  { %v7631_v49 = vrot.slane %v7606_v30, %v16019_v10  ;;  %v16058_v10 = vld [vmem:[#allocation44_spill] sm:$0xff] }
 0xb4d   :  { %16025 = vst [vmem:[#allocation6_spill] sm:$0xff] %v14809_v60  ;;  %16026 = vst [vmem:[#allocation41_spill] sm:$0xff] %v14811_v44 }
 0xb4e   :  { %16027 = vst [vmem:[#allocation17_spill] sm:$0xff] %v14813_v8  ;;  %16028 = vst [vmem:[#allocation20_spill] sm:$0xff] %v14815_v53  ;;  %v14821_v16 = vadd.f32 %v7631_v49, %v7617_v1  ;;  %v14823_v59 = vadd.f32 %v7631_v49, %v7619_v9  ;;  %v14825_v13 = vadd.f32 %v7631_v49, %v7621_v4 }
 0xb4f   :  { %v14827_v14 = vadd.f32 %v7631_v49, %v7623_v50 }
 0xb50   :  { %16032 = vst [vmem:[#allocation50_spill] sm:$0xff] %v14821_v16  ;;  %16033 = vst [vmem:[#allocation23_spill] sm:$0xff] %v14823_v59 }
 0xb51   :  { %16034 = vst [vmem:[#allocation53_spill] sm:$0xff] %v14825_v13  ;;  %16035 = vst [vmem:[#allocation25_spill] sm:$0xff] %v14827_v14 }
 0xb56   :  { %v14829_v48 = vpop.f32.mrf.mxu0 }
 0xb57   :  { %16036 = vst [vmem:[#allocation56_spill] sm:$0xff] %v14829_v48 }
 0xb58   :  { %v14831_v40 = vpop.f32.mrf.mxu0 }
 0xb59   :  { %16037 = vst [vmem:[#allocation59_spill] sm:$0xff] %v14831_v40 }
 0xb5a   :  { %v14833_v26 = vpop.f32.mrf.mxu0 }
 0xb5b   :  { %16038 = vst [vmem:[#allocation63_spill] sm:$0xff] %v14833_v26  ;;  %v7791_v61 = vadd.f32 %v14833_v26, %v14829_v48 }
 0xb5c   :  { %v14835_v18 = vpop.f32.mrf.mxu0 }
 0xb5d   :  { %16039 = vst [vmem:[#allocation67_spill] sm:$0xff] %v14835_v18  ;;  %v7800_v63 = vadd.f32 %v14835_v18, %v14831_v40 }
 0xb5e   :  { %v14837_v29 = vpop.f32.mrf.mxu0 }
 0xb5f   :  { %16040 = vst [vmem:[#allocation70_spill] sm:$0xff] %v14837_v29  ;;  %v7792_v30 = vadd.f32 %v7791_v61, %v14837_v29 }
 0xb60   :  { %v14841_v19 = vpop.f32.mrf.mxu0 }
 0xb61   :  { %16041 = vst [vmem:[#allocation73_spill] sm:$0xff] %v14841_v19  ;;  %v7801_v1 = vadd.f32 %v7800_v63, %v14841_v19 }
 0xb62   :  { %v14846_v45 = vpop.f32.mrf.mxu0 }
 0xb63   :  { %16042 = vst [vmem:[#allocation82_spill] sm:$0xff] %v14846_v45  ;;  %v7793_v7 = vadd.f32 %v7792_v30, %v14846_v45 }
 0xb64   :  { %v14850_v9 = vpop.f32.mrf.mxu0 }
 0xb65   :  { %16043 = vst [vmem:[#allocation85_spill] sm:$0xff] %v14850_v9  ;;  %v7794_v54 = vrot.slane %v7793_v7, 4  ;;  %v7802_v4 = vadd.f32 %v7801_v1, %v14850_v9 }
 0xb67   :  { %v7795_v51 = vadd.f32 %v7794_v54, %v7793_v7  ;;  %v7803_v50 = vrot.slane %v7802_v4, 4  ;;  %v16045_v54 = vld [vmem:[#allocation8_spill] sm:$0xff] }
 0xb69   :  { %v7796_v49 = vrot.slane %v7795_v51, 2  ;;  %v7804_v14 = vadd.f32 %v7803_v50, %v7802_v4  ;;  %v16046_v4 = vld [vmem:[#allocation10_spill] sm:$0xff] }
 0xb6a   :  { %v16048_v50 = vld [vmem:[#allocation14_spill] sm:$0xff] }
 0xb6b   :  { %v7797_v13 = vadd.f32 %v7796_v49, %v7795_v51  ;;  %v7805_v59 = vrot.slane %v7804_v14, 2  ;;  %v16047_v51 = vld [vmem:[#allocation12_spill] sm:$0xff] }
 0xb6c   :  { %v16049_v49 = vld [vmem:[#allocation16_spill] sm:$0xff] }
 0xb6d   :  { %v7798_v16 = vrot.slane %v7797_v13, 1  ;;  %v7806_v53 = vadd.f32 %v7805_v59, %v7804_v14  ;;  %v16044_v14 = vld [vmem:[#allocation7_spill] sm:$0xff] }
 0xb6f   :  { %v7799_v61 = vadd.f32 %v7798_v16, %v7797_v13  ;;  %v7807_v8 = vrot.slane %v7806_v53, 1 }
 0xb71   :  { %v14853_v44 = vand.u32 4294901760, %v7799_v61  ;;  %v7808_v63 = vadd.f32 %v7807_v8, %v7806_v53 }
 0xb73   :  { %v14856_v30 = vsub.f32 %v7799_v61, %v14853_v44  ;;  %v14858_v60 = vand.u32 4294901760, %v7808_v63  ;;  %v16050_v61 = vld [vmem:[#allocation19_spill] sm:$0xff] }
 0xb75   :  { %8172 = vmatprep.mubr.f32.mxu0 %v14858_v60  ;;  %v7932_v1 = vsub.f32 %v7808_v63, %v14858_v60  ;;  %v15673_v7 = vand.u32 4294901760, %v14856_v30  ;;  %v16051_v63 = vld [vmem:[#allocation22_spill] sm:$0xff] }
 0xb76   :  { %8174 = vmatmul.mubr.f32.vlgmr.msra.gmra.mxu0 %v14853_v44 }
 0xb77   :  { %11524 = vmatpush3.msra.mxu0 %v13595_v20  ;;  %v7933_v16 = vand.u32 4294901760, %v7932_v1  ;;  %v7940_v8 = vsub.f32 %v14856_v30, %v15673_v7  ;;  %v7812_v7 = vmul.f32 %v14835_v18, %v14835_v18  ;;  %v16061_v18 = vld [vmem:[#allocation58_spill] sm:$0xff] }
 0xb78   :  { %11525 = vmatprep.subr.mxu0 %v13600_v21 }
 0xb79   :  { %11526 = vmatpush3.msra.mxu0 %v13608_v32  ;;  %8416 = vmatprep.mubr.f32.mxu0 %v7933_v16  ;;  %v7934_v53 = vsub.f32 %v7932_v1, %v7933_v16  ;;  %v7941_v13 = vand.u32 4294901760, %v7940_v8  ;;  %v16053_v16 = vld [vmem:[#allocation30_spill] sm:$0xff]  ;;  %v16054_v8 = vld [vmem:[#allocation33_spill] sm:$0xff] }
 0xb7a   :  { %11527 = vmatprep.subr.mxu0 %v13617_v6 }
 0xb7b   :  { %11528 = vmatpush3.msra.mxu0 %v13629_v43  ;;  %v7935_v59 = vand.u32 4294901760, %v7934_v53  ;;  %v16055_v53 = vld [vmem:[#allocation36_spill] sm:$0xff] }
 0xb7c   :  { %11529 = vmatprep.subr.mxu0 %v13641_v57 }
 0xb7d   :  { %11530 = vmatpush3.msra.mxu0 %v13655_v28  ;;  %7936 = vmatprep.mubr.f32.mxu1 %v7935_v59  ;;  %v16056_v59 = vld [vmem:[#allocation38_spill] sm:$0xff] }
 0xb7e   :  { %11531 = vmatprep.subr.mxu0 %v13669_v31  ;;  %7942 = vmatmul.mubr.f32.vlgmr.msra.gmra.mxu1 %v7941_v13  ;;  %v16057_v13 = vld [vmem:[#allocation40_spill] sm:$0xff] }
 0xb7f   :  { %11489 = vmatpush3.msra.mxu1 %v16044_v14  ;;  %11532 = vmatpush3.msra.mxu0 %v13711_v38 }
 0xb80   :  { %11490 = vmatprep.subr.mxu1 %v16045_v54  ;;  %8309 = vmatprep.mubr.f32.mxu1 %v7932_v1  ;;  %v16052_v1 = vld [vmem:[#allocation28_spill] sm:$0xff] }
 0xb81   :  { %11533 = vmatprep.subr.mxu0 %v13724_v11  ;;  %11491 = vmatpush3.msra.mxu1 %v16046_v4 }
 0xb82   :  { %11534 = vmatpush3.msra.mxu0 %v13737_v17  ;;  %11492 = vmatprep.subr.mxu1 %v16047_v51 }
 0xb83   :  { %11535 = vmatprep.subr.mxu0 %v13751_v41  ;;  %11493 = vmatpush3.msra.mxu1 %v16048_v50 }
 0xb84   :  { %11536 = vmatpush3.msra.mxu0 %v13766_v46  ;;  %11494 = vmatprep.subr.mxu1 %v16049_v49 }
 0xb85   :  { %11537 = vmatprep.subr.mxu0 %v13781_v58  ;;  %11495 = vmatpush3.msra.mxu1 %v16050_v61 }
 0xb86   :  { %11538 = vmatpush3.msra.mxu0 %v13793_v36  ;;  %11496 = vmatprep.subr.mxu1 %v16051_v63 }
 0xb87   :  { %11539 = vmatprep.subr.mxu0 %v15971_v37  ;;  %11497 = vmatpush3.msra.mxu1 %v16052_v1 }
 0xb88   :  { %11540 = vmatpush3.msra.mxu0 %v15974_v24  ;;  %11498 = vmatprep.subr.mxu1 %v16053_v16 }
 0xb89   :  { %11541 = vmatprep.subr.mxu0 %v15976_v3  ;;  %11499 = vmatpush3.msra.mxu1 %v16054_v8  ;;  %v16059_v8 = vld [vmem:[#allocation47_spill] sm:$0xff] }
 0xb8a   :  { %11542 = vmatpush3.msra.mxu0 %v15978_v5  ;;  %11500 = vmatprep.subr.mxu1 %v16055_v53  ;;  %v7810_v53 = vmul.f32 %v14831_v40, %v14831_v40  ;;  %v16063_v40 = vld [vmem:[#allocation66_spill] sm:$0xff] }
 0xb8b   :  { %11543 = vmatprep.subr.mxu0 %v15980_v12  ;;  %11501 = vmatpush3.msra.mxu1 %v16056_v59  ;;  %v7814_v59 = vmul.f32 %v14841_v19, %v14841_v19 }
 0xb8c   :  { %11544 = vmatpush3.msra.mxu0 %v15982_v34  ;;  %11502 = vmatprep.subr.mxu1 %v16057_v13  ;;  %v16060_v13 = vld [vmem:[#allocation55_spill] sm:$0xff]  ;;  %v7826_v16 = vadd.f32 %v7812_v7, %v7810_v53  ;;  %v16066_v53 = vld [vmem:[#allocation76_spill] sm:$0xff] }
 0xb8d   :  { %11545 = vmatprep.subr.mxu0 %v15984_v33  ;;  %11503 = vmatpush3.msra.mxu1 %v16058_v10  ;;  %v7816_v10 = vmul.f32 %v14850_v9, %v14850_v9  ;;  %v16067_v9 = vld [vmem:[#allocation79_spill] sm:$0xff] }
 0xb8e   :  { %11546 = vmatpush3.msra.mxu0 %v15987_v55  ;;  %11504 = vmatprep.subr.mxu1 %v16059_v8  ;;  %v16062_v8 = vld [vmem:[#allocation62_spill] sm:$0xff]  ;;  %v7827_v19 = vadd.f32 %v7826_v16, %v7814_v59  ;;  %v16069_v16 = vld [vmem:[#allocation87_spill] sm:$0xff] }
 0xb8f   :  { %11547 = vmatprep.subr.mxu0 %v15989_v62  ;;  %11505 = vmatpush3.msra.mxu1 %v16060_v13  ;;  %v16064_v13 = vld [vmem:[#allocation69_spill] sm:$0xff] }
 0xb90   :  { %11548 = vmatpush3.msra.mxu0 %v15991_v22  ;;  %11506 = vmatprep.subr.mxu1 %v16061_v18  ;;  %v16065_v18 = vld [vmem:[#allocation72_spill] sm:$0xff]  ;;  %v7828_v7 = vadd.f32 %v7827_v19, %v7816_v10  ;;  %v16070_v10 = vld [vmem:[#allocation90_spill] sm:$0xff] }
 0xb91   :  { %11549 = vmatprep.subr.mxu0 %v15993_v35  ;;  %11507 = vmatpush3.msra.mxu1 %v16062_v8  ;;  %v16071_v19 = vld [vmem:[#allocation94_spill] sm:$0xff] }
 0xb92   :  { %11550 = vmatpush3.msra.mxu0 %v15995_v23  ;;  %11508 = vmatprep.subr.mxu1 %v16063_v40  ;;  %v16068_v40 = vand.u32 4294901760, %v14856_v30  ;;  %v7829_v59 = vrot.slane %v7828_v7, 4 }
 0xb93   :  { %11551 = vmatprep.subr.mxu0 %v15997_v2  ;;  %11509 = vmatpush3.msra.mxu1 %v16064_v13 }
 0xb94   :  { %11552 = vmatpush3.msra.mxu0 %v15999_v25  ;;  %11510 = vmatprep.subr.mxu1 %v16065_v18  ;;  %v16077_v18 = vld [vmem:[#allocation9_spill] sm:$0xff] }
 0xb95   :  { %11553 = vmatprep.subr.mxu0 %v16001_v56  ;;  %11511 = vmatpush3.msra.mxu1 %v16066_v53  ;;  %v16074_v53 = vld [vmem:[#allocation104_spill] sm:$0xff] }
 0xb96   :  { %11554 = vmatpush3.msra.mxu0 %v16003_v47  ;;  %11512 = vmatprep.subr.mxu1 %v16067_v9  ;;  %v16072_v9 = vld [vmem:[#allocation98_spill] sm:$0xff] }
 0xb97   :  { %8420 = vmatmul.mubr.f32.vlgmr.msra.gmra.mxu0 %v16068_v40  ;;  %11593 = vmatprep.subr.mxu0 %v15829_v39  ;;  %v16073_v40 = vld [vmem:[#allocation101_spill] sm:$0xff] }
 0xb98   :  { %11513 = vmatpush3.msra.mxu1 %v16069_v16  ;;  %11594 = vmatpush3.msra.mxu0 %v13595_v20  ;;  %v7830_v16 = vadd.f32 %v7829_v59, %v7828_v7  ;;  %v16078_v7 = vld [vmem:[#allocation11_spill] sm:$0xff]  ;;  %v16079_v59 = vld [vmem:[#allocation13_spill] sm:$0xff] }
 0xb99   :  { %8690 = vmatprep.mubr.f32.mxu0 %v14858_v60  ;;  %11514 = vmatprep.subr.mxu1 %v16070_v10  ;;  %v16075_v10 = vld [vmem:[#allocation107_spill] sm:$0xff] }
 0xb9a   :  { %11595 = vmatprep.subr.mxu0 %v13600_v21  ;;  %11515 = vmatpush3.msra.mxu1 %v16071_v19  ;;  %v16076_v19 = vld [vmem:[#allocation5_spill] sm:$0xff] }
 0xb9b   :  { %11596 = vmatpush3.msra.mxu0 %v13608_v32  ;;  %11516 = vmatprep.subr.mxu1 %v16072_v9  ;;  %v7831_v9 = vrot.slane %v7830_v16, 2 }
 0xb9c   :  { %11597 = vmatprep.subr.mxu0 %v13617_v6  ;;  %11517 = vmatpush3.msra.mxu1 %v16073_v40 }
 0xb9d   :  { %11598 = vmatpush3.msra.mxu0 %v13629_v43  ;;  %11518 = vmatprep.subr.mxu1 %v16074_v53 }
 0xb9e   :  { %11599 = vmatprep.subr.mxu0 %v13641_v57  ;;  %11519 = vmatpush3.msra.mxu1 %v16075_v10  ;;  %v16081_v10 = vld [vmem:[#allocation18_spill] sm:$0xff] }
 0xb9f   :  { %11600 = vmatpush3.msra.mxu0 %v13655_v28  ;;  %8312 = vmatmul.mubr.f32.vlgmr.msra.gmra.mxu1 %v14856_v30  ;;  %v16080_v30 = vld [vmem:[#allocation15_spill] sm:$0xff] }
 0xba0   :  { %11558 = vmatprep.subr.mxu1 %v16076_v19  ;;  %11601 = vmatprep.subr.mxu0 %v13669_v31  ;;  %v7832_v19 = vadd.f32 %v7831_v9, %v7830_v16  ;;  %v16086_v16 = vld [vmem:[#allocation35_spill] sm:$0xff] }
 0xba1   :  { %11559 = vmatpush3.msra.mxu1 %v16077_v18  ;;  %8586 = vmatprep.mubr.f32.mxu1 %v14858_v60  ;;  %v16082_v60 = vld [vmem:[#allocation21_spill] sm:$0xff]  ;;  %v16090_v18 = vld [vmem:[#allocation46_spill] sm:$0xff] }
 0xba2   :  { %11602 = vmatpush3.msra.mxu0 %v13711_v38  ;;  %11560 = vmatprep.subr.mxu1 %v16078_v7  ;;  %v16083_v7 = vld [vmem:[#allocation24_spill] sm:$0xff]  ;;  %v7833_v9 = vrot.slane %v7832_v19, 1 }
 0xba3   :  { %11603 = vmatprep.subr.mxu0 %v13724_v11  ;;  %11561 = vmatpush3.msra.mxu1 %v16079_v59  ;;  %v16084_v59 = vld [vmem:[#allocation26_spill] sm:$0xff] }
 0xba4   :  { %11604 = vmatpush3.msra.mxu0 %v13737_v17  ;;  %11562 = vmatprep.subr.mxu1 %v16080_v30  ;;  %v16085_v30 = vld [vmem:[#allocation32_spill] sm:$0xff] }
 0xba5   :  { %11605 = vmatprep.subr.mxu0 %v13751_v41  ;;  %11563 = vmatpush3.msra.mxu1 %v16081_v10  ;;  %v16089_v10 = vld [vmem:[#allocation43_spill] sm:$0xff] }
 0xba6   :  { %11606 = vmatpush3.msra.mxu0 %v13766_v46  ;;  %11564 = vmatprep.subr.mxu1 %v16082_v60  ;;  %v16087_v60 = vld [vmem:[#allocation37_spill] sm:$0xff] }
 0xba7   :  { %11607 = vmatprep.subr.mxu0 %v13781_v58  ;;  %11565 = vmatpush3.msra.mxu1 %v16083_v7  ;;  %v16088_v7 = vld [vmem:[#allocation39_spill] sm:$0xff] }
 0xba8   :  { %11608 = vmatpush3.msra.mxu0 %v13793_v36  ;;  %11566 = vmatprep.subr.mxu1 %v16084_v59  ;;  %v7811_v59 = vmul.f32 %v14833_v26, %v14833_v26  ;;  %v16092_v26 = vld [vmem:[#allocation52_spill] sm:$0xff] }
 0xba9   :  { %11609 = vmatprep.subr.mxu0 %v15971_v37  ;;  %11567 = vmatpush3.msra.mxu1 %v16085_v30  ;;  %v7834_v30 = vadd.f32 %v7833_v9, %v7832_v19  ;;  %v7815_v19 = vmul.f32 %v14846_v45, %v14846_v45  ;;  %v16093_v9 = vld [vmem:[#allocation61_spill] sm:$0xff]  ;;  %v16097_v45 = vld [vmem:[#allocation75_spill] sm:$0xff] }
 0xbaa   :  { %11610 = vmatpush3.msra.mxu0 %v15974_v24  ;;  %11568 = vmatprep.subr.mxu1 %v16086_v16  ;;  %v7809_v16 = vmul.f32 %v14829_v48, %v14829_v48 }
 0xbab   :  { %11611 = vmatprep.subr.mxu0 %v15976_v3  ;;  %11569 = vmatpush3.msra.mxu1 %v16087_v60  ;;  %v7813_v60 = vmul.f32 %v14837_v29, %v14837_v29  ;;  %v14993_v48 = vand.u32 4294901760, %v7834_v30  ;;  %v16094_v29 = vld [vmem:[#allocation65_spill] sm:$0xff] }
 0xbac   :  { %11612 = vmatpush3.msra.mxu0 %v15978_v5  ;;  %11570 = vmatprep.subr.mxu1 %v16088_v7  ;;  %v16091_v7 = vld [vmem:[#allocation49_spill] sm:$0xff] }
 0xbad   :  { %11613 = vmatprep.subr.mxu0 %v15980_v12  ;;  %11571 = vmatpush3.msra.mxu1 %v16089_v10  ;;  %v7817_v10 = vadd.f32 %v7811_v59, %v7809_v16  ;;  %v16096_v59 = vld [vmem:[#allocation71_spill] sm:$0xff] }
 0xbae   :  { %11614 = vmatpush3.msra.mxu0 %v15982_v34  ;;  %11572 = vmatprep.subr.mxu1 %v16090_v18 }
 0xbaf   :  { %11615 = vmatprep.subr.mxu0 %v15984_v33  ;;  %11573 = vmatpush3.msra.mxu1 %v16091_v7  ;;  %v7818_v18 = vadd.f32 %v7817_v10, %v7813_v60  ;;  %v16095_v7 = vld [vmem:[#allocation68_spill] sm:$0xff]  ;;  %v16099_v10 = vld [vmem:[#allocation81_spill] sm:$0xff] }
 0xbb0   :  { %11616 = vmatpush3.msra.mxu0 %v15987_v55  ;;  %11574 = vmatprep.subr.mxu1 %v16092_v26  ;;  %v16100_v60 = vld [vmem:[#allocation84_spill] sm:$0xff] }
 0xbb1   :  { %11617 = vmatprep.subr.mxu0 %v15989_v62  ;;  %11575 = vmatpush3.msra.mxu1 %v16093_v9  ;;  %v7819_v16 = vadd.f32 %v7818_v18, %v7815_v19  ;;  %v15004_v9 = vsub.f32 %v7834_v30, %v14993_v48  ;;  %v16101_v19 = vld [vmem:[#allocation93_spill] sm:$0xff] }
 0xbb2   :  { %11618 = vmatpush3.msra.mxu0 %v15991_v22  ;;  %11576 = vmatprep.subr.mxu1 %v16094_v29  ;;  %v16098_v29 = vld [vmem:[#allocation78_spill] sm:$0xff] }
 0xbb3   :  { %11619 = vmatprep.subr.mxu0 %v15993_v35  ;;  %11577 = vmatpush3.msra.mxu1 %v16095_v7  ;;  %v7820_v18 = vrot.slane %v7819_v16, 4  ;;  %v15683_v30 = vand.u32 4294901760, %v15004_v9 }
 0xbb4   :  { %11620 = vmatpush3.msra.mxu0 %v15995_v23  ;;  %11578 = vmatprep.subr.mxu1 %v16096_v59 }
 0xbb5   :  { %11621 = vmatprep.subr.mxu0 %v15997_v2  ;;  %11579 = vmatpush3.msra.mxu1 %v16097_v45  ;;  %v16104_v45 = vld [vmem:[#allocation103_spill] sm:$0xff] }
 0xbb6   :  { %11622 = vmatpush3.msra.mxu0 %v15999_v25  ;;  %11580 = vmatprep.subr.mxu1 %v16098_v29  ;;  %v16102_v29 = vld [vmem:[#allocation97_spill] sm:$0xff] }
 0xbb7   :  { %11623 = vmatprep.subr.mxu0 %v16001_v56  ;;  %11581 = vmatpush3.msra.mxu1 %v16099_v10  ;;  %v16103_v10 = vld [vmem:[#allocation100_spill] sm:$0xff] }
 0xbb8   :  { %11624 = vmatpush3.msra.mxu0 %v16003_v47  ;;  %11582 = vmatprep.subr.mxu1 %v16100_v60  ;;  %v7821_v60 = vadd.f32 %v7820_v18, %v7819_v16 }
 0xbb9   :  { %8692 = vmatmul.mubr.f32.vlgmr.msra.gmra.mxu0 %v14853_v44  ;;  %11663 = vmatprep.subr.mxu0 %v15970_v0  ;;  %v8796_v0 = vsub.f32 %v15004_v9, %v15683_v30  ;;  %v16111_v30 = vld [vmem:[#allocation34_spill] sm:$0xff] }
 0xbba   :  { %11583 = vmatpush3.msra.mxu1 %v16101_v19  ;;  %11664 = vmatpush3.msra.mxu0 %v15972_v15  ;;  %v16105_v15 = vld [vmem:[#allocation106_spill] sm:$0xff]  ;;  %v16106_v19 = vld [vmem:[#allocation27_spill] sm:$0xff]  ;;  %v7822_v16 = vrot.slane %v7821_v60, 2 }
 0xbbb   :  { %9034 = vmatprep.mubr.f32.mxu0 %v14993_v48  ;;  %11584 = vmatprep.subr.mxu1 %v16102_v29  ;;  %v16107_v29 = vld [vmem:[#allocation109_spill] sm:$0xff]  ;;  %v8797_v18 = vand.u32 4294901760, %v8796_v0 }
 0xbbc   :  { %11665 = vmatprep.subr.mxu0 %v15973_v52  ;;  %11585 = vmatpush3.msra.mxu1 %v16103_v10  ;;  %v16108_v52 = vld [vmem:[#allocation29_spill] sm:$0xff]  ;;  %v16109_v10 = vld [vmem:[#allocation111_spill] sm:$0xff] }
 0xbbd   :  { %11666 = vmatpush3.msra.mxu0 %v15975_v27  ;;  %11586 = vmatprep.subr.mxu1 %v16104_v45  ;;  %v16110_v27 = vld [vmem:[#allocation31_spill] sm:$0xff]  ;;  %v16117_v0 = vld [vmem:[#allocation57_spill] sm:$0xff] }
 0xbbe   :  { %11667 = vmatprep.subr.mxu0 %v15977_v42  ;;  %11587 = vmatpush3.msra.mxu1 %v16105_v15  ;;  %v16112_v42 = vld [vmem:[#allocation42_spill] sm:$0xff] }
 0xbbf   :  { %11668 = vmatpush3.msra.mxu0 %v16106_v19  ;;  %11588 = vmatprep.subr.mxu1 %v16107_v29  ;;  %v7823_v19 = vadd.f32 %v7822_v16, %v7821_v60  ;;  %v16118_v16 = vld [vmem:[#allocation60_spill] sm:$0xff] }
 0xbc0   :  { %11669 = vmatprep.subr.mxu0 %v16108_v52  ;;  %11589 = vmatpush3.msra.mxu1 %v16109_v10  ;;  %v16113_v52 = vld [vmem:[#allocation45_spill] sm:$0xff] }
 0xbc1   :  { %11670 = vmatpush3.msra.mxu0 %v16110_v27  ;;  %8588 = vmatmul.mubr.f32.vlgmr.msra.gmra.mxu1 %v14853_v44  ;;  %v16114_v27 = vld [vmem:[#allocation48_spill] sm:$0xff]  ;;  %v16115_v44 = vld [vmem:[#allocation51_spill] sm:$0xff]  ;;  %v7824_v60 = vrot.slane %v7823_v19, 1 }
 0xbc2   :  { %11628 = vmatprep.subr.mxu1 %v15829_v39  ;;  %11671 = vmatprep.subr.mxu0 %v16111_v30  ;;  %v16116_v30 = vld [vmem:[#allocation54_spill] sm:$0xff] }
 0xbc3   :  { %11629 = vmatpush3.msra.mxu1 %v13595_v20  ;;  %8798 = vmatprep.mubr.f32.mxu1 %v8797_v18  ;;  %v16119_v18 = vld [vmem:[#allocation64_spill] sm:$0xff] }
 0xbc4   :  { %11672 = vmatpush3.msra.mxu0 %v16112_v42  ;;  %11630 = vmatprep.subr.mxu1 %v13600_v21  ;;  %v16120_v42 = vld [vmem:[#allocation74_spill] sm:$0xff] }
 0xbc5   :  { %11673 = vmatprep.subr.mxu0 %v16113_v52  ;;  %11631 = vmatpush3.msra.mxu1 %v13608_v32  ;;  %v16121_v52 = vld [vmem:[#allocation77_spill] sm:$0xff] }
 0xbc6   :  { %11674 = vmatpush3.msra.mxu0 %v16114_v27  ;;  %11632 = vmatprep.subr.mxu1 %v13617_v6  ;;  %v7825_v27 = vadd.f32 %v7824_v60, %v7823_v19  ;;  %v16127_v19 = vld [vmem:[#allocation96_spill] sm:$0xff]  ;;  %v16128_v60 = vld [vmem:[#allocation105_spill] sm:$0xff] }
 0xbc7   :  { %11675 = vmatprep.subr.mxu0 %v16115_v44  ;;  %11633 = vmatpush3.msra.mxu1 %v13629_v43  ;;  %v16122_v44 = vld [vmem:[#allocation80_spill] sm:$0xff] }
 0xbc8   :  { %11676 = vmatpush3.msra.mxu0 %v16116_v30  ;;  %11634 = vmatprep.subr.mxu1 %v13641_v57  ;;  %v16123_v30 = vld [vmem:[#allocation83_spill] sm:$0xff] }
 0xbc9   :  { %11677 = vmatprep.subr.mxu0 %v16117_v0  ;;  %11635 = vmatpush3.msra.mxu1 %v13655_v28  ;;  %v16124_v0 = vld [vmem:[#allocation86_spill] sm:$0xff] }
 0xbca   :  { %11678 = vmatpush3.msra.mxu0 %v16118_v16  ;;  %11636 = vmatprep.subr.mxu1 %v13669_v31  ;;  %v16125_v16 = vld [vmem:[#allocation89_spill] sm:$0xff] }
 0xbcb   :  { %11679 = vmatprep.subr.mxu0 %v16119_v18  ;;  %11637 = vmatpush3.msra.mxu1 %v13711_v38  ;;  %v15065_v18 = vand.u32 4294901760, %v7825_v27 }
 0xbcc   :  { %11680 = vmatpush3.msra.mxu0 %v16120_v42  ;;  %11638 = vmatprep.subr.mxu1 %v13724_v11  ;;  %v16126_v42 = vld [vmem:[#allocation92_spill] sm:$0xff] }
 0xbcd   :  { %11681 = vmatprep.subr.mxu0 %v16121_v52  ;;  %11639 = vmatpush3.msra.mxu1 %v13737_v17  ;;  %v16129_v52 = vld [vmem:[#allocation108_spill] sm:$0xff] }
 0xbce   :  { %11682 = vmatpush3.msra.mxu0 %v16122_v44  ;;  %11640 = vmatprep.subr.mxu1 %v13751_v41  ;;  %v15076_v44 = vsub.f32 %v7825_v27, %v15065_v18  ;;  %v16134_v27 = vld [vmem:[#allocation115_spill] sm:$0xff] }
 0xbcf   :  { %11683 = vmatprep.subr.mxu0 %v16123_v30  ;;  %11641 = vmatpush3.msra.mxu1 %v13766_v46  ;;  %v16130_v30 = vld [vmem:[#allocation110_spill] sm:$0xff] }
 0xbd0   :  { %11684 = vmatpush3.msra.mxu0 %v16124_v0  ;;  %11642 = vmatprep.subr.mxu1 %v13781_v58  ;;  %v16131_v0 = vld [vmem:[#allocation112_spill] sm:$0xff] }
 0xbd1   :  { %11685 = vmatprep.subr.mxu0 %v16125_v16  ;;  %11643 = vmatpush3.msra.mxu1 %v13793_v36  ;;  %v16132_v16 = vld [vmem:[#allocation113_spill] sm:$0xff] }
 0xbd2   :  { %11686 = vmatpush3.msra.mxu0 %v16126_v42  ;;  %11644 = vmatprep.subr.mxu1 %v15971_v37  ;;  %v16133_v42 = vld [vmem:[#allocation114_spill] sm:$0xff] }
 0xbd3   :  { %11687 = vmatprep.subr.mxu0 %v16127_v19  ;;  %11645 = vmatpush3.msra.mxu1 %v15974_v24  ;;  %v8801_v19 = vand.u32 4294901760, %v15076_v44 }
 0xbd4   :  { %11688 = vmatpush3.msra.mxu0 %v16128_v60  ;;  %11646 = vmatprep.subr.mxu1 %v15976_v3  ;;  %v16135_v60 = vand.u32 4294901760, %v15004_v9 }
 0xbd5   :  { %11689 = vmatprep.subr.mxu0 %v16129_v52  ;;  %11647 = vmatpush3.msra.mxu1 %v15978_v5  ;;  %v8802_v52 = vsub.f32 %v15076_v44, %v8801_v19 }
 0xbd6   :  { %11690 = vmatpush3.msra.mxu0 %v16130_v30  ;;  %11648 = vmatprep.subr.mxu1 %v15980_v12 }
 0xbd7   :  { %11691 = vmatprep.subr.mxu0 %v16131_v0  ;;  %11649 = vmatpush3.msra.mxu1 %v15982_v34  ;;  %v8803_v30 = vand.u32 4294901760, %v8802_v52  ;;  %v16136_v0 = vld [vmem:[#allocation4_spill] sm:$0xff]  ;;  %v16153_v52 = vld [vmem:[#allocation98_spill] sm:$0xff] }
 0xbd8   :  { %11692 = vmatpush3.msra.mxu0 %v16132_v16  ;;  %11650 = vmatprep.subr.mxu1 %v15984_v33  ;;  %v16147_v16 = vld [vmem:[#allocation72_spill] sm:$0xff] }
 0xbd9   :  { %11693 = vmatprep.subr.mxu0 %v16133_v42  ;;  %11651 = vmatpush3.msra.mxu1 %v15987_v55  ;;  %v16148_v42 = vld [vmem:[#allocation76_spill] sm:$0xff] }
 0xbda   :  { %11694 = vmatpush3.msra.mxu0 %v16134_v27  ;;  %11652 = vmatprep.subr.mxu1 %v15989_v62  ;;  %v16149_v27 = vld [vmem:[#allocation79_spill] sm:$0xff] }
 0xbdb   :  { %9036 = vmatmul.mubr.f32.vlgmr.msra.gmra.mxu0 %v15065_v18  ;;  %11733 = vmatprep.subr.mxu0 %v15829_v39 }
 0xbdc   :  { %11653 = vmatpush3.msra.mxu1 %v15991_v22  ;;  %11734 = vmatpush3.msra.mxu0 %v13595_v20 }
 0xbdd   :  { %9278 = vmatprep.mubr.f32.mxu0 %v16135_v60  ;;  %11654 = vmatprep.subr.mxu1 %v15993_v35  ;;  %v16152_v60 = vld [vmem:[#allocation94_spill] sm:$0xff] }
 0xbde   :  { %11735 = vmatprep.subr.mxu0 %v13600_v21  ;;  %11655 = vmatpush3.msra.mxu1 %v15995_v23 }
 0xbdf   :  { %11736 = vmatpush3.msra.mxu0 %v13608_v32  ;;  %11656 = vmatprep.subr.mxu1 %v15997_v2 }
 0xbe0   :  { %11737 = vmatprep.subr.mxu0 %v13617_v6  ;;  %11657 = vmatpush3.msra.mxu1 %v15999_v25 }
 0xbe1   :  { %11738 = vmatpush3.msra.mxu0 %v13629_v43  ;;  %11658 = vmatprep.subr.mxu1 %v16001_v56 }
 0xbe2   :  { %11739 = vmatprep.subr.mxu0 %v13641_v57  ;;  %11659 = vmatpush3.msra.mxu1 %v16003_v47 }
 0xbe3   :  { %11740 = vmatpush3.msra.mxu0 %v13655_v28  ;;  %8804 = vmatmul.mubr.f32.vlgmr.msra.gmra.mxu1 %v8803_v30 }
 0xbe4   :  { %11698 = vmatprep.subr.mxu1 %v16136_v0  ;;  %11741 = vmatprep.subr.mxu0 %v13669_v31 }
 0xbe5   :  { %11699 = vmatpush3.msra.mxu1 %v16044_v14  ;;  %9171 = vmatprep.mubr.f32.mxu1 %v15004_v9  ;;  %v16137_v14 = vld [vmem:[#allocation30_spill] sm:$0xff] }
 0xbe6   :  { %11742 = vmatpush3.msra.mxu0 %v13711_v38  ;;  %11700 = vmatprep.subr.mxu1 %v16045_v54  ;;  %v16138_v54 = vld [vmem:[#allocation33_spill] sm:$0xff]  ;;  %v16146_v9 = vld [vmem:[#allocation66_spill] sm:$0xff] }
 0xbe7   :  { %11743 = vmatprep.subr.mxu0 %v13724_v11  ;;  %11701 = vmatpush3.msra.mxu1 %v16046_v4  ;;  %v16139_v4 = vld [vmem:[#allocation36_spill] sm:$0xff] }
 0xbe8   :  { %11744 = vmatpush3.msra.mxu0 %v13737_v17  ;;  %11702 = vmatprep.subr.mxu1 %v16047_v51  ;;  %v16140_v51 = vld [vmem:[#allocation38_spill] sm:$0xff] }
 0xbe9   :  { %11745 = vmatprep.subr.mxu0 %v13751_v41  ;;  %11703 = vmatpush3.msra.mxu1 %v16048_v50  ;;  %v16141_v50 = vld [vmem:[#allocation40_spill] sm:$0xff] }
 0xbea   :  { %11746 = vmatpush3.msra.mxu0 %v13766_v46  ;;  %11704 = vmatprep.subr.mxu1 %v16049_v49  ;;  %v16142_v49 = vld [vmem:[#allocation44_spill] sm:$0xff] }
 0xbeb   :  { %11747 = vmatprep.subr.mxu0 %v13781_v58  ;;  %11705 = vmatpush3.msra.mxu1 %v16050_v61  ;;  %v16143_v61 = vld [vmem:[#allocation47_spill] sm:$0xff] }
 0xbec   :  { %11748 = vmatpush3.msra.mxu0 %v13793_v36  ;;  %11706 = vmatprep.subr.mxu1 %v16051_v63  ;;  %v16144_v63 = vld [vmem:[#allocation55_spill] sm:$0xff] }
 0xbed   :  { %11749 = vmatprep.subr.mxu0 %v15971_v37  ;;  %11707 = vmatpush3.msra.mxu1 %v16052_v1  ;;  %v16145_v1 = vld [vmem:[#allocation58_spill] sm:$0xff] }
 0xbee   :  { %11750 = vmatpush3.msra.mxu0 %v15974_v24  ;;  %11708 = vmatprep.subr.mxu1 %v16137_v14 }
 0xbef   :  { %11751 = vmatprep.subr.mxu0 %v15976_v3  ;;  %11709 = vmatpush3.msra.mxu1 %v16138_v54 }
 0xbf0   :  { %11752 = vmatpush3.msra.mxu0 %v15978_v5  ;;  %11710 = vmatprep.subr.mxu1 %v16139_v4 }
 0xbf1   :  { %11753 = vmatprep.subr.mxu0 %v15980_v12  ;;  %11711 = vmatpush3.msra.mxu1 %v16140_v51 }
 0xbf2   :  { %11754 = vmatpush3.msra.mxu0 %v15982_v34  ;;  %11712 = vmatprep.subr.mxu1 %v16141_v50 }
 0xbf3   :  { %11755 = vmatprep.subr.mxu0 %v15984_v33  ;;  %11713 = vmatpush3.msra.mxu1 %v16142_v49 }
 0xbf4   :  { %11756 = vmatpush3.msra.mxu0 %v15987_v55  ;;  %11714 = vmatprep.subr.mxu1 %v16143_v61 }
 0xbf5   :  { %11757 = vmatprep.subr.mxu0 %v15989_v62  ;;  %11715 = vmatpush3.msra.mxu1 %v16144_v63 }
 0xbf6   :  { %11758 = vmatpush3.msra.mxu0 %v15991_v22  ;;  %11716 = vmatprep.subr.mxu1 %v16145_v1 }
 0xbf7   :  { %11759 = vmatprep.subr.mxu0 %v15993_v35  ;;  %11717 = vmatpush3.msra.mxu1 %v16062_v8  ;;  %v16150_v8 = vld [vmem:[#allocation87_spill] sm:$0xff] }
 0xbf8   :  { %11760 = vmatpush3.msra.mxu0 %v15995_v23  ;;  %11718 = vmatprep.subr.mxu1 %v16146_v9 }
 0xbf9   :  { %11761 = vmatprep.subr.mxu0 %v15997_v2  ;;  %11719 = vmatpush3.msra.mxu1 %v16064_v13  ;;  %v16151_v13 = vld [vmem:[#allocation90_spill] sm:$0xff] }
 0xbfa   :  { %11762 = vmatpush3.msra.mxu0 %v15999_v25  ;;  %11720 = vmatprep.subr.mxu1 %v16147_v16 }
 0xbfb   :  { %11763 = vmatprep.subr.mxu0 %v16001_v56  ;;  %11721 = vmatpush3.msra.mxu1 %v16148_v42 }
 0xbfc   :  { %11764 = vmatpush3.msra.mxu0 %v16003_v47  ;;  %11722 = vmatprep.subr.mxu1 %v16149_v27 }
 0xbfd   :  { %9282 = vmatmul.mubr.f32.vlgmr.msra.gmra.mxu0 %v8801_v19  ;;  %11803 = vmatprep.subr.mxu0 %v15829_v39  ;;  %v16169_v39 = vld [vmem:[#allocation46_spill] sm:$0xff] }
 0xbfe   :  { %11723 = vmatpush3.msra.mxu1 %v16150_v8  ;;  %11804 = vmatpush3.msra.mxu0 %v13595_v20  ;;  %v16154_v20 = vld [vmem:[#allocation107_spill] sm:$0xff] }
 0xbff   :  { %9552 = vmatprep.mubr.f32.mxu0 %v14993_v48  ;;  %11724 = vmatprep.subr.mxu1 %v16151_v13 }
 0xc00   :  { %11805 = vmatprep.subr.mxu0 %v13600_v21  ;;  %11725 = vmatpush3.msra.mxu1 %v16152_v60  ;;  %v16155_v21 = vld [vmem:[#allocation5_spill] sm:$0xff] }
 0xc01   :  { %11806 = vmatpush3.msra.mxu0 %v13608_v32  ;;  %11726 = vmatprep.subr.mxu1 %v16153_v52  ;;  %v16156_v32 = vld [vmem:[#allocation9_spill] sm:$0xff] }
 0xc02   :  { %11807 = vmatprep.subr.mxu0 %v13617_v6  ;;  %11727 = vmatpush3.msra.mxu1 %v16073_v40  ;;  %v16157_v6 = vld [vmem:[#allocation11_spill] sm:$0xff] }
 0xc03   :  { %11808 = vmatpush3.msra.mxu0 %v13629_v43  ;;  %11728 = vmatprep.subr.mxu1 %v16074_v53  ;;  %v16158_v43 = vld [vmem:[#allocation13_spill] sm:$0xff]  ;;  %v16189_v53 = vld [vmem:[#allocation126_spill] sm:$0xff]  ;;  %v16190_v40 = vld [vmem:[#allocation135_spill] sm:$0xff] }
 0xc04   :  { %11809 = vmatprep.subr.mxu0 %v13641_v57  ;;  %11729 = vmatpush3.msra.mxu1 %v16154_v20  ;;  %v16159_v57 = vld [vmem:[#allocation15_spill] sm:$0xff] }
 0xc05   :  { %11810 = vmatpush3.msra.mxu0 %v13655_v28  ;;  %9174 = vmatmul.mubr.f32.vlgmr.msra.gmra.mxu1 %v15076_v44  ;;  %v16160_v28 = vld [vmem:[#allocation18_spill] sm:$0xff] }
 0xc06   :  { %11768 = vmatprep.subr.mxu1 %v16155_v21  ;;  %11811 = vmatprep.subr.mxu0 %v13669_v31  ;;  %v16161_v31 = vld [vmem:[#allocation21_spill] sm:$0xff] }
 0xc07   :  { %11769 = vmatpush3.msra.mxu1 %v16156_v32  ;;  %9448 = vmatprep.mubr.f32.mxu1 %v14993_v48  ;;  %v16186_v48 = vld [vmem:[#allocation2_spill] sm:$0xff] }
 0xc08   :  { %11812 = vmatpush3.msra.mxu0 %v13711_v38  ;;  %11770 = vmatprep.subr.mxu1 %v16157_v6  ;;  %v16162_v38 = vld [vmem:[#allocation24_spill] sm:$0xff] }
 0xc09   :  { %11813 = vmatprep.subr.mxu0 %v13724_v11  ;;  %11771 = vmatpush3.msra.mxu1 %v16158_v43  ;;  %v16163_v11 = vld [vmem:[#allocation26_spill] sm:$0xff] }
 0xc0a   :  { %11814 = vmatpush3.msra.mxu0 %v13737_v17  ;;  %11772 = vmatprep.subr.mxu1 %v16159_v57  ;;  %v16164_v17 = vld [vmem:[#allocation32_spill] sm:$0xff] }
 0xc0b   :  { %11815 = vmatprep.subr.mxu0 %v13751_v41  ;;  %11773 = vmatpush3.msra.mxu1 %v16160_v28  ;;  %v16165_v41 = vld [vmem:[#allocation35_spill] sm:$0xff] }
 0xc0c   :  { %11816 = vmatpush3.msra.mxu0 %v13766_v46  ;;  %11774 = vmatprep.subr.mxu1 %v16161_v31  ;;  %v16166_v46 = vld [vmem:[#allocation37_spill] sm:$0xff] }
 0xc0d   :  { %11817 = vmatprep.subr.mxu0 %v13781_v58  ;;  %11775 = vmatpush3.msra.mxu1 %v16162_v38  ;;  %v16167_v58 = vld [vmem:[#allocation39_spill] sm:$0xff] }
 0xc0e   :  { %11818 = vmatpush3.msra.mxu0 %v13793_v36  ;;  %11776 = vmatprep.subr.mxu1 %v16163_v11  ;;  %v16168_v36 = vld [vmem:[#allocation43_spill] sm:$0xff] }
 0xc0f   :  { %11819 = vmatprep.subr.mxu0 %v15971_v37  ;;  %11777 = vmatpush3.msra.mxu1 %v16164_v17  ;;  %v16170_v37 = vld [vmem:[#allocation49_spill] sm:$0xff] }
 0xc10   :  { %11820 = vmatpush3.msra.mxu0 %v15974_v24  ;;  %11778 = vmatprep.subr.mxu1 %v16165_v41  ;;  %v16171_v24 = vld [vmem:[#allocation61_spill] sm:$0xff] }
 0xc11   :  { %11821 = vmatprep.subr.mxu0 %v15976_v3  ;;  %11779 = vmatpush3.msra.mxu1 %v16166_v46  ;;  %v16172_v3 = vld [vmem:[#allocation65_spill] sm:$0xff] }
 0xc12   :  { %11822 = vmatpush3.msra.mxu0 %v15978_v5  ;;  %11780 = vmatprep.subr.mxu1 %v16167_v58  ;;  %v16173_v5 = vld [vmem:[#allocation75_spill] sm:$0xff] }
 0xc13   :  { %11823 = vmatprep.subr.mxu0 %v15980_v12  ;;  %11781 = vmatpush3.msra.mxu1 %v16168_v36  ;;  %v16174_v12 = vld [vmem:[#allocation78_spill] sm:$0xff] }
 0xc14   :  { %11824 = vmatpush3.msra.mxu0 %v15982_v34  ;;  %11782 = vmatprep.subr.mxu1 %v16169_v39  ;;  %v16175_v34 = vld [vmem:[#allocation81_spill] sm:$0xff] }
 0xc15   :  { %11825 = vmatprep.subr.mxu0 %v15984_v33  ;;  %11783 = vmatpush3.msra.mxu1 %v16170_v37  ;;  %v16176_v33 = vld [vmem:[#allocation84_spill] sm:$0xff] }
 0xc16   :  { %11826 = vmatpush3.msra.mxu0 %v15987_v55  ;;  %11784 = vmatprep.subr.mxu1 %v16092_v26  ;;  %v16177_v55 = vld [vmem:[#allocation93_spill] sm:$0xff]  ;;  %v16187_v26 = vld [vmem:[#allocation124_spill] sm:$0xff] }
 0xc17   :  { %11827 = vmatprep.subr.mxu0 %v15989_v62  ;;  %11785 = vmatpush3.msra.mxu1 %v16171_v24  ;;  %v16178_v62 = vld [vmem:[#allocation97_spill] sm:$0xff] }
 0xc18   :  { %11828 = vmatpush3.msra.mxu0 %v15991_v22  ;;  %11786 = vmatprep.subr.mxu1 %v16172_v3  ;;  %v16179_v22 = vld [vmem:[#allocation127_spill] sm:$0xff] }
 0xc19   :  { %11829 = vmatprep.subr.mxu0 %v15993_v35  ;;  %11787 = vmatpush3.msra.mxu1 %v16095_v7  ;;  %v16180_v35 = vld [vmem:[#allocation100_spill] sm:$0xff] }
 0xc1a   :  { %11830 = vmatpush3.msra.mxu0 %v15995_v23  ;;  %11788 = vmatprep.subr.mxu1 %v16096_v59  ;;  %v16181_v23 = vld [vmem:[#allocation128_spill] sm:$0xff] }
 0xc1b   :  { %11831 = vmatprep.subr.mxu0 %v15997_v2  ;;  %11789 = vmatpush3.msra.mxu1 %v16173_v5  ;;  %v16184_v2 = vmov 0.0  }
 0xc1c   :  { %11832 = vmatpush3.msra.mxu0 %v15999_v25  ;;  %11790 = vmatprep.subr.mxu1 %v16174_v12  ;;  %v16185_v25 = vld [vmem:[#allocation131_spill] sm:$0xff] }
 0xc1d   :  { %11833 = vmatprep.subr.mxu0 %v16001_v56  ;;  %11791 = vmatpush3.msra.mxu1 %v16175_v34  ;;  %v16182_v56 = vld [vmem:[#allocation129_spill] sm:$0xff] }
 0xc1e   :  { %11834 = vmatpush3.msra.mxu0 %v16003_v47  ;;  %11792 = vmatprep.subr.mxu1 %v16176_v33  ;;  %v16183_v47 = vld [vmem:[#allocation130_spill] sm:$0xff] }
 0xc1f   :  { %9554 = vmatmul.mubr.f32.vlgmr.msra.gmra.mxu0 %v15065_v18  ;;  %11793 = vmatpush3.msra.mxu1 %v16177_v55 }
 0xc20   :  { %11794 = vmatprep.subr.mxu1 %v16178_v62  ;;  %10267 = vmatprep.subr.mxu0 %v16179_v22  ;;  %v7789_v62 = vld [vmem:[%s15372_s12] sm:$0x1] }
 0xc21   :  { %11795 = vmatpush3.msra.mxu1 %v16180_v35  ;;  %10270 = vmatpush1.msra.mxu0 %v16181_v23 }
 0xc22   :  { %11796 = vmatprep.subr.mxu1 %v16104_v45  ;;  %10273 = vmatprep.subr.mxu0 %v16182_v56  ;;  %v16188_v45 = vld [vmem:[#allocation125_spill] sm:$0xff] }
 0xc23   :  { %11797 = vmatpush3.msra.mxu1 %v16105_v15  ;;  %10276 = vmatpush1.msra.mxu0 %v16183_v47 }
 0xc24   :  { %11798 = vmatprep.subr.mxu1 %v16107_v29  ;;  %10309 = vmatprep.mubr.f32.mxu0 %v16184_v2 }
 0xc25   :  { %11799 = vmatpush3.msra.mxu1 %v16109_v10  ;;  %10427 = vmatprep.subr.mxu0 %v16185_v25 }
 0xc26   :  { %9450 = vmatmul.mubr.f32.vlgmr.msra.gmra.mxu1 %v15065_v18  ;;  %9600 = vmatprep.subr.mxu1 %v16186_v48 }
 0xc27   :  { %9602 = vmatpush1.msra.mxu1 %v16187_v26  ;;  %9639 = vmatprep.mubr.f32.mxu1 %v16184_v2 }
 0xc28   :  { %9604 = vmatprep.subr.mxu1 %v16188_v45 }
 0xc29   :  { %9606 = vmatpush1.msra.mxu1 %v16189_v53 }
 0xc2a   :  { %9684 = vmatprep.subr.mxu1 %v16190_v40 }
 0xc36   :  { %v11485_v7 = vpop.f32.mrf.mxu0 }
 0xc38   :  { %v11486_v15 = vpop.f32.mrf.mxu0 }
 0xc39   :  { %v11487_v61 = vadd.f32 %v11486_v15, %v11485_v7  ;;  %v7790_v7 = vld [vmem:[%s15373_s13] sm:$0x1] }
 0xc3e   :  { %v11450_v29 = vpop.f32.mrf.mxu1 }
 0xc40   :  { %v11451_v59 = vpop.f32.mrf.mxu1 }
 0xc41   :  { %v11452_v51 = vadd.f32 %v11451_v59, %v11450_v29 }
 0xc43   :  { %v8176_v9 = vadd.f32 %v11487_v61, %v11452_v51  ;;  %v16191_v51 = vld [vmem:[#allocation132_spill] sm:$0xff]  ;;  %v16194_v61 = vld [vmem:[#allocation134_spill] sm:$0xff] }
 0xc57   :  { %v11555_v44 = vpop.f32.mrf.mxu0 }
 0xc59   :  { %v11556_v30 = vpop.f32.mrf.mxu0 }
 0xc5a   :  { %v11557_v13 = vadd.f32 %v11556_v30, %v11555_v44 }
 0xc5f   :  { %v11520_v10 = vpop.f32.mrf.mxu1 }
 0xc61   :  { %v11521_v19 = vpop.f32.mrf.mxu1 }
 0xc62   :  { %v11522_v63 = vadd.f32 %v11521_v19, %v11520_v10 }
 0xc64   :  { %v8314_v42 = vadd.f32 %v11522_v63, %v8176_v9  ;;  %v16195_v63 = vld [vmem:[#allocation137_spill] sm:$0xff] }
 0xc66   :  { %v8422_v20 = vadd.f32 %v11557_v13, %v8314_v42 }
 0xc79   :  { %v11625_v0 = vpop.f32.mrf.mxu0 }
 0xc7b   :  { %v11626_v4 = vpop.f32.mrf.mxu0 }
 0xc7c   :  { %v11627_v31 = vadd.f32 %v11626_v4, %v11625_v0 }
 0xc81   :  { %v11590_v18 = vpop.f32.mrf.mxu1 }
 0xc83   :  { %v11591_v14 = vpop.f32.mrf.mxu1 }
 0xc84   :  { %v11592_v60 = vadd.f32 %v11591_v14, %v11590_v18 }
 0xc86   :  { %v8590_v43 = vadd.f32 %v11592_v60, %v8422_v20 }
 0xc88   :  { %v8694_v17 = vadd.f32 %v11627_v31, %v8590_v43 }
 0xc8a   :  { %v9559_v37 = vmul.f32 0.001953125, %v8694_v17 }
 0xc8c   :  { %v9561_v12 = vmul.f32 %v9559_v37, %v9559_v37 }
 0xc9b   :  { %v11695_v50 = vpop.f32.mrf.mxu0 }
 0xc9d   :  { %v11696_v16 = vpop.f32.mrf.mxu0 }
 0xc9e   :  { %v11697_v21 = vadd.f32 %v11696_v16, %v11695_v50  ;;  %v16192_v50 = vld [vmem:[#allocation133_spill] sm:$0xff] }
 0xca3   :  { %v11660_v54 = vpop.f32.mrf.mxu1 }
 0xca5   :  { %v11661_v49 = vpop.f32.mrf.mxu1 }
 0xca6   :  { %v11662_v52 = vadd.f32 %v11661_v49, %v11660_v54  ;;  %v16193_v49 = vld [vmem:[#allocation136_spill] sm:$0xff] }
 0xca8   :  { %v9038_v57 = vadd.f32 %v11697_v21, %v11662_v52 }
 0xcbd   :  { %v11765_v27 = vpop.f32.mrf.mxu0 }
 0xcbf   :  { %v11766_v6 = vpop.f32.mrf.mxu0 }
 0xcc0   :  { %v11767_v41 = vadd.f32 %v11766_v6, %v11765_v27 }
 0xcc5   :  { %v11730_v1 = vpop.f32.mrf.mxu1 }
 0xcc7   :  { %v11731_v8 = vpop.f32.mrf.mxu1 }
 0xcc8   :  { %v11732_v32 = vadd.f32 %v11731_v8, %v11730_v1  ;;  %v16196_v1 = vld [vmem:[#allocation138_spill] sm:$0xff] }
 0xcca   :  { %v9176_v38 = vadd.f32 %v11732_v32, %v9038_v57 }
 0xccc   :  { %v9284_v36 = vadd.f32 %v11767_v41, %v9176_v38 }
 0xcdf   :  { %v11835_v28 = vpop.f32.mrf.mxu0 }
 0xce1   :  { %v11836_v46 = vpop.f32.mrf.mxu0 }
 0xce2   :  { %v11837_v24 = vadd.f32 %v11836_v46, %v11835_v28 }
 0xce6   :  { %v11800_v11 = vpop.f32.mrf.mxu1 }
 0xce8   :  { %v11801_v58 = vpop.f32.mrf.mxu1 }
 0xce9   :  { %v11802_v39 = vadd.f32 %v11801_v58, %v11800_v11 }
 0xceb   :  { %v9452_v3 = vadd.f32 %v11802_v39, %v9284_v36 }
 0xced   :  { %v9556_v5 = vadd.f32 %v11837_v24, %v9452_v3 }
 0xcef   :  { %v9560_v34 = vmul.f32 0.001953125, %v9556_v5  ;;  %v16197_v5 = vld [vmem:[#allocation3_spill] sm:$0xff] }
 0xcf1   :  { %v9562_v33 = vsub.f32 %v9560_v34, %v9561_v12 }
 0xcf3   :  { %v9563_v55 = vadd.f32 1e-05, %v9562_v33 }
 0xcf5   :  { %12557 = vrsqrt.f32 %v9563_v55 }
 0xd02   :  { %v12558_v35 = vpop.eup %12557 }
 0xd03   :  { %v9565_v29 = vmul.f32 %v12558_v35, %v7789_v62 }
 0xd05   :  { %v9566_v59 = vmul.f32 %v9565_v29, %v9559_v37  ;;  %v9569_v10 = vsel %vm6619_vm5, %v9565_v29, 0 }
 0xd06   :  { %v9640_v15 = vand.u32 4294901760, %v9569_v10 }
 0xd07   :  { %v9567_v44 = vsub.f32 %v7790_v7, %v9566_v59 }
 0xd08   :  { %v9641_v19 = vsub.f32 %v9569_v10, %v9640_v15  ;;  %v16198_v10 = vld [vmem:[#allocation56_spill] sm:$0xff] }
 0xd09   :  { %v10063_v18 = vsel %vm6619_vm5, %v9567_v44, 0  ;;  %v16199_v44 = vld [vmem:[#allocation63_spill] sm:$0xff] }
 0xd0a   :  { %v15258_v30 = vand.u32 4294901760, %v10063_v18  ;;  %v9642_v0 = vand.u32 4294901760, %v9641_v19 }
 0xd0c   :  { %v10135_v14 = vsub.f32 %v10063_v18, %v15258_v30  ;;  %v9643_v54 = vsub.f32 %v9641_v19, %v9642_v0 }
 0xd0e   :  { %10312 = vmatmul.mubr.f32.vlgmr.msra.gmra.mxu0 %v10135_v14  ;;  %v9644_v4 = vand.u32 4294901760, %v9643_v54 }
 0xd0f   :  { %10431 = vmatpush1.msra.mxu0 %v16191_v51  ;;  %10472 = vmatprep.mubr.f32.mxu0 %v16184_v2 }
 0xd10   :  { %9645 = vmatmul.mubr.f32.vlgmr.msra.gmra.mxu1 %v9644_v4  ;;  %10435 = vmatprep.subr.mxu0 %v16192_v50 }
 0xd11   :  { %9690 = vmatpush1.msra.mxu1 %v16193_v49  ;;  %10439 = vmatpush1.msra.mxu0 %v16194_v61 }
 0xd12   :  { %9696 = vmatprep.subr.mxu1 %v16195_v63  ;;  %10474 = vmatmul.mubr.f32.vlgmr.msra.gmra.mxu0 %v15258_v30 }
 0xd13   :  { %9702 = vmatpush1.msra.mxu1 %v16196_v1  ;;  %9735 = vmatprep.mubr.f32.mxu1 %v16184_v2 }
 0xd14   :  { %9773 = vmatprep.subr.mxu1 %v16179_v22  ;;  %9737 = vmatmul.mubr.f32.vlgmr.msra.gmra.mxu1 %v9640_v15  ;;  %v10136_v22 = vand.u32 4294901760, %v10135_v14 }
 0xd15   :  { %9776 = vmatpush1.msra.mxu1 %v16181_v23  ;;  %9815 = vmatprep.mubr.f32.mxu1 %v16184_v2 }
 0xd16   :  { %9779 = vmatprep.subr.mxu1 %v16182_v56  ;;  %v10137_v23 = vsub.f32 %v10135_v14, %v10136_v22  ;;  %v16201_v14 = vld [vmem:[#allocation82_spill] sm:$0xff] }
 0xd17   :  { %9782 = vmatpush1.msra.mxu1 %v16183_v47 }
 0xd18   :  { %9853 = vmatprep.subr.mxu1 %v16186_v48  ;;  %9818 = vmatmul.mubr.f32.vlgmr.msra.gmra.mxu1 %v9641_v19  ;;  %v10138_v56 = vand.u32 4294901760, %v10137_v23  ;;  %v16203_v23 = vld [vmem:[#allocation67_spill] sm:$0xff] }
 0xd19   :  { %9855 = vmatpush1.msra.mxu1 %v16187_v26  ;;  %9892 = vmatprep.mubr.f32.mxu1 %v16184_v2 }
 0xd1a   :  { %9857 = vmatprep.subr.mxu1 %v16188_v45 }
 0xd1b   :  { %9859 = vmatpush1.msra.mxu1 %v16189_v53 }
 0xd1c   :  { %9933 = vmatprep.subr.mxu1 %v16185_v25  ;;  %9896 = vmatmul.mubr.f32.vlgmr.msra.gmra.mxu1 %v9642_v0 }
 0xd1d   :  { %9937 = vmatpush1.msra.mxu1 %v16191_v51  ;;  %9978 = vmatprep.mubr.f32.mxu1 %v16184_v2 }
 0xd1e   :  { %9941 = vmatprep.subr.mxu1 %v16192_v50  ;;  %v16202_v50 = vld [vmem:[#allocation59_spill] sm:$0xff] }
 0xd1f   :  { %9945 = vmatpush1.msra.mxu1 %v16194_v61 }
 0xd20   :  { %10015 = vmatprep.subr.mxu1 %v16186_v48  ;;  %9980 = vmatmul.mubr.f32.vlgmr.msra.gmra.mxu1 %v9640_v15 }
 0xd21   :  { %10017 = vmatpush1.msra.mxu1 %v16187_v26  ;;  %10054 = vmatprep.mubr.f32.mxu1 %v16184_v2 }
 0xd22   :  { %10019 = vmatprep.subr.mxu1 %v16188_v45 }
 0xd23   :  { %10021 = vmatpush1.msra.mxu1 %v16189_v53 }
 0xd24   :  { %10094 = vmatprep.subr.mxu1 %v16186_v48  ;;  %10056 = vmatmul.mubr.f32.vlgmr.msra.gmra.mxu1 %v9640_v15 }
 0xd25   :  { %10096 = vmatpush1.msra.mxu1 %v16187_v26  ;;  %10133 = vmatprep.mubr.f32.mxu1 %v16184_v2 }
 0xd26   :  { %10098 = vmatprep.subr.mxu1 %v16188_v45 }
 0xd27   :  { %10100 = vmatpush1.msra.mxu1 %v16189_v53 }
 0xd28   :  { %10178 = vmatprep.subr.mxu1 %v16190_v40  ;;  %10139 = vmatmul.mubr.f32.vlgmr.msra.gmra.mxu1 %v10138_v56 }
 0xd29   :  { %10184 = vmatpush1.msra.mxu1 %v16193_v49  ;;  %10229 = vmatprep.mubr.f32.mxu1 %v16184_v2 }
 0xd2a   :  { %10190 = vmatprep.subr.mxu1 %v16195_v63 }
 0xd2b   :  { %10196 = vmatpush1.msra.mxu1 %v16196_v1 }
 0xd2c   :  { %10347 = vmatprep.subr.mxu1 %v16186_v48  ;;  %10231 = vmatmul.mubr.f32.vlgmr.msra.gmra.mxu1 %v15258_v30 }
 0xd2d   :  { %10349 = vmatpush1.msra.mxu1 %v16187_v26  ;;  %10386 = vmatprep.mubr.f32.mxu1 %v16184_v2 }
 0xd2e   :  { %10351 = vmatprep.subr.mxu1 %v16188_v45 }
 0xd2f   :  { %10353 = vmatpush1.msra.mxu1 %v16189_v53 }
 0xd30   :  { %10509 = vmatprep.subr.mxu1 %v16186_v48  ;;  %10390 = vmatmul.mubr.f32.vlgmr.msra.gmra.mxu1 %v10136_v22 }
 0xd31   :  { %10511 = vmatpush1.msra.mxu1 %v16187_v26  ;;  %10548 = vmatprep.mubr.f32.mxu1 %v16184_v2 }
 0xd32   :  { %10513 = vmatprep.subr.mxu1 %v16188_v45 }
 0xd33   :  { %10515 = vmatpush1.msra.mxu1 %v16189_v53 }
 0xd34   :  { %10550 = vmatmul.mubr.f32.vlgmr.msra.gmra.mxu1 %v15258_v30  ;;  %v16200_v30 = vld [vmem:[#allocation70_spill] sm:$0xff] }
 0xdce   :  { %v10313_v2 = vpop.f32.mrf.mxu0 }
 0xdd0   :  { %v9646_v47 = vpop.f32.mrf.mxu1  ;;  %v10315_v43 = vpop.f32.mrf.mxu0 }
 0xdd2   :  { %v9648_v25 = vpop.f32.mrf.mxu1  ;;  %v10475_v36 = vpop.f32.mrf.mxu0 }
 0xdd4   :  { %v9738_v40 = vpop.f32.mrf.mxu1  ;;  %v10477_v62 = vpop.f32.mrf.mxu0 }
 0xdd5   :  { %v9739_v26 = vadd.f32 %v9738_v40, %v9646_v47  ;;  %v16204_v47 = vld [vmem:[#allocation73_spill] sm:$0xff] }
 0xdd6   :  { %v9740_v9 = vpop.f32.mrf.mxu1  ;;  %v16205_v40 = vld [vmem:[#allocation85_spill] sm:$0xff] }
 0xdd7   :  { %v9741_v20 = vadd.f32 %v9740_v9, %v9648_v25 }
 0xdd8   :  { %v9819_v16 = vpop.f32.mrf.mxu1 }
 0xdd9   :  { %v9820_v45 = vadd.f32 %v9819_v16, %v9739_v26  ;;  %v16209_v26 = vld [vmem:[#allocation20_spill] sm:$0xff] }
 0xdda   :  { %v9821_v42 = vpop.f32.mrf.mxu1 }
 0xddb   :  { %v9822_v53 = vadd.f32 %v9821_v42, %v9741_v20  ;;  %v16206_v42 = vld [vmem:[#allocation6_spill] sm:$0xff] }
 0xddc   :  { %v9897_v27 = vpop.f32.mrf.mxu1 }
 0xddd   :  { %v9898_v32 = vadd.f32 %v9897_v27, %v9820_v45 }
 0xdde   :  { %v9899_v8 = vpop.f32.mrf.mxu1 }
 0xddf   :  { %v9900_v57 = vadd.f32 %v9899_v8, %v9822_v53  ;;  %v16207_v8 = vld [vmem:[#allocation41_spill] sm:$0xff] }
 0xde0   :  { %v9981_v48 = vpop.f32.mrf.mxu1 }
 0xde1   :  { %v9982_v28 = vadd.f32 %v9981_v48, %v9898_v32 }
 0xde2   :  { %v9983_v13 = vpop.f32.mrf.mxu1 }
 0xde3   :  { %v9984_v11 = vadd.f32 %v9983_v13, %v9900_v57  ;;  %v16208_v13 = vld [vmem:[#allocation17_spill] sm:$0xff]  ;;  %v16210_v57 = vld [vmem:[#allocation50_spill] sm:$0xff] }
 0xde4   :  { %v10057_v60 = vpop.f32.mrf.mxu1 }
 0xde5   :  { %v10058_v17 = vadd.f32 %v10057_v60, %v9982_v28 }
 0xde6   :  { %v10059_v52 = vpop.f32.mrf.mxu1 }
 0xde7   :  { %v10060_v39 = vadd.f32 %v10059_v52, %v9984_v11  ;;  %v10559_v12 = vrot.slane %v10058_v17, %v16197_v5  ;;  %v16212_v11 = vld [vmem:[#allocation53_spill] sm:$0xff] }
 0xde8   :  { %v10140_v21 = vpop.f32.mrf.mxu1 }
 0xde9   :  { %v10563_v35 = vrot.slane %v10060_v39, %v16197_v5  ;;  %v10564_v15 = vmul.f32 %v10559_v12, %v16198_v10  ;;  %v10566_v19 = vmul.f32 %v10559_v12, %v16199_v44  ;;  %v10568_v0 = vmul.f32 %v10559_v12, %v16200_v30 }
 0xdea   :  { %v10142_v6 = vpop.f32.mrf.mxu1  ;;  %v10570_v54 = vmul.f32 %v10559_v12, %v16201_v14 }
 0xdeb   :  { %v10565_v49 = vmul.f32 %v10563_v35, %v16202_v50  ;;  %v10567_v56 = vmul.f32 %v10563_v35, %v16203_v23  ;;  %v10569_v25 = vmul.f32 %v10563_v35, %v16204_v47  ;;  %v10571_v9 = vmul.f32 %v10563_v35, %v16205_v40 }
 0xdec   :  { %v10232_v31 = vpop.f32.mrf.mxu1 }
 0xded   :  { %v10233_v38 = vadd.f32 %v10232_v31, %v10140_v21  ;;  %v16211_v31 = vld [vmem:[#allocation23_spill] sm:$0xff] }
 0xdee   :  { %v10234_v41 = vpop.f32.mrf.mxu1 }
 0xdef   :  { %v10235_v46 = vadd.f32 %v10234_v41, %v10142_v6  ;;  %v10314_v58 = vadd.f32 %v10313_v2, %v10233_v38  ;;  %v16213_v41 = vld [vmem:[#allocation25_spill] sm:$0xff] }
 0xdf0   :  { %v10391_v37 = vpop.f32.mrf.mxu1 }
 0xdf1   :  { %v10392_v24 = vadd.f32 %v10391_v37, %v10314_v58  ;;  %v10316_v3 = vadd.f32 %v10315_v43, %v10235_v46 }
 0xdf2   :  { %v10393_v34 = vpop.f32.mrf.mxu1 }
 0xdf3   :  { %v10394_v33 = vadd.f32 %v10393_v34, %v10316_v3  ;;  %v10476_v55 = vadd.f32 %v10475_v36, %v10392_v24 }
 0xdf4   :  { %v10551_v29 = vpop.f32.mrf.mxu1 }
 0xdf5   :  { %v10552_v7 = vadd.f32 %v10551_v29, %v10476_v55  ;;  %v10478_v59 = vadd.f32 %v10477_v62, %v10394_v33 }
 0xdf6   :  { %v10553_v18 = vpop.f32.mrf.mxu1 }
 0xdf7   :  { %v10575_v4 = vrot.slane %v10552_v7, %v16197_v5  ;;  %v10554_v51 = vadd.f32 %v10553_v18, %v10478_v59 }
 0xdf9   :  { %v10580_v61 = vadd.f32 %v10575_v4, %v10564_v15  ;;  %v10582_v63 = vadd.f32 %v10575_v4, %v10566_v19  ;;  %v10584_v1 = vadd.f32 %v10575_v4, %v10568_v0  ;;  %v10586_v22 = vadd.f32 %v10575_v4, %v10570_v54 }
 0xdfa   :  { %v10579_v16 = vrot.slane %v10554_v51, %v16197_v5 }
 0xdfb   :  { %v10588_v27 = vadd.f32 %v10580_v61, %v16206_v42  ;;  %v10590_v48 = vadd.f32 %v10582_v63, %v16207_v8  ;;  %v10592_v60 = vadd.f32 %v10584_v1, %v16208_v13  ;;  %v10594_v52 = vadd.f32 %v10586_v22, %v16209_v26 }
 0xdfc   :  { %v10581_v2 = vadd.f32 %v10579_v16, %v10565_v49  ;;  %v10583_v20 = vadd.f32 %v10579_v16, %v10567_v56  ;;  %v10585_v45 = vadd.f32 %v10579_v16, %v10569_v25  ;;  %v10587_v21 = vadd.f32 %v10579_v16, %v10571_v9 }
 0xdfd   :  { %v10596_v53 = vmax.f32 %v10588_v27, 0.0  ;;  %v10598_v32 = vmax.f32 %v10590_v48, 0.0  ;;  %v10600_v6 = vmax.f32 %v10592_v60, 0.0  ;;  %v10602_v43 = vmax.f32 %v10594_v52, 0.0 }
 0xdfe   :  { %v10589_v28 = vadd.f32 %v10581_v2, %v16210_v57  ;;  %v10591_v38 = vadd.f32 %v10583_v20, %v16211_v31  ;;  %v10593_v17 = vadd.f32 %v10585_v45, %v16212_v11  ;;  %v10595_v46 = vadd.f32 %v10587_v21, %v16213_v41 }
 0xdff   :  { %10604 = vst [vmem:[%s15374_s18] sm:$0xff] %v10596_v53  ;;  %10606 = vst [vmem:[%s15374_s18 + $0x10] sm:$0xff] %v10598_v32 }
 0xe00   :  { %10608 = vst [vmem:[%s15374_s18 + $0x20] sm:$0xff] %v10600_v6  ;;  %10610 = vst [vmem:[%s15374_s18 + $0x30] sm:$0xff] %v10602_v43  ;;  %v10597_v58 = vmax.f32 %v10589_v28, 0.0  ;;  %v10599_v36 = vmax.f32 %v10591_v38, 0.0  ;;  %v10601_v39 = vmax.f32 %v10593_v17, 0.0  ;;  %v10603_v37 = vmax.f32 %v10595_v46, 0.0 }
 0xe02   :  { %10605 = vst [vmem:[%s15374_s18 + $0x8] sm:$0xff] %v10597_v58  ;;  %10607 = vst [vmem:[%s15374_s18 + $0x18] sm:$0xff] %v10599_v36 }
 0xe03   :  { %10609 = vst [vmem:[%s15374_s18 + $0x28] sm:$0xff] %v10601_v39  ;;  %10611 = vst [vmem:[%s15374_s18 + $0x38] sm:$0xff] %v10603_v37 }

</bundles_post_ra>
